<compile_context>
chip_gen: v7x
topology: tpu7x:2x2x1
jax: 0.10.0
libtpu: 0.0.40
codegen_flags: <defaults>
</compile_context>

<pallas_src>
import functools
import math

import jax
import jax.numpy as jnp
import numpy as np
from jax.experimental import pallas as pl
from jax.experimental.pallas import tpu as pltpu


def attn_classifier_kernel(x_ref, wq_ref, wk_ref, wv_ref, bq_ref, bk_ref,
                           bv_ref, wo_ref, bo_ref, wp_ref, bp_ref, out_ref,
                           *, S, B, num_heads, num_layers):
    """Fused multi-head self-attention (over the batch axis, per position) +
    flatten + linear classifier.

    x_ref : (S*B, E)   tokens, row t = s*B + b
    wq/wk/wv_ref : (nh, E, d)   per-head input projections (already transposed)
    bq/bk/bv_ref : (nh, 1, d)
    wo_ref : (nh, d, E)         per-head slices of W_out^T
    bo_ref : (1, E)
    wp_ref : (S, E, CP)         classifier weight, rearranged + lane-padded
    bp_ref : (1, CP)
    out_ref: (B, CP)
    """
    E = wo_ref.shape[-1]
    d = wq_ref.shape[-1]
    scale = 1.0 / math.sqrt(d)

    x2 = x_ref[...]                                            # (S*B, E)

    # nn.ModuleList([m] * n) shares one set of weights across all layers.
    for _ in range(num_layers):
        y2 = jnp.zeros((S * B, E), jnp.float32)
        for h in range(num_heads):
            q = (jnp.dot(x2, wq_ref[h], preferred_element_type=jnp.float32)
                 + bq_ref[h]).reshape(S, B, d)
            k = (jnp.dot(x2, wk_ref[h], preferred_element_type=jnp.float32)
                 + bk_ref[h]).reshape(S, B, d)
            v = (jnp.dot(x2, wv_ref[h], preferred_element_type=jnp.float32)
                 + bv_ref[h]).reshape(S, B, d)

            # attention over the L(=batch) axis, batched over positions s
            scores = jnp.einsum('sid,sjd->sij', q, k,
                                preferred_element_type=jnp.float32) * scale
            m = jnp.max(scores, axis=-1, keepdims=True)
            e = jnp.exp(scores - m)
            p = e / jnp.sum(e, axis=-1, keepdims=True)
            o = jnp.einsum('sij,sjd->sid', p, v,
                           preferred_element_type=jnp.float32)  # (S, B, d)

            # out-projection, accumulated per head (avoids a lane concat)
            y2 = y2 + jnp.dot(o.reshape(S * B, d), wo_ref[h],
                              preferred_element_type=jnp.float32)
        x2 = y2 + bo_ref[...]                                   # (S*B, E)

    # flatten(B, S*E) @ W_proj^T folded as a per-s accumulation so no
    # (S,B,E)->(B,S,E) transpose is needed inside the kernel.
    x3 = x2.reshape(S, B, E)
    acc = jnp.dot(x3[0], wp_ref[0], preferred_element_type=jnp.float32)
    for s in range(1, S):
        acc = acc + jnp.dot(x3[s], wp_ref[s],
                            preferred_element_type=jnp.float32)
    out_ref[...] = (acc + bp_ref[...]).astype(out_ref.dtype)


@functools.partial(jax.jit, static_argnames=("num_heads", "num_attn_layers"))
def attn_text_classifier(data, mask, emb_table, wq, wk, wv, bq, bk, bv,
                         wo, bo, w_proj, b_proj, *, num_heads,
                         num_attn_layers=1):
    """Forward pass matching AttnTextClassifier (eval mode)."""
    B, S = data.shape
    E = emb_table.shape[1]
    C = w_proj.shape[0]
    nh = num_heads
    d = E // nh
    CP = 128                       # lane-dense padded classifier width

    # --- plain-JAX glue: masking + embedding gather, directly in the
    # attention-major (S, B, E) order used by the kernel (token row = s*B + b).
    ids = (data * mask).astype(jnp.int32)
    x2d = emb_table[ids.T].reshape(S * B, E)                    # (S*B, E)

    # --- weight re-layout (free, done once per call under jit)
    def split_heads_in(w):        # (E_out, E_in) -> (nh, E_in, d)
        return jnp.transpose(w.reshape(nh, d, E), (0, 2, 1))

    wq_h = split_heads_in(wq)
    wk_h = split_heads_in(wk)
    wv_h = split_heads_in(wv)
    bq_h = bq.reshape(nh, 1, d)
    bk_h = bk.reshape(nh, 1, d)
    bv_h = bv.reshape(nh, 1, d)
    wo_h = jnp.transpose(wo.reshape(E, nh, d), (1, 2, 0))       # (nh, d, E)
    bo2 = bo.reshape(1, E)

    wp3 = jnp.transpose(w_proj.reshape(C, S, E), (1, 2, 0))     # (S, E, C)
    wp3 = jnp.pad(wp3, ((0, 0), (0, 0), (0, CP - C)))           # (S, E, CP)
    bp2 = jnp.pad(b_proj, (0, CP - C)).reshape(1, CP)

    kernel = functools.partial(attn_classifier_kernel, S=S, B=B,
                               num_heads=nh, num_layers=num_attn_layers)

    out_p = pl.pallas_call(
        kernel,
        out_shape=jax.ShapeDtypeStruct((B, CP), jnp.float32),
        grid_spec=pltpu.PrefetchScalarGridSpec(
            num_scalar_prefetch=0,
            grid=(1,),
            in_specs=[
                pl.BlockSpec((S * B, E), lambda i: (0, 0)),      # tokens
                pl.BlockSpec((nh, E, d), lambda i: (0, 0, 0)),   # Wq (per head)
                pl.BlockSpec((nh, E, d), lambda i: (0, 0, 0)),   # Wk
                pl.BlockSpec((nh, E, d), lambda i: (0, 0, 0)),   # Wv
                pl.BlockSpec((nh, 1, d), lambda i: (0, 0, 0)),   # bq
                pl.BlockSpec((nh, 1, d), lambda i: (0, 0, 0)),   # bk
                pl.BlockSpec((nh, 1, d), lambda i: (0, 0, 0)),   # bv
                pl.BlockSpec((nh, d, E), lambda i: (0, 0, 0)),   # Wo (per head)
                pl.BlockSpec((1, E), lambda i: (0, 0)),          # bo
                pl.BlockSpec((S, E, CP), lambda i: (0, 0, 0)),   # W_proj (padded)
                pl.BlockSpec((1, CP), lambda i: (0, 0)),         # b_proj (padded)
            ],
            out_specs=pl.BlockSpec((B, CP), lambda i: (0, 0)),
        ),
        compiler_params=pltpu.CompilerParams(
            dimension_semantics=("arbitrary",)),
    )(x2d, wq_h, wk_h, wv_h, bq_h, bk_h, bv_h, wo_h, bo2, wp3, bp2)

    return out_p[:, :C]


def reference_forward(data, mask, emb_table, wq, wk, wv, bq, bk, bv, wo, bo,
                      w_proj, b_proj, *, num_heads, num_attn_layers=1):
    """Pure-JAX reference mirroring the PyTorch forward (eval mode)."""
    ids = data * mask
    x = emb_table[ids]                         # (B, S, E) == (L, N, E)
    B, S, E = x.shape
    d = E // num_heads
    scale = 1.0 / math.sqrt(d)
    for _ in range(num_attn_layers):           # shared weights across layers
        q = x @ wq.T + bq
        k = x @ wk.T + bk
        v = x @ wv.T + bv
        qh = q.reshape(B, S, num_heads, d)
        kh = k.reshape(B, S, num_heads, d)
        vh = v.reshape(B, S, num_heads, d)
        scores = jnp.einsum('ishd,jshd->shij', qh, kh) * scale
        p = jax.nn.softmax(scores, axis=-1)
        o = jnp.einsum('shij,jshd->ishd', p, vh).reshape(B, S, E)
        x = o @ wo.T + bo
    flat = x.reshape(B, S * E)
    # dropout is identity in eval mode; self.softmax is never applied
    return flat @ w_proj.T + b_proj


if __name__ == "__main__":
    # small shapes consistent with the module; num_heads=4 so it divides E=32
    # (the module default num_heads=10 would require E % 10 == 0).
    VOCAB, E, NH, C = 50, 32, 4, 2
    B, S = 8, 8
    NUM_LAYERS = 1

    key = jax.random.PRNGKey(0)
    k = jax.random.split(key, 13)

    data = jax.random.randint(k[0], (B, S), 0, VOCAB, dtype=jnp.int32)
    mask = (jax.random.uniform(k[1], (B, S)) > 0.2).astype(jnp.int32)

    emb_table = jax.random.normal(k[2], (VOCAB, E), jnp.float32) * 0.1
    # nn.MultiheadAttention params (in_proj split into q/k/v, plus out_proj)
    wq = jax.random.normal(k[3], (E, E), jnp.float32) * 0.1
    wk = jax.random.normal(k[4], (E, E), jnp.float32) * 0.1
    wv = jax.random.normal(k[5], (E, E), jnp.float32) * 0.1
    bq = jax.random.normal(k[6], (E,), jnp.float32) * 0.1
    bk = jax.random.normal(k[7], (E,), jnp.float32) * 0.1
    bv = jax.random.normal(k[8], (E,), jnp.float32) * 0.1
    wo = jax.random.normal(k[9], (E, E), jnp.float32) * 0.1
    bo = jax.random.normal(k[10], (E,), jnp.float32) * 0.1
    # LazyLinear(num_classes) materializes as (C, S*E)
    w_proj = jax.random.normal(k[11], (C, S * E), jnp.float32) * 0.1
    b_proj = jax.random.normal(k[12], (C,), jnp.float32) * 0.1

    out = attn_text_classifier(data, mask, emb_table, wq, wk, wv, bq, bk, bv,
                               wo, bo, w_proj, b_proj, num_heads=NH,
                               num_attn_layers=NUM_LAYERS)
    out = jax.block_until_ready(out)

    ref = reference_forward(data, mask, emb_table, wq, wk, wv, bq, bk, bv,
                            wo, bo, w_proj, b_proj, num_heads=NH,
                            num_attn_layers=NUM_LAYERS)
    ref = jax.block_until_ready(ref)

    np.testing.assert_allclose(np.asarray(out), np.asarray(ref),
                               rtol=1e-4, atol=1e-4)
    print("KERNEL_OK")
</pallas_src>

<mosaic_0001>
module attributes {stable_mosaic.version = 11 : i64} {
  func.func @attn_classifier_kernel(%arg0: i32, %arg1: memref<64x32xf32, #tpu.memory_space<vmem>>, %arg2: memref<4x32x8xf32, #tpu.memory_space<vmem>>, %arg3: memref<4x32x8xf32, #tpu.memory_space<vmem>>, %arg4: memref<4x32x8xf32, #tpu.memory_space<vmem>>, %arg5: memref<4x1x8xf32, #tpu.memory_space<vmem>>, %arg6: memref<4x1x8xf32, #tpu.memory_space<vmem>>, %arg7: memref<4x1x8xf32, #tpu.memory_space<vmem>>, %arg8: memref<4x8x32xf32, #tpu.memory_space<vmem>>, %arg9: memref<1x32xf32, #tpu.memory_space<vmem>>, %arg10: memref<8x32x128xf32, #tpu.memory_space<vmem>>, %arg11: memref<1x128xf32, #tpu.memory_space<vmem>>, %arg12: memref<8x128xf32, #tpu.memory_space<vmem>>) attributes {dimension_semantics = [#tpu.dimension_semantics<arbitrary>], iteration_bounds = array<i64: 1>, scalar_prefetch = 0 : i64, scratch_operands = 0 : i64, tpu.core_type = #tpu.core_type<tc>, window_params = [{pipeline_mode = #tpu.pipeline_mode<synchronous>, transform_indices = @transform_0, window_bounds = array<i64: 64, 32>}, {pipeline_mode = #tpu.pipeline_mode<synchronous>, transform_indices = @transform_1, window_bounds = array<i64: 4, 32, 8>}, {pipeline_mode = #tpu.pipeline_mode<synchronous>, transform_indices = @transform_2, window_bounds = array<i64: 4, 32, 8>}, {pipeline_mode = #tpu.pipeline_mode<synchronous>, transform_indices = @transform_3, window_bounds = array<i64: 4, 32, 8>}, {pipeline_mode = #tpu.pipeline_mode<synchronous>, transform_indices = @transform_4, window_bounds = array<i64: 4, 1, 8>}, {pipeline_mode = #tpu.pipeline_mode<synchronous>, transform_indices = @transform_5, window_bounds = array<i64: 4, 1, 8>}, {pipeline_mode = #tpu.pipeline_mode<synchronous>, transform_indices = @transform_6, window_bounds = array<i64: 4, 1, 8>}, {pipeline_mode = #tpu.pipeline_mode<synchronous>, transform_indices = @transform_7, window_bounds = array<i64: 4, 8, 32>}, {pipeline_mode = #tpu.pipeline_mode<synchronous>, transform_indices = @transform_8, window_bounds = array<i64: 1, 32>}, {pipeline_mode = #tpu.pipeline_mode<synchronous>, transform_indices = @transform_9, window_bounds = array<i64: 8, 32, 128>}, {pipeline_mode = #tpu.pipeline_mode<synchronous>, transform_indices = @transform_10, window_bounds = array<i64: 1, 128>}, {pipeline_mode = #tpu.pipeline_mode<synchronous>, transform_indices = @transform_11, window_bounds = array<i64: 8, 128>}]} {
    %c0 = arith.constant 0 : index
    %c0_0 = arith.constant 0 : index
    %0 = vector.load %arg1[%c0, %c0_0] : memref<64x32xf32, #tpu.memory_space<vmem>>, vector<64x32xf32>
    %cst = arith.constant 0.000000e+00 : f32
    %1 = vector.broadcast %cst : f32 to vector<64x32xf32>
    %c0_1 = arith.constant 0 : index
    %c0_2 = arith.constant 0 : index
    %c0_3 = arith.constant 0 : index
    %2 = vector.load %arg2[%c0_1, %c0_2, %c0_3] : memref<4x32x8xf32, #tpu.memory_space<vmem>>, vector<1x32x8xf32>
    %3 = vector.shape_cast %2 : vector<1x32x8xf32> to vector<32x8xf32>
    %cst_4 = arith.constant dense<0.000000e+00> : vector<64x8xf32>
    %4 = tpu.matmul %0, %3, %cst_4 {dimension_numbers = #tpu.dot_dimension_numbers<[1], [0], [0], [1], [0, 0, 1, 1], [], []>} : vector<64x32xf32>, vector<32x8xf32>, vector<64x8xf32> -> vector<64x8xf32>
    %c0_5 = arith.constant 0 : index
    %c0_6 = arith.constant 0 : index
    %c0_7 = arith.constant 0 : index
    %5 = vector.load %arg5[%c0_5, %c0_6, %c0_7] : memref<4x1x8xf32, #tpu.memory_space<vmem>>, vector<1x1x8xf32>
    %6 = vector.shape_cast %5 : vector<1x1x8xf32> to vector<1x8xf32>
    %7 = vector.broadcast %6 : vector<1x8xf32> to vector<64x8xf32>
    %8 = arith.addf %4, %7 : vector<64x8xf32>
    %9 = vector.shape_cast %8 : vector<64x8xf32> to vector<8x8x8xf32>
    %c0_8 = arith.constant 0 : index
    %c0_9 = arith.constant 0 : index
    %c0_10 = arith.constant 0 : index
    %10 = vector.load %arg3[%c0_8, %c0_9, %c0_10] : memref<4x32x8xf32, #tpu.memory_space<vmem>>, vector<1x32x8xf32>
    %11 = vector.shape_cast %10 : vector<1x32x8xf32> to vector<32x8xf32>
    %cst_11 = arith.constant dense<0.000000e+00> : vector<64x8xf32>
    %12 = tpu.matmul %0, %11, %cst_11 {dimension_numbers = #tpu.dot_dimension_numbers<[1], [0], [0], [1], [0, 0, 1, 1], [], []>} : vector<64x32xf32>, vector<32x8xf32>, vector<64x8xf32> -> vector<64x8xf32>
    %c0_12 = arith.constant 0 : index
    %c0_13 = arith.constant 0 : index
    %c0_14 = arith.constant 0 : index
    %13 = vector.load %arg6[%c0_12, %c0_13, %c0_14] : memref<4x1x8xf32, #tpu.memory_space<vmem>>, vector<1x1x8xf32>
    %14 = vector.shape_cast %13 : vector<1x1x8xf32> to vector<1x8xf32>
    %15 = vector.broadcast %14 : vector<1x8xf32> to vector<64x8xf32>
    %16 = arith.addf %12, %15 : vector<64x8xf32>
    %17 = vector.shape_cast %16 : vector<64x8xf32> to vector<8x8x8xf32>
    %c0_15 = arith.constant 0 : index
    %c0_16 = arith.constant 0 : index
    %c0_17 = arith.constant 0 : index
    %18 = vector.load %arg4[%c0_15, %c0_16, %c0_17] : memref<4x32x8xf32, #tpu.memory_space<vmem>>, vector<1x32x8xf32>
    %19 = vector.shape_cast %18 : vector<1x32x8xf32> to vector<32x8xf32>
    %cst_18 = arith.constant dense<0.000000e+00> : vector<64x8xf32>
    %20 = tpu.matmul %0, %19, %cst_18 {dimension_numbers = #tpu.dot_dimension_numbers<[1], [0], [0], [1], [0, 0, 1, 1], [], []>} : vector<64x32xf32>, vector<32x8xf32>, vector<64x8xf32> -> vector<64x8xf32>
    %c0_19 = arith.constant 0 : index
    %c0_20 = arith.constant 0 : index
    %c0_21 = arith.constant 0 : index
    %21 = vector.load %arg7[%c0_19, %c0_20, %c0_21] : memref<4x1x8xf32, #tpu.memory_space<vmem>>, vector<1x1x8xf32>
    %22 = vector.shape_cast %21 : vector<1x1x8xf32> to vector<1x8xf32>
    %23 = vector.broadcast %22 : vector<1x8xf32> to vector<64x8xf32>
    %24 = arith.addf %20, %23 : vector<64x8xf32>
    %25 = vector.shape_cast %24 : vector<64x8xf32> to vector<8x8x8xf32>
    "tpu.trace_start"() <{level = 10 : i32, message = "sid,sjd->sij"}> : () -> ()
    %cst_22 = arith.constant dense<0.000000e+00> : vector<8x8x8xf32>
    %26 = tpu.matmul %9, %17, %cst_22 {dimension_numbers = #tpu.dot_dimension_numbers<[2], [2], [1], [1], [0, 0, 0, 1, 1, 1], [0], [0]>} : vector<8x8x8xf32>, vector<8x8x8xf32>, vector<8x8x8xf32> -> vector<8x8x8xf32>
    "tpu.trace_stop"() : () -> ()
    %cst_23 = arith.constant 0.353553385 : f32
    %27 = vector.broadcast %cst_23 : f32 to vector<8x8x8xf32>
    %28 = arith.mulf %26, %27 : vector<8x8x8xf32>
    %cst_24 = arith.constant dense<0xFF800000> : vector<8x8xf32>
    %29 = vector.multi_reduction <maximumf>, %28, %cst_24 [2] : vector<8x8x8xf32> to vector<8x8xf32>
    %30 = vector.shape_cast %29 : vector<8x8xf32> to vector<8x8x1xf32>
    %31 = vector.broadcast %30 : vector<8x8x1xf32> to vector<8x8x8xf32>
    %32 = arith.subf %28, %31 : vector<8x8x8xf32>
    %33 = math.exp %32 : vector<8x8x8xf32>
    %cst_25 = arith.constant dense<0.000000e+00> : vector<8x8xf32>
    %34 = vector.multi_reduction <add>, %33, %cst_25 [2] : vector<8x8x8xf32> to vector<8x8xf32>
    %35 = vector.shape_cast %34 : vector<8x8xf32> to vector<8x8x1xf32>
    %36 = vector.broadcast %35 : vector<8x8x1xf32> to vector<8x8x8xf32>
    %37 = arith.divf %33, %36 : vector<8x8x8xf32>
    "tpu.trace_start"() <{level = 10 : i32, message = "sij,sjd->sid"}> : () -> ()
    %cst_26 = arith.constant dense<0.000000e+00> : vector<8x8x8xf32>
    %38 = tpu.matmul %37, %25, %cst_26 {dimension_numbers = #tpu.dot_dimension_numbers<[2], [1], [1], [2], [0, 0, 0, 1, 1, 2], [0], [0]>} : vector<8x8x8xf32>, vector<8x8x8xf32>, vector<8x8x8xf32> -> vector<8x8x8xf32>
    "tpu.trace_stop"() : () -> ()
    %39 = vector.shape_cast %38 : vector<8x8x8xf32> to vector<64x8xf32>
    %c0_27 = arith.constant 0 : index
    %c0_28 = arith.constant 0 : index
    %c0_29 = arith.constant 0 : index
    %40 = vector.load %arg8[%c0_27, %c0_28, %c0_29] : memref<4x8x32xf32, #tpu.memory_space<vmem>>, vector<1x8x32xf32>
    %41 = vector.shape_cast %40 : vector<1x8x32xf32> to vector<8x32xf32>
    %cst_30 = arith.constant dense<0.000000e+00> : vector<64x32xf32>
    %42 = tpu.matmul %39, %41, %cst_30 {dimension_numbers = #tpu.dot_dimension_numbers<[1], [0], [0], [1], [0, 0, 1, 1], [], []>} : vector<64x8xf32>, vector<8x32xf32>, vector<64x32xf32> -> vector<64x32xf32>
    %43 = arith.addf %1, %42 : vector<64x32xf32>
    %c1 = arith.constant 1 : index
    %c0_31 = arith.constant 0 : index
    %c0_32 = arith.constant 0 : index
    %44 = vector.load %arg2[%c1, %c0_31, %c0_32] : memref<4x32x8xf32, #tpu.memory_space<vmem>>, vector<1x32x8xf32>
    %45 = vector.shape_cast %44 : vector<1x32x8xf32> to vector<32x8xf32>
    %cst_33 = arith.constant dense<0.000000e+00> : vector<64x8xf32>
    %46 = tpu.matmul %0, %45, %cst_33 {dimension_numbers = #tpu.dot_dimension_numbers<[1], [0], [0], [1], [0, 0, 1, 1], [], []>} : vector<64x32xf32>, vector<32x8xf32>, vector<64x8xf32> -> vector<64x8xf32>
    %c1_34 = arith.constant 1 : index
    %c0_35 = arith.constant 0 : index
    %c0_36 = arith.constant 0 : index
    %47 = vector.load %arg5[%c1_34, %c0_35, %c0_36] : memref<4x1x8xf32, #tpu.memory_space<vmem>>, vector<1x1x8xf32>
    %48 = vector.shape_cast %47 : vector<1x1x8xf32> to vector<1x8xf32>
    %49 = vector.broadcast %48 : vector<1x8xf32> to vector<64x8xf32>
    %50 = arith.addf %46, %49 : vector<64x8xf32>
    %51 = vector.shape_cast %50 : vector<64x8xf32> to vector<8x8x8xf32>
    %c1_37 = arith.constant 1 : index
    %c0_38 = arith.constant 0 : index
    %c0_39 = arith.constant 0 : index
    %52 = vector.load %arg3[%c1_37, %c0_38, %c0_39] : memref<4x32x8xf32, #tpu.memory_space<vmem>>, vector<1x32x8xf32>
    %53 = vector.shape_cast %52 : vector<1x32x8xf32> to vector<32x8xf32>
    %cst_40 = arith.constant dense<0.000000e+00> : vector<64x8xf32>
    %54 = tpu.matmul %0, %53, %cst_40 {dimension_numbers = #tpu.dot_dimension_numbers<[1], [0], [0], [1], [0, 0, 1, 1], [], []>} : vector<64x32xf32>, vector<32x8xf32>, vector<64x8xf32> -> vector<64x8xf32>
    %c1_41 = arith.constant 1 : index
    %c0_42 = arith.constant 0 : index
    %c0_43 = arith.constant 0 : index
    %55 = vector.load %arg6[%c1_41, %c0_42, %c0_43] : memref<4x1x8xf32, #tpu.memory_space<vmem>>, vector<1x1x8xf32>
    %56 = vector.shape_cast %55 : vector<1x1x8xf32> to vector<1x8xf32>
    %57 = vector.broadcast %56 : vector<1x8xf32> to vector<64x8xf32>
    %58 = arith.addf %54, %57 : vector<64x8xf32>
    %59 = vector.shape_cast %58 : vector<64x8xf32> to vector<8x8x8xf32>
    %c1_44 = arith.constant 1 : index
    %c0_45 = arith.constant 0 : index
    %c0_46 = arith.constant 0 : index
    %60 = vector.load %arg4[%c1_44, %c0_45, %c0_46] : memref<4x32x8xf32, #tpu.memory_space<vmem>>, vector<1x32x8xf32>
    %61 = vector.shape_cast %60 : vector<1x32x8xf32> to vector<32x8xf32>
    %cst_47 = arith.constant dense<0.000000e+00> : vector<64x8xf32>
    %62 = tpu.matmul %0, %61, %cst_47 {dimension_numbers = #tpu.dot_dimension_numbers<[1], [0], [0], [1], [0, 0, 1, 1], [], []>} : vector<64x32xf32>, vector<32x8xf32>, vector<64x8xf32> -> vector<64x8xf32>
    %c1_48 = arith.constant 1 : index
    %c0_49 = arith.constant 0 : index
    %c0_50 = arith.constant 0 : index
    %63 = vector.load %arg7[%c1_48, %c0_49, %c0_50] : memref<4x1x8xf32, #tpu.memory_space<vmem>>, vector<1x1x8xf32>
    %64 = vector.shape_cast %63 : vector<1x1x8xf32> to vector<1x8xf32>
    %65 = vector.broadcast %64 : vector<1x8xf32> to vector<64x8xf32>
    %66 = arith.addf %62, %65 : vector<64x8xf32>
    %67 = vector.shape_cast %66 : vector<64x8xf32> to vector<8x8x8xf32>
    "tpu.trace_start"() <{level = 10 : i32, message = "sid,sjd->sij"}> : () -> ()
    %cst_51 = arith.constant dense<0.000000e+00> : vector<8x8x8xf32>
    %68 = tpu.matmul %51, %59, %cst_51 {dimension_numbers = #tpu.dot_dimension_numbers<[2], [2], [1], [1], [0, 0, 0, 1, 1, 1], [0], [0]>} : vector<8x8x8xf32>, vector<8x8x8xf32>, vector<8x8x8xf32> -> vector<8x8x8xf32>
    "tpu.trace_stop"() : () -> ()
    %cst_52 = arith.constant 0.353553385 : f32
    %69 = vector.broadcast %cst_52 : f32 to vector<8x8x8xf32>
    %70 = arith.mulf %68, %69 : vector<8x8x8xf32>
    %cst_53 = arith.constant dense<0xFF800000> : vector<8x8xf32>
    %71 = vector.multi_reduction <maximumf>, %70, %cst_53 [2] : vector<8x8x8xf32> to vector<8x8xf32>
    %72 = vector.shape_cast %71 : vector<8x8xf32> to vector<8x8x1xf32>
    %73 = vector.broadcast %72 : vector<8x8x1xf32> to vector<8x8x8xf32>
    %74 = arith.subf %70, %73 : vector<8x8x8xf32>
    %75 = math.exp %74 : vector<8x8x8xf32>
    %cst_54 = arith.constant dense<0.000000e+00> : vector<8x8xf32>
    %76 = vector.multi_reduction <add>, %75, %cst_54 [2] : vector<8x8x8xf32> to vector<8x8xf32>
    %77 = vector.shape_cast %76 : vector<8x8xf32> to vector<8x8x1xf32>
    %78 = vector.broadcast %77 : vector<8x8x1xf32> to vector<8x8x8xf32>
    %79 = arith.divf %75, %78 : vector<8x8x8xf32>
    "tpu.trace_start"() <{level = 10 : i32, message = "sij,sjd->sid"}> : () -> ()
    %cst_55 = arith.constant dense<0.000000e+00> : vector<8x8x8xf32>
    %80 = tpu.matmul %79, %67, %cst_55 {dimension_numbers = #tpu.dot_dimension_numbers<[2], [1], [1], [2], [0, 0, 0, 1, 1, 2], [0], [0]>} : vector<8x8x8xf32>, vector<8x8x8xf32>, vector<8x8x8xf32> -> vector<8x8x8xf32>
    "tpu.trace_stop"() : () -> ()
    %81 = vector.shape_cast %80 : vector<8x8x8xf32> to vector<64x8xf32>
    %c1_56 = arith.constant 1 : index
    %c0_57 = arith.constant 0 : index
    %c0_58 = arith.constant 0 : index
    %82 = vector.load %arg8[%c1_56, %c0_57, %c0_58] : memref<4x8x32xf32, #tpu.memory_space<vmem>>, vector<1x8x32xf32>
    %83 = vector.shape_cast %82 : vector<1x8x32xf32> to vector<8x32xf32>
    %cst_59 = arith.constant dense<0.000000e+00> : vector<64x32xf32>
    %84 = tpu.matmul %81, %83, %cst_59 {dimension_numbers = #tpu.dot_dimension_numbers<[1], [0], [0], [1], [0, 0, 1, 1], [], []>} : vector<64x8xf32>, vector<8x32xf32>, vector<64x32xf32> -> vector<64x32xf32>
    %85 = arith.addf %43, %84 : vector<64x32xf32>
    %c2 = arith.constant 2 : index
    %c0_60 = arith.constant 0 : index
    %c0_61 = arith.constant 0 : index
    %86 = vector.load %arg2[%c2, %c0_60, %c0_61] : memref<4x32x8xf32, #tpu.memory_space<vmem>>, vector<1x32x8xf32>
    %87 = vector.shape_cast %86 : vector<1x32x8xf32> to vector<32x8xf32>
    %cst_62 = arith.constant dense<0.000000e+00> : vector<64x8xf32>
    %88 = tpu.matmul %0, %87, %cst_62 {dimension_numbers = #tpu.dot_dimension_numbers<[1], [0], [0], [1], [0, 0, 1, 1], [], []>} : vector<64x32xf32>, vector<32x8xf32>, vector<64x8xf32> -> vector<64x8xf32>
    %c2_63 = arith.constant 2 : index
    %c0_64 = arith.constant 0 : index
    %c0_65 = arith.constant 0 : index
    %89 = vector.load %arg5[%c2_63, %c0_64, %c0_65] : memref<4x1x8xf32, #tpu.memory_space<vmem>>, vector<1x1x8xf32>
    %90 = vector.shape_cast %89 : vector<1x1x8xf32> to vector<1x8xf32>
    %91 = vector.broadcast %90 : vector<1x8xf32> to vector<64x8xf32>
    %92 = arith.addf %88, %91 : vector<64x8xf32>
    %93 = vector.shape_cast %92 : vector<64x8xf32> to vector<8x8x8xf32>
    %c2_66 = arith.constant 2 : index
    %c0_67 = arith.constant 0 : index
    %c0_68 = arith.constant 0 : index
    %94 = vector.load %arg3[%c2_66, %c0_67, %c0_68] : memref<4x32x8xf32, #tpu.memory_space<vmem>>, vector<1x32x8xf32>
    %95 = vector.shape_cast %94 : vector<1x32x8xf32> to vector<32x8xf32>
    %cst_69 = arith.constant dense<0.000000e+00> : vector<64x8xf32>
    %96 = tpu.matmul %0, %95, %cst_69 {dimension_numbers = #tpu.dot_dimension_numbers<[1], [0], [0], [1], [0, 0, 1, 1], [], []>} : vector<64x32xf32>, vector<32x8xf32>, vector<64x8xf32> -> vector<64x8xf32>
    %c2_70 = arith.constant 2 : index
    %c0_71 = arith.constant 0 : index
    %c0_72 = arith.constant 0 : index
    %97 = vector.load %arg6[%c2_70, %c0_71, %c0_72] : memref<4x1x8xf32, #tpu.memory_space<vmem>>, vector<1x1x8xf32>
    %98 = vector.shape_cast %97 : vector<1x1x8xf32> to vector<1x8xf32>
    %99 = vector.broadcast %98 : vector<1x8xf32> to vector<64x8xf32>
    %100 = arith.addf %96, %99 : vector<64x8xf32>
    %101 = vector.shape_cast %100 : vector<64x8xf32> to vector<8x8x8xf32>
    %c2_73 = arith.constant 2 : index
    %c0_74 = arith.constant 0 : index
    %c0_75 = arith.constant 0 : index
    %102 = vector.load %arg4[%c2_73, %c0_74, %c0_75] : memref<4x32x8xf32, #tpu.memory_space<vmem>>, vector<1x32x8xf32>
    %103 = vector.shape_cast %102 : vector<1x32x8xf32> to vector<32x8xf32>
    %cst_76 = arith.constant dense<0.000000e+00> : vector<64x8xf32>
    %104 = tpu.matmul %0, %103, %cst_76 {dimension_numbers = #tpu.dot_dimension_numbers<[1], [0], [0], [1], [0, 0, 1, 1], [], []>} : vector<64x32xf32>, vector<32x8xf32>, vector<64x8xf32> -> vector<64x8xf32>
    %c2_77 = arith.constant 2 : index
    %c0_78 = arith.constant 0 : index
    %c0_79 = arith.constant 0 : index
    %105 = vector.load %arg7[%c2_77, %c0_78, %c0_79] : memref<4x1x8xf32, #tpu.memory_space<vmem>>, vector<1x1x8xf32>
    %106 = vector.shape_cast %105 : vector<1x1x8xf32> to vector<1x8xf32>
    %107 = vector.broadcast %106 : vector<1x8xf32> to vector<64x8xf32>
    %108 = arith.addf %104, %107 : vector<64x8xf32>
    %109 = vector.shape_cast %108 : vector<64x8xf32> to vector<8x8x8xf32>
    "tpu.trace_start"() <{level = 10 : i32, message = "sid,sjd->sij"}> : () -> ()
    %cst_80 = arith.constant dense<0.000000e+00> : vector<8x8x8xf32>
    %110 = tpu.matmul %93, %101, %cst_80 {dimension_numbers = #tpu.dot_dimension_numbers<[2], [2], [1], [1], [0, 0, 0, 1, 1, 1], [0], [0]>} : vector<8x8x8xf32>, vector<8x8x8xf32>, vector<8x8x8xf32> -> vector<8x8x8xf32>
    "tpu.trace_stop"() : () -> ()
    %cst_81 = arith.constant 0.353553385 : f32
    %111 = vector.broadcast %cst_81 : f32 to vector<8x8x8xf32>
    %112 = arith.mulf %110, %111 : vector<8x8x8xf32>
    %cst_82 = arith.constant dense<0xFF800000> : vector<8x8xf32>
    %113 = vector.multi_reduction <maximumf>, %112, %cst_82 [2] : vector<8x8x8xf32> to vector<8x8xf32>
    %114 = vector.shape_cast %113 : vector<8x8xf32> to vector<8x8x1xf32>
    %115 = vector.broadcast %114 : vector<8x8x1xf32> to vector<8x8x8xf32>
    %116 = arith.subf %112, %115 : vector<8x8x8xf32>
    %117 = math.exp %116 : vector<8x8x8xf32>
    %cst_83 = arith.constant dense<0.000000e+00> : vector<8x8xf32>
    %118 = vector.multi_reduction <add>, %117, %cst_83 [2] : vector<8x8x8xf32> to vector<8x8xf32>
    %119 = vector.shape_cast %118 : vector<8x8xf32> to vector<8x8x1xf32>
    %120 = vector.broadcast %119 : vector<8x8x1xf32> to vector<8x8x8xf32>
    %121 = arith.divf %117, %120 : vector<8x8x8xf32>
    "tpu.trace_start"() <{level = 10 : i32, message = "sij,sjd->sid"}> : () -> ()
    %cst_84 = arith.constant dense<0.000000e+00> : vector<8x8x8xf32>
    %122 = tpu.matmul %121, %109, %cst_84 {dimension_numbers = #tpu.dot_dimension_numbers<[2], [1], [1], [2], [0, 0, 0, 1, 1, 2], [0], [0]>} : vector<8x8x8xf32>, vector<8x8x8xf32>, vector<8x8x8xf32> -> vector<8x8x8xf32>
    "tpu.trace_stop"() : () -> ()
    %123 = vector.shape_cast %122 : vector<8x8x8xf32> to vector<64x8xf32>
    %c2_85 = arith.constant 2 : index
    %c0_86 = arith.constant 0 : index
    %c0_87 = arith.constant 0 : index
    %124 = vector.load %arg8[%c2_85, %c0_86, %c0_87] : memref<4x8x32xf32, #tpu.memory_space<vmem>>, vector<1x8x32xf32>
    %125 = vector.shape_cast %124 : vector<1x8x32xf32> to vector<8x32xf32>
    %cst_88 = arith.constant dense<0.000000e+00> : vector<64x32xf32>
    %126 = tpu.matmul %123, %125, %cst_88 {dimension_numbers = #tpu.dot_dimension_numbers<[1], [0], [0], [1], [0, 0, 1, 1], [], []>} : vector<64x8xf32>, vector<8x32xf32>, vector<64x32xf32> -> vector<64x32xf32>
    %127 = arith.addf %85, %126 : vector<64x32xf32>
    %c3 = arith.constant 3 : index
    %c0_89 = arith.constant 0 : index
    %c0_90 = arith.constant 0 : index
    %128 = vector.load %arg2[%c3, %c0_89, %c0_90] : memref<4x32x8xf32, #tpu.memory_space<vmem>>, vector<1x32x8xf32>
    %129 = vector.shape_cast %128 : vector<1x32x8xf32> to vector<32x8xf32>
    %cst_91 = arith.constant dense<0.000000e+00> : vector<64x8xf32>
    %130 = tpu.matmul %0, %129, %cst_91 {dimension_numbers = #tpu.dot_dimension_numbers<[1], [0], [0], [1], [0, 0, 1, 1], [], []>} : vector<64x32xf32>, vector<32x8xf32>, vector<64x8xf32> -> vector<64x8xf32>
    %c3_92 = arith.constant 3 : index
    %c0_93 = arith.constant 0 : index
    %c0_94 = arith.constant 0 : index
    %131 = vector.load %arg5[%c3_92, %c0_93, %c0_94] : memref<4x1x8xf32, #tpu.memory_space<vmem>>, vector<1x1x8xf32>
    %132 = vector.shape_cast %131 : vector<1x1x8xf32> to vector<1x8xf32>
    %133 = vector.broadcast %132 : vector<1x8xf32> to vector<64x8xf32>
    %134 = arith.addf %130, %133 : vector<64x8xf32>
    %135 = vector.shape_cast %134 : vector<64x8xf32> to vector<8x8x8xf32>
    %c3_95 = arith.constant 3 : index
    %c0_96 = arith.constant 0 : index
    %c0_97 = arith.constant 0 : index
    %136 = vector.load %arg3[%c3_95, %c0_96, %c0_97] : memref<4x32x8xf32, #tpu.memory_space<vmem>>, vector<1x32x8xf32>
    %137 = vector.shape_cast %136 : vector<1x32x8xf32> to vector<32x8xf32>
    %cst_98 = arith.constant dense<0.000000e+00> : vector<64x8xf32>
    %138 = tpu.matmul %0, %137, %cst_98 {dimension_numbers = #tpu.dot_dimension_numbers<[1], [0], [0], [1], [0, 0, 1, 1], [], []>} : vector<64x32xf32>, vector<32x8xf32>, vector<64x8xf32> -> vector<64x8xf32>
    %c3_99 = arith.constant 3 : index
    %c0_100 = arith.constant 0 : index
    %c0_101 = arith.constant 0 : index
    %139 = vector.load %arg6[%c3_99, %c0_100, %c0_101] : memref<4x1x8xf32, #tpu.memory_space<vmem>>, vector<1x1x8xf32>
    %140 = vector.shape_cast %139 : vector<1x1x8xf32> to vector<1x8xf32>
    %141 = vector.broadcast %140 : vector<1x8xf32> to vector<64x8xf32>
    %142 = arith.addf %138, %141 : vector<64x8xf32>
    %143 = vector.shape_cast %142 : vector<64x8xf32> to vector<8x8x8xf32>
    %c3_102 = arith.constant 3 : index
    %c0_103 = arith.constant 0 : index
    %c0_104 = arith.constant 0 : index
    %144 = vector.load %arg4[%c3_102, %c0_103, %c0_104] : memref<4x32x8xf32, #tpu.memory_space<vmem>>, vector<1x32x8xf32>
    %145 = vector.shape_cast %144 : vector<1x32x8xf32> to vector<32x8xf32>
    %cst_105 = arith.constant dense<0.000000e+00> : vector<64x8xf32>
    %146 = tpu.matmul %0, %145, %cst_105 {dimension_numbers = #tpu.dot_dimension_numbers<[1], [0], [0], [1], [0, 0, 1, 1], [], []>} : vector<64x32xf32>, vector<32x8xf32>, vector<64x8xf32> -> vector<64x8xf32>
    %c3_106 = arith.constant 3 : index
    %c0_107 = arith.constant 0 : index
    %c0_108 = arith.constant 0 : index
    %147 = vector.load %arg7[%c3_106, %c0_107, %c0_108] : memref<4x1x8xf32, #tpu.memory_space<vmem>>, vector<1x1x8xf32>
    %148 = vector.shape_cast %147 : vector<1x1x8xf32> to vector<1x8xf32>
    %149 = vector.broadcast %148 : vector<1x8xf32> to vector<64x8xf32>
    %150 = arith.addf %146, %149 : vector<64x8xf32>
    %151 = vector.shape_cast %150 : vector<64x8xf32> to vector<8x8x8xf32>
    "tpu.trace_start"() <{level = 10 : i32, message = "sid,sjd->sij"}> : () -> ()
    %cst_109 = arith.constant dense<0.000000e+00> : vector<8x8x8xf32>
    %152 = tpu.matmul %135, %143, %cst_109 {dimension_numbers = #tpu.dot_dimension_numbers<[2], [2], [1], [1], [0, 0, 0, 1, 1, 1], [0], [0]>} : vector<8x8x8xf32>, vector<8x8x8xf32>, vector<8x8x8xf32> -> vector<8x8x8xf32>
    "tpu.trace_stop"() : () -> ()
    %cst_110 = arith.constant 0.353553385 : f32
    %153 = vector.broadcast %cst_110 : f32 to vector<8x8x8xf32>
    %154 = arith.mulf %152, %153 : vector<8x8x8xf32>
    %cst_111 = arith.constant dense<0xFF800000> : vector<8x8xf32>
    %155 = vector.multi_reduction <maximumf>, %154, %cst_111 [2] : vector<8x8x8xf32> to vector<8x8xf32>
    %156 = vector.shape_cast %155 : vector<8x8xf32> to vector<8x8x1xf32>
    %157 = vector.broadcast %156 : vector<8x8x1xf32> to vector<8x8x8xf32>
    %158 = arith.subf %154, %157 : vector<8x8x8xf32>
    %159 = math.exp %158 : vector<8x8x8xf32>
    %cst_112 = arith.constant dense<0.000000e+00> : vector<8x8xf32>
    %160 = vector.multi_reduction <add>, %159, %cst_112 [2] : vector<8x8x8xf32> to vector<8x8xf32>
    %161 = vector.shape_cast %160 : vector<8x8xf32> to vector<8x8x1xf32>
    %162 = vector.broadcast %161 : vector<8x8x1xf32> to vector<8x8x8xf32>
    %163 = arith.divf %159, %162 : vector<8x8x8xf32>
    "tpu.trace_start"() <{level = 10 : i32, message = "sij,sjd->sid"}> : () -> ()
    %cst_113 = arith.constant dense<0.000000e+00> : vector<8x8x8xf32>
    %164 = tpu.matmul %163, %151, %cst_113 {dimension_numbers = #tpu.dot_dimension_numbers<[2], [1], [1], [2], [0, 0, 0, 1, 1, 2], [0], [0]>} : vector<8x8x8xf32>, vector<8x8x8xf32>, vector<8x8x8xf32> -> vector<8x8x8xf32>
    "tpu.trace_stop"() : () -> ()
    %165 = vector.shape_cast %164 : vector<8x8x8xf32> to vector<64x8xf32>
    %c3_114 = arith.constant 3 : index
    %c0_115 = arith.constant 0 : index
    %c0_116 = arith.constant 0 : index
    %166 = vector.load %arg8[%c3_114, %c0_115, %c0_116] : memref<4x8x32xf32, #tpu.memory_space<vmem>>, vector<1x8x32xf32>
    %167 = vector.shape_cast %166 : vector<1x8x32xf32> to vector<8x32xf32>
    %cst_117 = arith.constant dense<0.000000e+00> : vector<64x32xf32>
    %168 = tpu.matmul %165, %167, %cst_117 {dimension_numbers = #tpu.dot_dimension_numbers<[1], [0], [0], [1], [0, 0, 1, 1], [], []>} : vector<64x8xf32>, vector<8x32xf32>, vector<64x32xf32> -> vector<64x32xf32>
    %169 = arith.addf %127, %168 : vector<64x32xf32>
    %c0_118 = arith.constant 0 : index
    %c0_119 = arith.constant 0 : index
    %170 = vector.load %arg9[%c0_118, %c0_119] : memref<1x32xf32, #tpu.memory_space<vmem>>, vector<1x32xf32>
    %171 = vector.broadcast %170 : vector<1x32xf32> to vector<64x32xf32>
    %172 = arith.addf %169, %171 : vector<64x32xf32>
    %173 = vector.shape_cast %172 : vector<64x32xf32> to vector<8x8x32xf32>
    %174 = vector.extract_strided_slice %173 {offsets = [0, 0, 0], sizes = [1, 8, 32], strides = [1, 1, 1]} : vector<8x8x32xf32> to vector<1x8x32xf32>
    %175 = vector.shape_cast %174 : vector<1x8x32xf32> to vector<8x32xf32>
    %c0_120 = arith.constant 0 : index
    %c0_121 = arith.constant 0 : index
    %c0_122 = arith.constant 0 : index
    %176 = vector.load %arg10[%c0_120, %c0_121, %c0_122] : memref<8x32x128xf32, #tpu.memory_space<vmem>>, vector<1x32x128xf32>
    %177 = vector.shape_cast %176 : vector<1x32x128xf32> to vector<32x128xf32>
    %cst_123 = arith.constant dense<0.000000e+00> : vector<8x128xf32>
    %178 = tpu.matmul %175, %177, %cst_123 {dimension_numbers = #tpu.dot_dimension_numbers<[1], [0], [0], [1], [0, 0, 1, 1], [], []>} : vector<8x32xf32>, vector<32x128xf32>, vector<8x128xf32> -> vector<8x128xf32>
    %179 = vector.extract_strided_slice %173 {offsets = [1, 0, 0], sizes = [1, 8, 32], strides = [1, 1, 1]} : vector<8x8x32xf32> to vector<1x8x32xf32>
    %180 = vector.shape_cast %179 : vector<1x8x32xf32> to vector<8x32xf32>
    %c1_124 = arith.constant 1 : index
    %c0_125 = arith.constant 0 : index
    %c0_126 = arith.constant 0 : index
    %181 = vector.load %arg10[%c1_124, %c0_125, %c0_126] : memref<8x32x128xf32, #tpu.memory_space<vmem>>, vector<1x32x128xf32>
    %182 = vector.shape_cast %181 : vector<1x32x128xf32> to vector<32x128xf32>
    %cst_127 = arith.constant dense<0.000000e+00> : vector<8x128xf32>
    %183 = tpu.matmul %180, %182, %cst_127 {dimension_numbers = #tpu.dot_dimension_numbers<[1], [0], [0], [1], [0, 0, 1, 1], [], []>} : vector<8x32xf32>, vector<32x128xf32>, vector<8x128xf32> -> vector<8x128xf32>
    %184 = arith.addf %178, %183 : vector<8x128xf32>
    %185 = vector.extract_strided_slice %173 {offsets = [2, 0, 0], sizes = [1, 8, 32], strides = [1, 1, 1]} : vector<8x8x32xf32> to vector<1x8x32xf32>
    %186 = vector.shape_cast %185 : vector<1x8x32xf32> to vector<8x32xf32>
    %c2_128 = arith.constant 2 : index
    %c0_129 = arith.constant 0 : index
    %c0_130 = arith.constant 0 : index
    %187 = vector.load %arg10[%c2_128, %c0_129, %c0_130] : memref<8x32x128xf32, #tpu.memory_space<vmem>>, vector<1x32x128xf32>
    %188 = vector.shape_cast %187 : vector<1x32x128xf32> to vector<32x128xf32>
    %cst_131 = arith.constant dense<0.000000e+00> : vector<8x128xf32>
    %189 = tpu.matmul %186, %188, %cst_131 {dimension_numbers = #tpu.dot_dimension_numbers<[1], [0], [0], [1], [0, 0, 1, 1], [], []>} : vector<8x32xf32>, vector<32x128xf32>, vector<8x128xf32> -> vector<8x128xf32>
    %190 = arith.addf %184, %189 : vector<8x128xf32>
    %191 = vector.extract_strided_slice %173 {offsets = [3, 0, 0], sizes = [1, 8, 32], strides = [1, 1, 1]} : vector<8x8x32xf32> to vector<1x8x32xf32>
    %192 = vector.shape_cast %191 : vector<1x8x32xf32> to vector<8x32xf32>
    %c3_132 = arith.constant 3 : index
    %c0_133 = arith.constant 0 : index
    %c0_134 = arith.constant 0 : index
    %193 = vector.load %arg10[%c3_132, %c0_133, %c0_134] : memref<8x32x128xf32, #tpu.memory_space<vmem>>, vector<1x32x128xf32>
    %194 = vector.shape_cast %193 : vector<1x32x128xf32> to vector<32x128xf32>
    %cst_135 = arith.constant dense<0.000000e+00> : vector<8x128xf32>
    %195 = tpu.matmul %192, %194, %cst_135 {dimension_numbers = #tpu.dot_dimension_numbers<[1], [0], [0], [1], [0, 0, 1, 1], [], []>} : vector<8x32xf32>, vector<32x128xf32>, vector<8x128xf32> -> vector<8x128xf32>
    %196 = arith.addf %190, %195 : vector<8x128xf32>
    %197 = vector.extract_strided_slice %173 {offsets = [4, 0, 0], sizes = [1, 8, 32], strides = [1, 1, 1]} : vector<8x8x32xf32> to vector<1x8x32xf32>
    %198 = vector.shape_cast %197 : vector<1x8x32xf32> to vector<8x32xf32>
    %c4 = arith.constant 4 : index
    %c0_136 = arith.constant 0 : index
    %c0_137 = arith.constant 0 : index
    %199 = vector.load %arg10[%c4, %c0_136, %c0_137] : memref<8x32x128xf32, #tpu.memory_space<vmem>>, vector<1x32x128xf32>
    %200 = vector.shape_cast %199 : vector<1x32x128xf32> to vector<32x128xf32>
    %cst_138 = arith.constant dense<0.000000e+00> : vector<8x128xf32>
    %201 = tpu.matmul %198, %200, %cst_138 {dimension_numbers = #tpu.dot_dimension_numbers<[1], [0], [0], [1], [0, 0, 1, 1], [], []>} : vector<8x32xf32>, vector<32x128xf32>, vector<8x128xf32> -> vector<8x128xf32>
    %202 = arith.addf %196, %201 : vector<8x128xf32>
    %203 = vector.extract_strided_slice %173 {offsets = [5, 0, 0], sizes = [1, 8, 32], strides = [1, 1, 1]} : vector<8x8x32xf32> to vector<1x8x32xf32>
    %204 = vector.shape_cast %203 : vector<1x8x32xf32> to vector<8x32xf32>
    %c5 = arith.constant 5 : index
    %c0_139 = arith.constant 0 : index
    %c0_140 = arith.constant 0 : index
    %205 = vector.load %arg10[%c5, %c0_139, %c0_140] : memref<8x32x128xf32, #tpu.memory_space<vmem>>, vector<1x32x128xf32>
    %206 = vector.shape_cast %205 : vector<1x32x128xf32> to vector<32x128xf32>
    %cst_141 = arith.constant dense<0.000000e+00> : vector<8x128xf32>
    %207 = tpu.matmul %204, %206, %cst_141 {dimension_numbers = #tpu.dot_dimension_numbers<[1], [0], [0], [1], [0, 0, 1, 1], [], []>} : vector<8x32xf32>, vector<32x128xf32>, vector<8x128xf32> -> vector<8x128xf32>
    %208 = arith.addf %202, %207 : vector<8x128xf32>
    %209 = vector.extract_strided_slice %173 {offsets = [6, 0, 0], sizes = [1, 8, 32], strides = [1, 1, 1]} : vector<8x8x32xf32> to vector<1x8x32xf32>
    %210 = vector.shape_cast %209 : vector<1x8x32xf32> to vector<8x32xf32>
    %c6 = arith.constant 6 : index
    %c0_142 = arith.constant 0 : index
    %c0_143 = arith.constant 0 : index
    %211 = vector.load %arg10[%c6, %c0_142, %c0_143] : memref<8x32x128xf32, #tpu.memory_space<vmem>>, vector<1x32x128xf32>
    %212 = vector.shape_cast %211 : vector<1x32x128xf32> to vector<32x128xf32>
    %cst_144 = arith.constant dense<0.000000e+00> : vector<8x128xf32>
    %213 = tpu.matmul %210, %212, %cst_144 {dimension_numbers = #tpu.dot_dimension_numbers<[1], [0], [0], [1], [0, 0, 1, 1], [], []>} : vector<8x32xf32>, vector<32x128xf32>, vector<8x128xf32> -> vector<8x128xf32>
    %214 = arith.addf %208, %213 : vector<8x128xf32>
    %215 = vector.extract_strided_slice %173 {offsets = [7, 0, 0], sizes = [1, 8, 32], strides = [1, 1, 1]} : vector<8x8x32xf32> to vector<1x8x32xf32>
    %216 = vector.shape_cast %215 : vector<1x8x32xf32> to vector<8x32xf32>
    %c7 = arith.constant 7 : index
    %c0_145 = arith.constant 0 : index
    %c0_146 = arith.constant 0 : index
    %217 = vector.load %arg10[%c7, %c0_145, %c0_146] : memref<8x32x128xf32, #tpu.memory_space<vmem>>, vector<1x32x128xf32>
    %218 = vector.shape_cast %217 : vector<1x32x128xf32> to vector<32x128xf32>
    %cst_147 = arith.constant dense<0.000000e+00> : vector<8x128xf32>
    %219 = tpu.matmul %216, %218, %cst_147 {dimension_numbers = #tpu.dot_dimension_numbers<[1], [0], [0], [1], [0, 0, 1, 1], [], []>} : vector<8x32xf32>, vector<32x128xf32>, vector<8x128xf32> -> vector<8x128xf32>
    %220 = arith.addf %214, %219 : vector<8x128xf32>
    %c0_148 = arith.constant 0 : index
    %c0_149 = arith.constant 0 : index
    %221 = vector.load %arg11[%c0_148, %c0_149] : memref<1x128xf32, #tpu.memory_space<vmem>>, vector<1x128xf32>
    %222 = vector.broadcast %221 : vector<1x128xf32> to vector<8x128xf32>
    %223 = arith.addf %220, %222 : vector<8x128xf32>
    %c0_150 = arith.constant 0 : index
    %c0_151 = arith.constant 0 : index
    %224 = vector.load %arg12[%c0_150, %c0_151] : memref<8x128xf32, #tpu.memory_space<vmem>>, vector<8x128xf32>
    tpu.vector_store %arg12[%c0_150, %c0_151], %223 {strides = array<i32>} : memref<8x128xf32, #tpu.memory_space<vmem>>, vector<8x128xf32>,
    return
  }
  func.func @transform_0(%arg0: i32) -> (i32, i32) {
    %c0_i32 = arith.constant 0 : i32
    %c0_i32_0 = arith.constant 0 : i32
    %c0_i32_1 = arith.constant 0 : i32
    return %c0_i32, %c0_i32_0 : i32, i32
  }
  func.func @transform_1(%arg0: i32) -> (i32, i32, i32) {
    %c0_i32 = arith.constant 0 : i32
    %c0_i32_0 = arith.constant 0 : i32
    %c0_i32_1 = arith.constant 0 : i32
    %c0_i32_2 = arith.constant 0 : i32
    return %c0_i32, %c0_i32_0, %c0_i32_1 : i32, i32, i32
  }
  func.func @transform_2(%arg0: i32) -> (i32, i32, i32) {
    %c0_i32 = arith.constant 0 : i32
    %c0_i32_0 = arith.constant 0 : i32
    %c0_i32_1 = arith.constant 0 : i32
    %c0_i32_2 = arith.constant 0 : i32
    return %c0_i32, %c0_i32_0, %c0_i32_1 : i32, i32, i32
  }
  func.func @transform_3(%arg0: i32) -> (i32, i32, i32) {
    %c0_i32 = arith.constant 0 : i32
    %c0_i32_0 = arith.constant 0 : i32
    %c0_i32_1 = arith.constant 0 : i32
    %c0_i32_2 = arith.constant 0 : i32
    return %c0_i32, %c0_i32_0, %c0_i32_1 : i32, i32, i32
  }
  func.func @transform_4(%arg0: i32) -> (i32, i32, i32) {
    %c0_i32 = arith.constant 0 : i32
    %c0_i32_0 = arith.constant 0 : i32
    %c0_i32_1 = arith.constant 0 : i32
    %c0_i32_2 = arith.constant 0 : i32
    return %c0_i32, %c0_i32_0, %c0_i32_1 : i32, i32, i32
  }
  func.func @transform_5(%arg0: i32) -> (i32, i32, i32) {
    %c0_i32 = arith.constant 0 : i32
    %c0_i32_0 = arith.constant 0 : i32
    %c0_i32_1 = arith.constant 0 : i32
    %c0_i32_2 = arith.constant 0 : i32
    return %c0_i32, %c0_i32_0, %c0_i32_1 : i32, i32, i32
  }
  func.func @transform_6(%arg0: i32) -> (i32, i32, i32) {
    %c0_i32 = arith.constant 0 : i32
    %c0_i32_0 = arith.constant 0 : i32
    %c0_i32_1 = arith.constant 0 : i32
    %c0_i32_2 = arith.constant 0 : i32
    return %c0_i32, %c0_i32_0, %c0_i32_1 : i32, i32, i32
  }
  func.func @transform_7(%arg0: i32) -> (i32, i32, i32) {
    %c0_i32 = arith.constant 0 : i32
    %c0_i32_0 = arith.constant 0 : i32
    %c0_i32_1 = arith.constant 0 : i32
    %c0_i32_2 = arith.constant 0 : i32
    return %c0_i32, %c0_i32_0, %c0_i32_1 : i32, i32, i32
  }
  func.func @transform_8(%arg0: i32) -> (i32, i32) {
    %c0_i32 = arith.constant 0 : i32
    %c0_i32_0 = arith.constant 0 : i32
    %c0_i32_1 = arith.constant 0 : i32
    return %c0_i32, %c0_i32_0 : i32, i32
  }
  func.func @transform_9(%arg0: i32) -> (i32, i32, i32) {
    %c0_i32 = arith.constant 0 : i32
    %c0_i32_0 = arith.constant 0 : i32
    %c0_i32_1 = arith.constant 0 : i32
    %c0_i32_2 = arith.constant 0 : i32
    return %c0_i32, %c0_i32_0, %c0_i32_1 : i32, i32, i32
  }
  func.func @transform_10(%arg0: i32) -> (i32, i32) {
    %c0_i32 = arith.constant 0 : i32
    %c0_i32_0 = arith.constant 0 : i32
    %c0_i32_1 = arith.constant 0 : i32
    return %c0_i32, %c0_i32_0 : i32, i32
  }
  func.func @transform_11(%arg0: i32) -> (i32, i32) {
    %c0_i32 = arith.constant 0 : i32
    %c0_i32_0 = arith.constant 0 : i32
    %c0_i32_1 = arith.constant 0 : i32
    return %c0_i32, %c0_i32_0 : i32, i32
  }
}

</mosaic_0001>

<bundles_post_ra>
// kernel: attn_text_classifier.1
= control target key start
LH: loop header
LB: loop body
LE: loop exit
PB: predicated region body
PF: predicated region fallthrough
CT: control target
= control target key end

     0   :  { %vm57_vm0 = vcmask 261120   ;;  %v9511_v26 = vmov 0.0   ;;  %vm9512_vm1 = vmmov 0   ;;  %vm419_vm2 = vcmask 64512   ;;  %s10696_s2 = inlined_call_operand.vmem [shape: f32[4,32,8], index: 2, kind: input, shape index: {}]   ;;  %s10697_s1 = inlined_call_operand.vmem [shape: f32[4,32,8], index: 1, kind: input, shape index: {}]   ;;  %s10698_s0 = inlined_call_operand.vmem [shape: f32[64,32], index: 0, kind: input, shape index: {}]   ;;  %s10699_s3 = inlined_call_operand.vmem [shape: f32[4,32,8], index: 3, kind: input, shape index: {}]   ;;  %s10700_s5 = inlined_call_operand.vmem [shape: f32[4,1,8], index: 5, kind: input, shape index: {}]   ;;  %s10701_s4 = inlined_call_operand.vmem [shape: f32[4,1,8], index: 4, kind: input, shape index: {}]   ;;  %s10702_s6 = inlined_call_operand.vmem [shape: f32[4,1,8], index: 6, kind: input, shape index: {}]   ;;  %s10703_s7 = inlined_call_operand.vmem [shape: f32[4,8,32], index: 7, kind: input, shape index: {}]   ;;  %s10704_s9 = inlined_call_operand.vmem [shape: f32[8,32,128], index: 9, kind: input, shape index: {}]   ;;  %s10705_s8 = inlined_call_operand.vmem [shape: f32[1,32], index: 8, kind: input, shape index: {}]   ;;  %s10706_s10 = inlined_call_operand.vmem [shape: f32[1,128], index: 10, kind: input, shape index: {}]   ;;  %s10707_s11 = inlined_call_operand.vmem [shape: f32[8,128], index: 11, kind: output, shape index: {}]  }
   0x1   :  { %v187_v0 = vld [vmem:[%s10696_s2] sm:$0xff]  ;;  %v188_v1 = vld [vmem:[%s10696_s2 + $0x8] sm:$0xff]  ;;  %v189_v5 = vld [vmem:[%s10696_s2 + $0x10] sm:$0xff] }
   0x2   :  { %v46_v2 = vld [vmem:[%s10697_s1] sm:$0xff]  ;;  %v9212_v3 = vpack.c.bf16 %v188_v1, %v187_v0  ;;  %v47_v4 = vld [vmem:[%s10697_s1 + $0x8] sm:$0xff]  ;;  %v190_v6 = vld [vmem:[%s10696_s2 + $0x18] sm:$0xff] }
   0x3   :  { %v9204_v7 = vpack.c.bf16 %v47_v4, %v46_v2  ;;  %v9216_v8 = vpack.c.bf16 %v190_v6, %v189_v5  ;;  %v48_v9 = vld [vmem:[%s10697_s1 + $0x10] sm:$0xff]  ;;  %v49_v10 = vld [vmem:[%s10697_s1 + $0x18] sm:$0xff]  ;;  %v9601_v11 = vld [vmem:[%s10698_s0] sm:$0xff] }
   0x4   :  { %9213 = vmatprep.subr.bf16.mxu1 %v9212_v3  ;;  %v9208_v12 = vpack.c.bf16 %v49_v10, %v48_v9  ;;  %8528 = vmatprep.mubr.msk.f32.mxu1 %vm57_vm0, %v9601_v11  ;;  %v303_v13 = vld [vmem:[%s10699_s3] sm:$0xff]  ;;  %v304_v14 = vld [vmem:[%s10699_s3 + $0x8] sm:$0xff]  ;;  %v9621_v17 = vld [vmem:[%s10698_s0 + $0x10] sm:$0xff] }
   0x5   :  { %9215 = vmatpush3.bf16.msra.mxu1 %v9212_v3  ;;  %9205 = vmatprep.subr.bf16.mxu0 %v9204_v7  ;;  %v9220_v15 = vpack.c.bf16 %v304_v14, %v303_v13  ;;  %v9616_v16 = vld [vmem:[%s10698_s0 + $0x8] sm:$0xff]  ;;  %v9632_v18 = vld [vmem:[%s10698_s0 + $0x18] sm:$0xff]  ;;  %v9639_v19 = vld [vmem:[%s10698_s0 + $0x20] sm:$0xff] }
   0x6   :  { %9207 = vmatpush3.bf16.msra.mxu0 %v9204_v7  ;;  %9217 = vmatprep.subr.bf16.mxu1 %v9216_v8  ;;  %v9650_v20 = vld [vmem:[%s10698_s0 + $0x28] sm:$0xff]  ;;  %v9657_v21 = vld [vmem:[%s10698_s0 + $0x30] sm:$0xff]  ;;  %v9668_v22 = vld [vmem:[%s10698_s0 + $0x38] sm:$0xff] }
   0x7   :  { %9209 = vmatprep.subr.bf16.mxu0 %v9208_v12  ;;  %8508 = vmatprep.mubr.msk.f32.mxu0 %vm57_vm0, %v9601_v11  ;;  %v305_v23 = vld [vmem:[%s10699_s3 + $0x10] sm:$0xff]  ;;  %v306_v24 = vld [vmem:[%s10699_s3 + $0x18] sm:$0xff]  ;;  %v7839_v27 = vld [vmem:[%s10700_s5] ss:$0 sm:$0xff] }
   0x8   :  { %v9224_v25 = vpack.c.bf16 %v306_v24, %v305_v23  ;;  %v7830_v29 = vld [vmem:[%s10701_s4] ss:$0 sm:$0xff] }
   0x9   :  { %9219 = vmatpush3.bf16.msra.mxu1 %v9216_v8  ;;  %v7848_v62 = vld [vmem:[%s10702_s6] ss:$0 sm:$0xff] }
   0xa   :  { %9211 = vmatpush3.bf16.msra.mxu0 %v9208_v12  ;;  %8560 = vmatprep.subr.mxu1 %v9511_v26 }
   0xb   :  { %9221 = vmatprep.subr.bf16.mxu0 %v9220_v15 }
   0xc   :  { %8529 = vmatmul.mubr.msk.f32.vlgmr.msra.gmra.mrb[0].mxu1 %vm57_vm0, %v9616_v16 }
   0xd   :  { %8509 = vmatmul.mubr.msk.f32.vlgmr.msra.gmra.mrb[0].mxu0 %vm57_vm0, %v9616_v16  ;;  %8531 = vmatprep.mubr.msk.f32.mxu1 %vm57_vm0, %v9621_v17 }
   0xe   :  { %8511 = vmatprep.mubr.msk.f32.mxu0 %vm57_vm0, %v9621_v17  ;;  %9223 = vmatpush3.bf16.msra.mxu0 %v9220_v15 }
   0xf   :  { %9225 = vmatprep.subr.bf16.mxu0 %v9224_v25 }
  0x10   :  { %8532 = vmatmul.mubr.msk.f32.gmra.mrb[2].mxu1 %vm57_vm0, %v9632_v18 }
  0x11   :  { %8512 = vmatmul.mubr.msk.f32.gmra.mrb[2].mxu0 %vm57_vm0, %v9632_v18  ;;  %8534 = vmatprep.mubr.msk.f32.mxu1 %vm57_vm0, %v9639_v19 }
  0x12   :  { %8514 = vmatprep.mubr.msk.f32.mxu0 %vm57_vm0, %v9639_v19  ;;  %9227 = vmatpush3.bf16.msra.mxu0 %v9224_v25 }
  0x13   :  { %8580 = vmatprep.subr.mxu0 %v9511_v26 }
  0x14   :  { %8535 = vmatmul.mubr.msk.f32.gmra.mrb[4].mxu1 %vm57_vm0, %v9650_v20 }
  0x15   :  { %8515 = vmatmul.mubr.msk.f32.gmra.mrb[4].mxu0 %vm57_vm0, %v9650_v20  ;;  %8537 = vmatprep.mubr.msk.f32.mxu1 %vm57_vm0, %v9657_v21 }
  0x16   :  { %8517 = vmatprep.mubr.msk.f32.mxu0 %vm57_vm0, %v9657_v21 }
  0x18   :  { %8538 = vmatmul.mubr.msk.f32.gmra.mrb[6].mxu1 %vm57_vm0, %v9668_v22 }
  0x19   :  { %8518 = vmatmul.mubr.msk.f32.gmra.mrb[6].mxu0 %vm57_vm0, %v9668_v22  ;;  %8562 = vmatprep.mubr.msk.f32.mxu1 %vm9512_vm1, %v9511_v26 }
  0x1a   :  { %8548 = vmatprep.mubr.msk.f32.mxu0 %vm57_vm0, %v9601_v11 }
  0x1d   :  { %8549 = vmatmul.mubr.msk.f32.vlgmr.msra.gmra.mrb[8].mxu0 %vm57_vm0, %v9616_v16 }
  0x1e   :  { %8551 = vmatprep.mubr.msk.f32.mxu0 %vm57_vm0, %v9621_v17 }
  0x21   :  { %8552 = vmatmul.mubr.msk.f32.gmra.mrb[10].mxu0 %vm57_vm0, %v9632_v18 }
  0x22   :  { %8554 = vmatprep.mubr.msk.f32.mxu0 %vm57_vm0, %v9639_v19 }
  0x25   :  { %8555 = vmatmul.mubr.msk.f32.gmra.mrb[12].mxu0 %vm57_vm0, %v9650_v20 }
  0x26   :  { %8557 = vmatprep.mubr.msk.f32.mxu0 %vm57_vm0, %v9657_v21 }
  0x29   :  { %8558 = vmatmul.mubr.msk.f32.gmra.mrb[14].mxu0 %vm57_vm0, %v9668_v22 }
  0x2a   :  { %8582 = vmatprep.mubr.msk.f32.mxu0 %vm9512_vm1, %v9511_v26 }
  0xdf   :  { %v8530_v28 = vpop.f32.mrb[0].mxu1 }
  0xe0   :  { %v264_v30 = vpop.f32.mrb[1].mxu1  ;;  %v8510_v31 = vpop.f32.mrb[0].mxu0  ;;  %v270_v38 = vadd.f32 %v8530_v28, %v7839_v27 }
  0xe1   :  { %v265_v32 = vadd.f32 %v7839_v27, %v264_v30  ;;  %v148_v33 = vpop.f32.mrb[1].mxu0  ;;  %v154_v42 = vadd.f32 %v8510_v31, %v7830_v29 }
  0xe2   :  { %v149_v34 = vadd.f32 %v7830_v29, %v148_v33 }
  0xe3   :  { %8561 = vmatpush3.xpose.msk.msra.mxu1 %vm419_vm2, %v265_v32  ;;  %v8533_v35 = vpop.f32.mrb[2].mxu1 }
  0xe4   :  { %8565 = vmatprep.subr.mxu1 %v9511_v26  ;;  %v274_v36 = vpop.f32.mrb[3].mxu1  ;;  %v8513_v37 = vpop.f32.mrb[2].mxu0  ;;  %v280_v52 = vadd.f32 %v8533_v35, %v7839_v27 }
  0xe5   :  { %v158_v39 = vpop.f32.mrb[3].mxu0  ;;  %v275_v40 = vadd.f32 %v7839_v27, %v274_v36  ;;  %v164_v56 = vadd.f32 %v8513_v37, %v7830_v29 }
  0xe6   :  { %8563 = vmatmul.mubr.msk.f32.vlgmr.msra.gmra.mrb[8].mxu1 %vm419_vm2, %v149_v34  ;;  %v159_v47 = vadd.f32 %v7830_v29, %v158_v39 }
  0xe7   :  { %8566 = vmatpush3.xpose.msk.msra.mxu1 %vm419_vm2, %v270_v38  ;;  %8567 = vmatprep.mubr.msk.f32.mxu1 %vm9512_vm1, %v9511_v26  ;;  %v8536_v41 = vpop.f32.mrb[4].mxu1 }
  0xe8   :  { %8570 = vmatprep.subr.mxu1 %v9511_v26  ;;  %v284_v43 = vpop.f32.mrb[5].mxu1  ;;  %v8516_v44 = vpop.f32.mrb[4].mxu0  ;;  %v290_v55 = vadd.f32 %v8536_v41, %v7839_v27 }
  0xe9   :  { %v285_v45 = vadd.f32 %v7839_v27, %v284_v43  ;;  %v168_v46 = vpop.f32.mrb[5].mxu0  ;;  %v174_v58 = vadd.f32 %v8516_v44, %v7830_v29 }
  0xea   :  { %8568 = vmatmul.mubr.msk.f32.vlgmr.msra.gmra.mrb[10].mxu1 %vm419_vm2, %v154_v42  ;;  %v169_v49 = vadd.f32 %v7830_v29, %v168_v46 }
  0xeb   :  { %8571 = vmatpush3.xpose.msk.msra.mxu1 %vm419_vm2, %v275_v40  ;;  %8572 = vmatprep.mubr.msk.f32.mxu1 %vm9512_vm1, %v9511_v26  ;;  %v8539_v48 = vpop.f32.mrb[6].mxu1 }
  0xec   :  { %8575 = vmatprep.subr.mxu1 %v9511_v26  ;;  %8581 = vmatpush3.xpose.msk.msra.mxu0 %vm419_vm2, %v285_v45  ;;  %v294_v50 = vpop.f32.mrb[7].mxu1  ;;  %v8519_v51 = vpop.f32.mrb[6].mxu0  ;;  %v300_v59 = vadd.f32 %v8539_v48, %v7839_v27 }
  0xed   :  { %v295_v53 = vadd.f32 %v7839_v27, %v294_v50  ;;  %8590 = vmatprep.subr.mxu0 %v9511_v26  ;;  %v178_v54 = vpop.f32.mrb[7].mxu0  ;;  %v184_v60 = vadd.f32 %v8519_v51, %v7830_v29 }
  0xee   :  { %8573 = vmatmul.mubr.msk.f32.vlgmr.msra.gmra.mrb[12].mxu1 %vm419_vm2, %v159_v47  ;;  %v179_v57 = vadd.f32 %v7830_v29, %v178_v54 }
  0xef   :  { %8576 = vmatpush3.xpose.msk.msra.mxu1 %vm419_vm2, %v280_v52  ;;  %8577 = vmatprep.mubr.msk.f32.mxu1 %vm9512_vm1, %v9511_v26 }
  0xf0   :  { %8585 = vmatprep.subr.mxu1 %v9511_v26  ;;  %8583 = vmatmul.mubr.msk.f32.vlgmr.msra.gmra.mrb[16].mxu0 %vm419_vm2, %v169_v49  ;;  %v8550_v61 = vpop.f32.mrb[8].mxu0 }
  0xf1   :  { %8591 = vmatpush3.xpose.msk.msra.mxu0 %vm419_vm2, %v295_v53  ;;  %8592 = vmatprep.mubr.msk.f32.mxu0 %vm9512_vm1, %v9511_v26  ;;  %v380_v63 = vpop.f32.mrb[9].mxu0  ;;  %v386_v0 = vadd.f32 %v8550_v61, %v7848_v62 }
  0xf2   :  { %8578 = vmatmul.mubr.msk.f32.vlgmr.msra.gmra.mrb[14].mxu1 %vm419_vm2, %v164_v56  ;;  %8600 = vmatprep.subr.mxu0 %v9511_v26  ;;  %v381_v1 = vadd.f32 %v7848_v62, %v380_v63 }
  0xf3   :  { %8586 = vmatpush3.xpose.msk.msra.mxu1 %vm419_vm2, %v290_v55  ;;  %8587 = vmatprep.mubr.msk.f32.mxu1 %vm9512_vm1, %v9511_v26 }
  0xf4   :  { %8595 = vmatprep.subr.mxu1 %v9511_v26  ;;  %8593 = vmatmul.mubr.msk.f32.vlgmr.msra.gmra.mrb[18].mxu0 %vm419_vm2, %v179_v57  ;;  %v8553_v2 = vpop.f32.mrb[10].mxu0 }
  0xf5   :  { %8602 = vmatprep.mubr.msk.f32.mxu0 %vm9512_vm1, %v9511_v26  ;;  %8601 = vmatpush3.msra.mxu0 %v381_v1  ;;  %v9753_v3 = vadd.f32 %v8553_v2, %v7848_v62  ;;  %v390_v4 = vpop.f32.mrb[11].mxu0 }
  0xf6   :  { %8588 = vmatmul.mubr.msk.f32.vlgmr.msra.gmra.mrb[16].mxu1 %vm419_vm2, %v174_v58  ;;  %8610 = vmatprep.subr.mxu0 %v9511_v26  ;;  %v9757_v5 = vadd.f32 %v7848_v62, %v390_v4 }
  0xf7   :  { %8596 = vmatpush3.xpose.msk.msra.mxu1 %vm419_vm2, %v300_v59  ;;  %8597 = vmatprep.mubr.msk.f32.mxu1 %vm9512_vm1, %v9511_v26 }
  0xf8   :  { %8605 = vmatprep.subr.mxu1 %v9511_v26  ;;  %v8556_v6 = vpop.f32.mrb[12].mxu0 }
  0xf9   :  { %v9759_v7 = vadd.f32 %v8556_v6, %v7848_v62  ;;  %v400_v8 = vpop.f32.mrb[13].mxu0 }
  0xfa   :  { %8598 = vmatmul.mubr.msk.f32.vlgmr.msra.gmra.mrb[18].mxu1 %vm419_vm2, %v184_v60  ;;  %v9761_v9 = vadd.f32 %v7848_v62, %v400_v8 }
  0xfb   :  { %8607 = vmatprep.mubr.msk.f32.mxu1 %vm9512_vm1, %v9511_v26  ;;  %8606 = vmatpush3.msra.mxu1 %v386_v0 }
  0xfc   :  { %8615 = vmatprep.subr.mxu1 %v9511_v26  ;;  %v8559_v10 = vpop.f32.mrb[14].mxu0 }
  0xfd   :  { %v9763_v12 = vadd.f32 %v8559_v10, %v7848_v62  ;;  %v410_v13 = vpop.f32.mrb[15].mxu0 }
  0xfe   :  { %v9765_v14 = vadd.f32 %v7848_v62, %v410_v13 }
 0x1b9   :  { %v492_v15 = vpop.f32.mrb[8].mxu1 }
 0x1ba   :  { %v8564_v23 = vpop.f32.mrb[9].mxu1  ;;  %v1028_v28 = vmul.f32 0.35355338, %v492_v15 }
 0x1bc   :  { %v1036_v33 = vsel %vm419_vm2, %v1028_v28, -inf }
 0x1bd   :  { %v568_v24 = vpop.f32.mrb[10].mxu1 }
 0x1be   :  { %v1029_v25 = vmul.f32 0.35355338, %v568_v24  ;;  %v8569_v27 = vpop.f32.mrb[11].mxu1 }
 0x1c0   :  { %v1039_v29 = vsel %vm419_vm2, %v1029_v25, -inf }
 0x1c1   :  { %1040 = vmax.xlane.f32.xlu0 %v1039_v29  ;;  %v644_v30 = vpop.f32.mrb[12].mxu1 }
 0x1c2   :  { %v8574_v31 = vpop.f32.mrb[13].mxu1  ;;  %v1030_v39 = vmul.f32 0.35355338, %v644_v30 }
 0x1c3   :  { %v796_v32 = vpop.f32.mrb[16].mxu0 }
 0x1c4   :  { %v8584_v34 = vpop.f32.mrb[17].mxu0  ;;  %v1032_v45 = vmul.f32 0.35355338, %v796_v32  ;;  %v1042_v46 = vsel %vm419_vm2, %v1030_v39, -inf }
 0x1c5   :  { %1037 = vmax.xlane.f32.xlu0 %v1036_v33  ;;  %v720_v35 = vpop.f32.mrb[14].mxu1 }
 0x1c6   :  { %v1031_v36 = vmul.f32 0.35355338, %v720_v35  ;;  %v8579_v37 = vpop.f32.mrb[15].mxu1  ;;  %v1048_v52 = vsel %vm419_vm2, %v1032_v45, -inf }
 0x1c7   :  { %v948_v38 = vpop.f32.mrb[18].mxu0 }
 0x1c8   :  { %v1045_v40 = vsel %vm419_vm2, %v1031_v36, -inf  ;;  %v8594_v41 = vpop.f32.mrb[19].mxu0  ;;  %v1034_v51 = vmul.f32 0.35355338, %v948_v38 }
 0x1c9   :  { %1046 = vmax.xlane.f32.xlu1 %v1045_v40  ;;  %v872_v42 = vpop.f32.mrb[16].mxu1 }
 0x1ca   :  { %v1033_v43 = vmul.f32 0.35355338, %v872_v42  ;;  %v8589_v44 = vpop.f32.mrb[17].mxu1  ;;  %v1054_v54 = vsel %vm419_vm2, %v1034_v51, -inf }
 0x1cc   :  { %v1051_v47 = vsel %vm419_vm2, %v1033_v43, -inf }
 0x1cd   :  { %1043 = vmax.xlane.f32.xlu1 %v1042_v46  ;;  %1052 = vmax.xlane.f32.xlu0 %v1051_v47  ;;  %v1024_v48 = vpop.f32.mrb[18].mxu1 }
 0x1ce   :  { %v1035_v49 = vmul.f32 0.35355338, %v1024_v48  ;;  %v8599_v50 = vpop.f32.mrb[19].mxu1 }
 0x1d0   :  { %v1057_v53 = vsel %vm419_vm2, %v1035_v49, -inf }
 0x1d1   :  { %1049 = vmax.xlane.f32.xlu1 %v1048_v52  ;;  %1058 = vmax.xlane.f32.xlu0 %v1057_v53 }
 0x1d5   :  { %1055 = vmax.xlane.f32.xlu1 %v1054_v54 }
 0x24e   :  { %v1041_v55 = vpop.xlane.xlu0 %1040 }
 0x24f   :  { %v1061_v56 = vsub.f32 %v1029_v25, %v1041_v55 }
 0x251   :  { %v1070_v57 = vmul.f32 1.442695, %v1061_v56 }
 0x252   :  { %v1038_v58 = vpop.xlane.xlu0 %1037 }
 0x253   :  { %9375 = vpow2.f32 %v1070_v57  ;;  %v1060_v59 = vsub.f32 %v1028_v28, %v1038_v58 }
 0x255   :  { %v1068_v60 = vmul.f32 1.442695, %v1060_v59 }
 0x256   :  { %v1047_v61 = vpop.xlane.xlu1 %1046 }
 0x257   :  { %9377 = vpow2.f32 %v1068_v60  ;;  %v1063_v62 = vsub.f32 %v1031_v36, %v1047_v61  ;;  %v7896_v60 = vld [vmem:[%s10696_s2 + $0x28] sm:$0xff] }
 0x259   :  { %v1074_v63 = vmul.f32 1.442695, %v1063_v62 }
 0x25a   :  { %v1044_v0 = vpop.xlane.xlu1 %1043  ;;  %v1053_v1 = vpop.xlane.xlu0 %1052 }
 0x25b   :  { %9379 = vpow2.f32 %v1074_v63  ;;  %v1062_v2 = vsub.f32 %v1030_v39, %v1044_v0  ;;  %v1065_v4 = vsub.f32 %v1033_v43, %v1053_v1  ;;  %v7882_v1 = vld [vmem:[%s10697_s1 + $0x28] sm:$0xff] }
 0x25d   :  { %v9376_v6 = vpop.eup %9375  ;;  %v1072_v8 = vmul.f32 1.442695, %v1062_v2  ;;  %v1078_v10 = vmul.f32 1.442695, %v1065_v4  ;;  %v7897_v2 = vld [vmem:[%s10696_s2 + $0x30] sm:$0xff]  ;;  %v7898_v4 = vld [vmem:[%s10696_s2 + $0x38] sm:$0xff] }
 0x25e   :  { %v1050_v13 = vpop.xlane.xlu1 %1049  ;;  %v1059_v15 = vpop.xlane.xlu0 %1058  ;;  %v1087_v23 = vsel %vm419_vm2, %v9376_v6, 0.0 }
 0x25f   :  { %9381 = vpow2.f32 %v1072_v8  ;;  %v1064_v24 = vsub.f32 %v1032_v45, %v1050_v13  ;;  %v1067_v25 = vsub.f32 %v1035_v49, %v1059_v15  ;;  %1088 = vadd.xlane.f32.xlu0 %v1087_v23  ;;  %v9240_v23 = vpack.c.bf16 %v7898_v4, %v7897_v2 }
 0x260   :  { %9383 = vpow2.f32 %v1078_v10 }
 0x261   :  { %v9378_v27 = vpop.eup %9377  ;;  %v1076_v28 = vmul.f32 1.442695, %v1064_v24  ;;  %v1082_v29 = vmul.f32 1.442695, %v1067_v25  ;;  %v7884_v24 = vld [vmem:[%s10697_s1 + $0x38] sm:$0xff] }
 0x262   :  { %v1056_v30 = vpop.xlane.xlu1 %1055  ;;  %v1084_v31 = vsel %vm419_vm2, %v9378_v27, 0.0 }
 0x263   :  { %9385 = vpow2.f32 %v1076_v28  ;;  %v1066_v32 = vsub.f32 %v1034_v51, %v1056_v30  ;;  %1085 = vadd.xlane.f32.xlu1 %v1084_v31  ;;  %v7910_v28 = vld [vmem:[%s10699_s3 + $0x28] sm:$0xff]  ;;  %v7911_v30 = vld [vmem:[%s10699_s3 + $0x30] sm:$0xff]  ;;  %v7912_v31 = vld [vmem:[%s10699_s3 + $0x38] sm:$0xff] }
 0x264   :  { %9387 = vpow2.f32 %v1082_v29 }
 0x265   :  { %v9380_v33 = vpop.eup %9379  ;;  %v1080_v34 = vmul.f32 1.442695, %v1066_v32 }
 0x266   :  { %v1093_v35 = vsel %vm419_vm2, %v9380_v33, 0.0 }
 0x267   :  { %9389 = vpow2.f32 %v1080_v34  ;;  %1094 = vadd.xlane.f32.xlu0 %v1093_v35 }
 0x269   :  { %v9382_v36 = vpop.eup %9381 }
 0x26a   :  { %v9384_v37 = vpop.eup %9383  ;;  %v1090_v38 = vsel %vm419_vm2, %v9382_v36, 0.0 }
 0x26b   :  { %1091 = vadd.xlane.f32.xlu1 %v1090_v38  ;;  %v1099_v39 = vsel %vm419_vm2, %v9384_v37, 0.0 }
 0x26c   :  { %1100 = vadd.xlane.f32.xlu0 %v1099_v39 }
 0x26d   :  { %v9386_v40 = vpop.eup %9385 }
 0x26e   :  { %v9388_v41 = vpop.eup %9387  ;;  %v1096_v42 = vsel %vm419_vm2, %v9386_v40, 0.0 }
 0x26f   :  { %1097 = vadd.xlane.f32.xlu1 %v1096_v42  ;;  %v1105_v43 = vsel %vm419_vm2, %v9388_v41, 0.0 }
 0x270   :  { %1106 = vadd.xlane.f32.xlu0 %v1105_v43 }
 0x271   :  { %v9782_v44 = vpop.eup %9389 }
 0x272   :  { %v1102_v45 = vsel %vm419_vm2, %v9782_v44, 0.0 }
 0x273   :  { %1103 = vadd.xlane.f32.xlu1 %v1102_v45  ;;  %v7886_v45 = vld [vmem:[%s10701_s4 + $0x1] ss:$0 sm:$0xff] }
 0x2ec   :  { %v1089_v46 = vpop.xlane.xlu0 %1088 }
 0x2ed   :  { %9391 = vrcp.f32 %v1089_v46 }
 0x2f0   :  { %v1086_v47 = vpop.xlane.xlu1 %1085 }
 0x2f1   :  { %9393 = vrcp.f32 %v1086_v47 }
 0x2f4   :  { %v1095_v48 = vpop.xlane.xlu0 %1094 }
 0x2f5   :  { %9395 = vrcp.f32 %v1095_v48 }
 0x2f7   :  { %v9392_v49 = vpop.eup %9391 }
 0x2f8   :  { %v1111_v50 = vmul.f32 %v9392_v49, %v9376_v6  ;;  %v1092_v51 = vpop.xlane.xlu1 %1091 }
 0x2f9   :  { %9397 = vrcp.f32 %v1092_v51  ;;  %v1101_v52 = vpop.xlane.xlu0 %1100 }
 0x2fa   :  { %9399 = vrcp.f32 %v1101_v52  ;;  %8608 = vmatmul.mubr.msk.f32.vlgmr.msra.gmra.mrb[20].mxu1 %vm419_vm2, %v1111_v50 }
 0x2fb   :  { %v9394_v53 = vpop.eup %9393  ;;  %8616 = vmatpush3.msra.mxu1 %v9753_v3  ;;  %8617 = vmatprep.mubr.msk.f32.mxu1 %vm9512_vm1, %v9511_v26 }
 0x2fc   :  { %v1109_v54 = vmul.f32 %v9394_v53, %v9378_v27  ;;  %v1098_v55 = vpop.xlane.xlu1 %1097  ;;  %8625 = vmatprep.subr.mxu1 %v9511_v26 }
 0x2fd   :  { %9401 = vrcp.f32 %v1098_v55  ;;  %v1107_v56 = vpop.xlane.xlu0 %1106 }
 0x2fe   :  { %9403 = vrcp.f32 %v1107_v56  ;;  %8603 = vmatmul.mubr.msk.f32.vlgmr.msra.gmra.mrb[20].mxu0 %vm419_vm2, %v1109_v54 }
 0x2ff   :  { %v9396_v57 = vpop.eup %9395  ;;  %8611 = vmatpush3.msra.mxu0 %v9757_v5  ;;  %8612 = vmatprep.mubr.msk.f32.mxu0 %vm9512_vm1, %v9511_v26  ;;  %v7895_v5 = vld [vmem:[%s10696_s2 + $0x20] sm:$0xff] }
 0x300   :  { %v1115_v58 = vmul.f32 %v9396_v57, %v9380_v33  ;;  %v1104_v3 = vpop.xlane.xlu1 %1103  ;;  %8620 = vmatprep.subr.mxu0 %v9511_v26  ;;  %v9236_v0 = vpack.c.bf16 %v7896_v60, %v7895_v5 }
 0x301   :  { %9405 = vrcp.f32 %v1104_v3 }
 0x302   :  { %8618 = vmatmul.mubr.msk.f32.vlgmr.msra.gmra.mrb[22].mxu1 %vm419_vm2, %v1115_v58 }
 0x303   :  { %v9398_v59 = vpop.eup %9397  ;;  %8626 = vmatpush3.msra.mxu1 %v9759_v7  ;;  %8627 = vmatprep.mubr.msk.f32.mxu1 %vm9512_vm1, %v9511_v26  ;;  %v7881_v7 = vld [vmem:[%s10697_s1 + $0x20] sm:$0xff] }
 0x304   :  { %v9400_v61 = vpop.eup %9399  ;;  %v1113_v62 = vmul.f32 %v9398_v59, %v9382_v36  ;;  %8635 = vmatprep.subr.mxu1 %v9511_v26  ;;  %v9228_v15 = vpack.c.bf16 %v7882_v1, %v7881_v7 }
 0x305   :  { %v1119_v63 = vmul.f32 %v9400_v61, %v9384_v37 }
 0x306   :  { %8613 = vmatmul.mubr.msk.f32.vlgmr.msra.gmra.mrb[22].mxu0 %vm419_vm2, %v1113_v62 }
 0x307   :  { %v9402_v6 = vpop.eup %9401  ;;  %8621 = vmatpush3.msra.mxu0 %v9761_v9  ;;  %8628 = vmatmul.mubr.msk.f32.vlgmr.msra.gmra.mrb[24].mxu1 %vm419_vm2, %v1119_v63  ;;  %v7883_v9 = vld [vmem:[%s10697_s1 + $0x30] sm:$0xff] }
 0x308   :  { %v9404_v8 = vpop.eup %9403  ;;  %v1117_v10 = vmul.f32 %v9402_v6, %v9386_v40  ;;  %8636 = vmatpush3.msra.mxu1 %v9763_v12  ;;  %8622 = vmatprep.mubr.msk.f32.mxu0 %vm9512_vm1, %v9511_v26  ;;  %v9232_v27 = vpack.c.bf16 %v7884_v24, %v7883_v9 }
 0x309   :  { %v1123_v13 = vmul.f32 %v9404_v8, %v9388_v41  ;;  %8630 = vmatprep.subr.mxu0 %v9511_v26  ;;  %8637 = vmatprep.mubr.msk.f32.mxu1 %vm9512_vm1, %v9511_v26  ;;  %v7900_v41 = vld [vmem:[%s10700_s5 + $0x1] ss:$0 sm:$0xff] }
 0x30a   :  { %9237 = vmatprep.subr.bf16.mxu1 %v9236_v0  ;;  %8623 = vmatmul.mubr.msk.f32.vlgmr.msra.gmra.mrb[24].mxu0 %vm419_vm2, %v1117_v10 }
 0x30b   :  { %v9406_v12 = vpop.eup %9405  ;;  %8631 = vmatpush3.msra.mxu0 %v9765_v14  ;;  %8638 = vmatmul.mubr.msk.f32.vlgmr.msra.gmra.mrb[26].mxu1 %vm419_vm2, %v1123_v13  ;;  %v7909_v14 = vld [vmem:[%s10699_s3 + $0x20] sm:$0xff] }
 0x30c   :  { %v1121_v25 = vmul.f32 %v9406_v12, %v9782_v44  ;;  %9239 = vmatpush3.bf16.msra.mxu1 %v9236_v0  ;;  %8632 = vmatprep.mubr.msk.f32.mxu0 %vm9512_vm1, %v9511_v26  ;;  %v9244_v29 = vpack.c.bf16 %v7910_v28, %v7909_v14 }
 0x30d   :  { %9229 = vmatprep.subr.bf16.mxu0 %v9228_v15  ;;  %9241 = vmatprep.subr.bf16.mxu1 %v9240_v23 }
 0x30e   :  { %8633 = vmatmul.mubr.msk.f32.vlgmr.msra.gmra.mrb[26].mxu0 %vm419_vm2, %v1121_v25  ;;  %8668 = vmatprep.mubr.msk.f32.mxu1 %vm57_vm0, %v9601_v11 }
 0x30f   :  { %9231 = vmatpush3.bf16.msra.mxu0 %v9228_v15  ;;  %8648 = vmatprep.mubr.msk.f32.mxu0 %vm57_vm0, %v9601_v11  ;;  %v7914_v15 = vld [vmem:[%s10702_s6 + $0x1] ss:$0 sm:$0xff] }
 0x310   :  { %9243 = vmatpush3.bf16.msra.mxu1 %v9240_v23  ;;  %9233 = vmatprep.subr.bf16.mxu0 %v9232_v27 }
 0x311   :  { %8700 = vmatprep.subr.mxu1 %v9511_v26 }
 0x313   :  { %8669 = vmatmul.mubr.msk.f32.vlgmr.msra.gmra.mrb[28].mxu1 %vm57_vm0, %v9616_v16  ;;  %9235 = vmatpush3.bf16.msra.mxu0 %v9232_v27 }
 0x314   :  { %8671 = vmatprep.mubr.msk.f32.mxu1 %vm57_vm0, %v9621_v17  ;;  %9245 = vmatprep.subr.bf16.mxu0 %v9244_v29 }
 0x316   :  { %8649 = vmatmul.mubr.msk.f32.vlgmr.msra.gmra.mrb[28].mxu0 %vm57_vm0, %v9616_v16 }
 0x317   :  { %8672 = vmatmul.mubr.msk.f32.gmra.mrb[30].mxu1 %vm57_vm0, %v9632_v18  ;;  %8651 = vmatprep.mubr.msk.f32.mxu0 %vm57_vm0, %v9621_v17 }
 0x318   :  { %8674 = vmatprep.mubr.msk.f32.mxu1 %vm57_vm0, %v9639_v19  ;;  %9247 = vmatpush3.bf16.msra.mxu0 %v9244_v29 }
 0x31a   :  { %8652 = vmatmul.mubr.msk.f32.gmra.mrb[30].mxu0 %vm57_vm0, %v9632_v18 }
 0x31b   :  { %8675 = vmatmul.mubr.msk.f32.gmra.mrb[32].mxu1 %vm57_vm0, %v9650_v20  ;;  %8654 = vmatprep.mubr.msk.f32.mxu0 %vm57_vm0, %v9639_v19 }
 0x31c   :  { %8677 = vmatprep.mubr.msk.f32.mxu1 %vm57_vm0, %v9657_v21 }
 0x31e   :  { %8655 = vmatmul.mubr.msk.f32.gmra.mrb[32].mxu0 %vm57_vm0, %v9650_v20 }
 0x31f   :  { %8678 = vmatmul.mubr.msk.f32.gmra.mrb[34].mxu1 %vm57_vm0, %v9668_v22  ;;  %8657 = vmatprep.mubr.msk.f32.mxu0 %vm57_vm0, %v9657_v21 }
 0x320   :  { %8702 = vmatprep.mubr.msk.f32.mxu1 %vm9512_vm1, %v9511_v26 }
 0x322   :  { %8658 = vmatmul.mubr.msk.f32.gmra.mrb[34].mxu0 %vm57_vm0, %v9668_v22 }
 0x323   :  { %8688 = vmatprep.mubr.msk.f32.mxu0 %vm57_vm0, %v9601_v11  ;;  %v9248_v11 = vpack.c.bf16 %v7912_v31, %v7911_v30 }
 0x325   :  { %9249 = vmatprep.subr.bf16.mxu0 %v9248_v11 }
 0x326   :  { %9251 = vmatpush3.bf16.msra.mxu0 %v9248_v11 }
 0x327   :  { %8720 = vmatprep.subr.mxu0 %v9511_v26 }
 0x329   :  { %8689 = vmatmul.mubr.msk.f32.vlgmr.msra.gmra.mrb[36].mxu0 %vm57_vm0, %v9616_v16 }
 0x32a   :  { %8691 = vmatprep.mubr.msk.f32.mxu0 %vm57_vm0, %v9621_v17 }
 0x32d   :  { %8692 = vmatmul.mubr.msk.f32.gmra.mrb[38].mxu0 %vm57_vm0, %v9632_v18 }
 0x32e   :  { %8694 = vmatprep.mubr.msk.f32.mxu0 %vm57_vm0, %v9639_v19 }
 0x331   :  { %8695 = vmatmul.mubr.msk.f32.gmra.mrb[40].mxu0 %vm57_vm0, %v9650_v20 }
 0x332   :  { %8697 = vmatprep.mubr.msk.f32.mxu0 %vm57_vm0, %v9657_v21 }
 0x335   :  { %8698 = vmatmul.mubr.msk.f32.gmra.mrb[42].mxu0 %vm57_vm0, %v9668_v22 }
 0x336   :  { %8722 = vmatprep.mubr.msk.f32.mxu0 %vm9512_vm1, %v9511_v26 }
 0x3cd   :  { %v9907_v16 = vpop.f32.mrb[20].mxu1 }
 0x3ce   :  { %v8609_v17 = vpop.f32.mrb[21].mxu1 }
 0x3d1   :  { %v9909_v32 = vpop.f32.mrb[20].mxu0 }
 0x3d2   :  { %v8604_v18 = vpop.f32.mrb[21].mxu0 }
 0x3d5   :  { %v9911_v33 = vpop.f32.mrb[22].mxu1 }
 0x3d6   :  { %v8619_v19 = vpop.f32.mrb[23].mxu1 }
 0x3d9   :  { %v9913_v34 = vpop.f32.mrb[22].mxu0 }
 0x3da   :  { %v9915_v20 = vpop.f32.mrb[24].mxu1  ;;  %v8614_v21 = vpop.f32.mrb[23].mxu0 }
 0x3db   :  { %v8629_v35 = vpop.f32.mrb[25].mxu1 }
 0x3dd   :  { %v9917_v36 = vpop.f32.mrb[24].mxu0 }
 0x3de   :  { %v9919_v22 = vpop.f32.mrb[26].mxu1  ;;  %v8624_v37 = vpop.f32.mrb[25].mxu0 }
 0x3df   :  { %v8639_v38 = vpop.f32.mrb[27].mxu1 }
 0x3e1   :  { %v9921_v39 = vpop.f32.mrb[26].mxu0 }
 0x3e2   :  { %v8634_v40 = vpop.f32.mrb[27].mxu0 }
 0x3e6   :  { %v8670_v42 = vpop.f32.mrb[28].mxu1 }
 0x3e7   :  { %v1906_v43 = vpop.f32.mrb[29].mxu1  ;;  %v1912_v51 = vadd.f32 %v8670_v42, %v7900_v41 }
 0x3e8   :  { %v1907_v44 = vadd.f32 %v7900_v41, %v1906_v43 }
 0x3e9   :  { %v8650_v46 = vpop.f32.mrb[28].mxu0 }
 0x3ea   :  { %8701 = vmatpush3.xpose.msk.msra.mxu1 %vm419_vm2, %v1907_v44  ;;  %v1788_v47 = vpop.f32.mrb[29].mxu0  ;;  %v8673_v48 = vpop.f32.mrb[30].mxu1  ;;  %v1794_v56 = vadd.f32 %v8650_v46, %v7886_v45 }
 0x3eb   :  { %v1789_v49 = vadd.f32 %v7886_v45, %v1788_v47  ;;  %8705 = vmatprep.subr.mxu1 %v9511_v26  ;;  %v1916_v50 = vpop.f32.mrb[31].mxu1  ;;  %v1922_v63 = vadd.f32 %v8673_v48, %v7900_v41 }
 0x3ec   :  { %v1917_v53 = vadd.f32 %v7900_v41, %v1916_v50 }
 0x3ed   :  { %8703 = vmatmul.mubr.msk.f32.vlgmr.msra.gmra.mrb[36].mxu1 %vm419_vm2, %v1789_v49  ;;  %v8653_v52 = vpop.f32.mrb[30].mxu0 }
 0x3ee   :  { %8706 = vmatpush3.xpose.msk.msra.mxu1 %vm419_vm2, %v1912_v51  ;;  %8707 = vmatprep.mubr.msk.f32.mxu1 %vm9512_vm1, %v9511_v26  ;;  %v1798_v54 = vpop.f32.mrb[31].mxu0  ;;  %v8676_v55 = vpop.f32.mrb[32].mxu1  ;;  %v1804_v4 = vadd.f32 %v8653_v52, %v7886_v45 }
 0x3ef   :  { %8710 = vmatprep.subr.mxu1 %v9511_v26  ;;  %v1926_v57 = vpop.f32.mrb[33].mxu1  ;;  %v1799_v3 = vadd.f32 %v7886_v45, %v1798_v54  ;;  %v1932_v1 = vadd.f32 %v8676_v55, %v7900_v41 }
 0x3f0   :  { %v1927_v58 = vadd.f32 %v7900_v41, %v1926_v57 }
 0x3f1   :  { %8708 = vmatmul.mubr.msk.f32.vlgmr.msra.gmra.mrb[38].mxu1 %vm419_vm2, %v1794_v56  ;;  %v8656_v59 = vpop.f32.mrb[32].mxu0 }
 0x3f2   :  { %8711 = vmatpush3.xpose.msk.msra.mxu1 %vm419_vm2, %v1917_v53  ;;  %8712 = vmatprep.mubr.msk.f32.mxu1 %vm9512_vm1, %v9511_v26  ;;  %v1808_v5 = vpop.f32.mrb[33].mxu0  ;;  %v8679_v60 = vpop.f32.mrb[34].mxu1  ;;  %v1814_v8 = vadd.f32 %v8656_v59, %v7886_v45 }
 0x3f3   :  { %8715 = vmatprep.subr.mxu1 %v9511_v26  ;;  %v1809_v61 = vadd.f32 %v7886_v45, %v1808_v5  ;;  %8721 = vmatpush3.xpose.msk.msra.mxu0 %vm419_vm2, %v1927_v58  ;;  %v1936_v62 = vpop.f32.mrb[35].mxu1  ;;  %v1942_v10 = vadd.f32 %v8679_v60, %v7900_v41 }
 0x3f4   :  { %v1937_v7 = vadd.f32 %v7900_v41, %v1936_v62  ;;  %8730 = vmatprep.subr.mxu0 %v9511_v26 }
 0x3f5   :  { %8713 = vmatmul.mubr.msk.f32.vlgmr.msra.gmra.mrb[40].mxu1 %vm419_vm2, %v1799_v3  ;;  %v8659_v0 = vpop.f32.mrb[34].mxu0 }
 0x3f6   :  { %8716 = vmatpush3.xpose.msk.msra.mxu1 %vm419_vm2, %v1922_v63  ;;  %8717 = vmatprep.mubr.msk.f32.mxu1 %vm9512_vm1, %v9511_v26  ;;  %v1818_v2 = vpop.f32.mrb[35].mxu0  ;;  %v1824_v13 = vadd.f32 %v8659_v0, %v7886_v45 }
 0x3f7   :  { %8723 = vmatmul.mubr.msk.f32.vlgmr.msra.gmra.mrb[44].mxu0 %vm419_vm2, %v1809_v61  ;;  %8725 = vmatprep.subr.mxu1 %v9511_v26  ;;  %v1819_v6 = vadd.f32 %v7886_v45, %v1818_v2 }
 0x3f8   :  { %8731 = vmatpush3.xpose.msk.msra.mxu0 %vm419_vm2, %v1937_v7  ;;  %8732 = vmatprep.mubr.msk.f32.mxu0 %vm9512_vm1, %v9511_v26 }
 0x3f9   :  { %8718 = vmatmul.mubr.msk.f32.vlgmr.msra.gmra.mrb[42].mxu1 %vm419_vm2, %v1804_v4  ;;  %8740 = vmatprep.subr.mxu0 %v9511_v26 }
 0x3fa   :  { %8726 = vmatpush3.xpose.msk.msra.mxu1 %vm419_vm2, %v1932_v1  ;;  %8727 = vmatprep.mubr.msk.f32.mxu1 %vm9512_vm1, %v9511_v26 }
 0x3fb   :  { %8733 = vmatmul.mubr.msk.f32.vlgmr.msra.gmra.mrb[46].mxu0 %vm419_vm2, %v1819_v6  ;;  %8735 = vmatprep.subr.mxu1 %v9511_v26 }
 0x3fc   :  { %8742 = vmatprep.mubr.msk.f32.mxu0 %vm9512_vm1, %v9511_v26  ;;  %v8690_v23 = vpop.f32.mrb[36].mxu0 }
 0x3fd   :  { %8728 = vmatmul.mubr.msk.f32.vlgmr.msra.gmra.mrb[44].mxu1 %vm419_vm2, %v1814_v8  ;;  %v2030_v9 = vadd.f32 %v8690_v23, %v7914_v15  ;;  %v2024_v24 = vpop.f32.mrb[37].mxu0 }
 0x3fe   :  { %8736 = vmatpush3.xpose.msk.msra.mxu1 %vm419_vm2, %v1942_v10  ;;  %8737 = vmatprep.mubr.msk.f32.mxu1 %vm9512_vm1, %v9511_v26  ;;  %v2025_v12 = vadd.f32 %v7914_v15, %v2024_v24 }
 0x3ff   :  { %8745 = vmatprep.subr.mxu1 %v9511_v26 }
 0x400   :  { %v8693_v25 = vpop.f32.mrb[38].mxu0  ;;  %8741 = vmatpush3.msra.mxu0 %v2025_v12 }
 0x401   :  { %8738 = vmatmul.mubr.msk.f32.vlgmr.msra.gmra.mrb[46].mxu1 %vm419_vm2, %v1824_v13  ;;  %v9973_v27 = vadd.f32 %v8693_v25, %v7914_v15  ;;  %v2034_v14 = vpop.f32.mrb[39].mxu0  ;;  %8750 = vmatprep.subr.mxu0 %v9511_v26 }
 0x402   :  { %8747 = vmatprep.mubr.msk.f32.mxu1 %vm9512_vm1, %v9511_v26  ;;  %8746 = vmatpush3.msra.mxu1 %v2030_v9  ;;  %v9976_v28 = vadd.f32 %v7914_v15, %v2034_v14 }
 0x403   :  { %8755 = vmatprep.subr.mxu1 %v9511_v26 }
 0x404   :  { %v8696_v29 = vpop.f32.mrb[40].mxu0 }
 0x405   :  { %v9978_v30 = vadd.f32 %v8696_v29, %v7914_v15  ;;  %v2044_v31 = vpop.f32.mrb[41].mxu0 }
 0x406   :  { %v9980_v11 = vadd.f32 %v7914_v15, %v2044_v31 }
 0x408   :  { %v8699_v17 = vpop.f32.mrb[42].mxu0 }
 0x409   :  { %v9982_v18 = vadd.f32 %v8699_v17, %v7914_v15  ;;  %v2054_v19 = vpop.f32.mrb[43].mxu0 }
 0x40a   :  { %v9984_v21 = vadd.f32 %v7914_v15, %v2054_v19 }
 0x4c0   :  { %v2135_v35 = vpop.f32.mrb[36].mxu1 }
 0x4c1   :  { %v2671_v37 = vmul.f32 0.35355338, %v2135_v35  ;;  %v8704_v38 = vpop.f32.mrb[37].mxu1 }
 0x4c3   :  { %v2679_v40 = vsel %vm419_vm2, %v2671_v37, -inf }
 0x4c4   :  { %2680 = vmax.xlane.f32.xlu1 %v2679_v40  ;;  %v2211_v41 = vpop.f32.mrb[38].mxu1 }
 0x4c5   :  { %v2672_v42 = vmul.f32 0.35355338, %v2211_v41  ;;  %v8709_v43 = vpop.f32.mrb[39].mxu1 }
 0x4c7   :  { %v2682_v44 = vsel %vm419_vm2, %v2672_v42, -inf }
 0x4c8   :  { %2683 = vmax.xlane.f32.xlu0 %v2682_v44  ;;  %v2287_v45 = vpop.f32.mrb[40].mxu1 }
 0x4c9   :  { %v2673_v46 = vmul.f32 0.35355338, %v2287_v45  ;;  %v8714_v47 = vpop.f32.mrb[41].mxu1 }
 0x4ca   :  { %v2439_v48 = vpop.f32.mrb[44].mxu0 }
 0x4cb   :  { %v2675_v49 = vmul.f32 0.35355338, %v2439_v48  ;;  %v2685_v50 = vsel %vm419_vm2, %v2673_v46, -inf  ;;  %v8724_v51 = vpop.f32.mrb[45].mxu0 }
 0x4cc   :  { %2686 = vmax.xlane.f32.xlu1 %v2685_v50  ;;  %v2363_v52 = vpop.f32.mrb[42].mxu1 }
 0x4cd   :  { %v2674_v53 = vmul.f32 0.35355338, %v2363_v52  ;;  %v8719_v54 = vpop.f32.mrb[43].mxu1  ;;  %v2691_v55 = vsel %vm419_vm2, %v2675_v49, -inf }
 0x4ce   :  { %v2591_v56 = vpop.f32.mrb[46].mxu0 }
 0x4cf   :  { %v2677_v57 = vmul.f32 0.35355338, %v2591_v56  ;;  %v2688_v58 = vsel %vm419_vm2, %v2674_v53, -inf  ;;  %v8734_v3 = vpop.f32.mrb[47].mxu0 }
 0x4d0   :  { %2692 = vmax.xlane.f32.xlu1 %v2691_v55  ;;  %2689 = vmax.xlane.f32.xlu0 %v2688_v58  ;;  %v2515_v59 = vpop.f32.mrb[44].mxu1 }
 0x4d1   :  { %v2676_v5 = vmul.f32 0.35355338, %v2515_v59  ;;  %v8729_v60 = vpop.f32.mrb[45].mxu1  ;;  %v2697_v61 = vsel %vm419_vm2, %v2677_v57, -inf }
 0x4d3   :  { %v2694_v62 = vsel %vm419_vm2, %v2676_v5, -inf }
 0x4d4   :  { %2698 = vmax.xlane.f32.xlu1 %v2697_v61  ;;  %2695 = vmax.xlane.f32.xlu0 %v2694_v62  ;;  %v2667_v63 = vpop.f32.mrb[46].mxu1 }
 0x4d5   :  { %v2678_v7 = vmul.f32 0.35355338, %v2667_v63  ;;  %v8739_v0 = vpop.f32.mrb[47].mxu1 }
 0x4d7   :  { %v2700_v1 = vsel %vm419_vm2, %v2678_v7, -inf }
 0x4d8   :  { %2701 = vmax.xlane.f32.xlu0 %v2700_v1 }
 0x551   :  { %v2681_v2 = vpop.xlane.xlu1 %2680 }
 0x552   :  { %v2703_v4 = vsub.f32 %v2671_v37, %v2681_v2 }
 0x554   :  { %v2711_v6 = vmul.f32 1.442695, %v2703_v4 }
 0x555   :  { %v2684_v8 = vpop.xlane.xlu0 %2683 }
 0x556   :  { %9407 = vpow2.f32 %v2711_v6  ;;  %v2704_v10 = vsub.f32 %v2672_v42, %v2684_v8 }
 0x558   :  { %v2713_v13 = vmul.f32 1.442695, %v2704_v10 }
 0x559   :  { %v2687_v15 = vpop.xlane.xlu1 %2686 }
 0x55a   :  { %9409 = vpow2.f32 %v2713_v13  ;;  %v2705_v23 = vsub.f32 %v2673_v46, %v2687_v15 }
 0x55c   :  { %v2715_v9 = vmul.f32 1.442695, %v2705_v23  ;;  %v7964_v23 = vld [vmem:[%s10697_s1 + $0x40] sm:$0xff] }
 0x55d   :  { %v2693_v24 = vpop.xlane.xlu1 %2692  ;;  %v2690_v12 = vpop.xlane.xlu0 %2689 }
 0x55e   :  { %9411 = vpow2.f32 %v2715_v9  ;;  %v2707_v25 = vsub.f32 %v2675_v49, %v2693_v24  ;;  %v2706_v14 = vsub.f32 %v2674_v53, %v2690_v12  ;;  %v7965_v9 = vld [vmem:[%s10697_s1 + $0x48] sm:$0xff] }
 0x560   :  { %v9408_v29 = vpop.eup %9407  ;;  %v2719_v31 = vmul.f32 1.442695, %v2707_v25  ;;  %v2717_v17 = vmul.f32 1.442695, %v2706_v14  ;;  %v9252_v14 = vpack.c.bf16 %v7965_v9, %v7964_v23 }
 0x561   :  { %v2699_v19 = vpop.xlane.xlu1 %2698  ;;  %v2696_v35 = vpop.xlane.xlu0 %2695  ;;  %v2727_v37 = vsel %vm419_vm2, %v9408_v29, 0.0 }
 0x562   :  { %9413 = vpow2.f32 %v2719_v31  ;;  %v2709_v38 = vsub.f32 %v2677_v57, %v2699_v19  ;;  %v2708_v40 = vsub.f32 %v2676_v5, %v2696_v35  ;;  %2728 = vadd.xlane.f32.xlu1 %v2727_v37  ;;  %v7978_v19 = vld [vmem:[%s10696_s2 + $0x40] sm:$0xff]  ;;  %v7979_v35 = vld [vmem:[%s10696_s2 + $0x48] sm:$0xff] }
 0x563   :  { %9415 = vpow2.f32 %v2717_v17  ;;  %v9260_v37 = vpack.c.bf16 %v7979_v35, %v7978_v19 }
 0x564   :  { %v9410_v41 = vpop.eup %9409  ;;  %v2723_v42 = vmul.f32 1.442695, %v2709_v38  ;;  %v2721_v43 = vmul.f32 1.442695, %v2708_v40  ;;  %v7980_v38 = vld [vmem:[%s10696_s2 + $0x50] sm:$0xff]  ;;  %v7981_v40 = vld [vmem:[%s10696_s2 + $0x58] sm:$0xff] }
 0x565   :  { %v2702_v44 = vpop.xlane.xlu0 %2701  ;;  %v2730_v45 = vsel %vm419_vm2, %v9410_v41, 0.0 }
 0x566   :  { %9417 = vpow2.f32 %v2723_v42  ;;  %v2710_v46 = vsub.f32 %v2678_v7, %v2702_v44  ;;  %2731 = vadd.xlane.f32.xlu0 %v2730_v45  ;;  %v10066_v42 = vld [vmem:[%s10698_s0 + $0x8] sm:$0xff]  ;;  %v10080_v44 = vld [vmem:[%s10698_s0 + $0x18] sm:$0xff]  ;;  %v10087_v45 = vld [vmem:[%s10698_s0 + $0x20] sm:$0xff] }
 0x567   :  { %9419 = vpow2.f32 %v2721_v43  ;;  %v10073_v43 = vld [vmem:[%s10698_s0 + $0x10] sm:$0xff] }
 0x568   :  { %v9412_v47 = vpop.eup %9411  ;;  %v2725_v48 = vmul.f32 1.442695, %v2710_v46  ;;  %v10095_v46 = vld [vmem:[%s10698_s0 + $0x28] sm:$0xff] }
 0x569   :  { %v2733_v49 = vsel %vm419_vm2, %v9412_v47, 0.0 }
 0x56a   :  { %9421 = vpow2.f32 %v2725_v48  ;;  %2734 = vadd.xlane.f32.xlu1 %v2733_v49  ;;  %v10109_v48 = vld [vmem:[%s10698_s0 + $0x38] sm:$0xff]  ;;  %v7947_v49 = vld [vmem:[%s10703_s7 + $0x8] sm:$0xff] }
 0x56c   :  { %v9414_v50 = vpop.eup %9413 }
 0x56d   :  { %v9416_v51 = vpop.eup %9415  ;;  %v2739_v52 = vsel %vm419_vm2, %v9414_v50, 0.0 }
 0x56e   :  { %2740 = vadd.xlane.f32.xlu1 %v2739_v52  ;;  %v2736_v53 = vsel %vm419_vm2, %v9416_v51, 0.0  ;;  %v7992_v52 = vld [vmem:[%s10699_s3 + $0x40] sm:$0xff] }
 0x56f   :  { %2737 = vadd.xlane.f32.xlu0 %v2736_v53  ;;  %v7993_v53 = vld [vmem:[%s10699_s3 + $0x48] sm:$0xff] }
 0x570   :  { %v9418_v54 = vpop.eup %9417 }
 0x571   :  { %v9420_v55 = vpop.eup %9419  ;;  %v2745_v56 = vsel %vm419_vm2, %v9418_v54, 0.0 }
 0x572   :  { %2746 = vadd.xlane.f32.xlu1 %v2745_v56  ;;  %v2742_v57 = vsel %vm419_vm2, %v9420_v55, 0.0 }
 0x573   :  { %2743 = vadd.xlane.f32.xlu0 %v2742_v57 }
 0x574   :  { %v9422_v58 = vpop.eup %9421 }
 0x575   :  { %v2748_v3 = vsel %vm419_vm2, %v9422_v58, 0.0 }
 0x577   :  { %2749 = vadd.xlane.f32.xlu0 %v2748_v3 }
 0x5ef   :  { %v2729_v59 = vpop.xlane.xlu1 %2728 }
 0x5f0   :  { %9423 = vrcp.f32 %v2729_v59 }
 0x5f3   :  { %v2732_v5 = vpop.xlane.xlu0 %2731 }
 0x5f4   :  { %9425 = vrcp.f32 %v2732_v5 }
 0x5f7   :  { %v2735_v60 = vpop.xlane.xlu1 %2734 }
 0x5f8   :  { %9427 = vrcp.f32 %v2735_v60 }
 0x5fa   :  { %v9424_v61 = vpop.eup %9423 }
 0x5fb   :  { %v2752_v62 = vmul.f32 %v9424_v61, %v9408_v29  ;;  %v2741_v63 = vpop.xlane.xlu1 %2740 }
 0x5fc   :  { %9429 = vrcp.f32 %v2741_v63  ;;  %v2738_v7 = vpop.xlane.xlu0 %2737 }
 0x5fd   :  { %9431 = vrcp.f32 %v2738_v7  ;;  %8743 = vmatmul.mubr.msk.f32.vlgmr.msra.gmra.mrb[48].mxu0 %vm419_vm2, %v2752_v62 }
 0x5fe   :  { %v9426_v0 = vpop.eup %9425  ;;  %8751 = vmatpush3.msra.mxu0 %v9976_v28  ;;  %8752 = vmatprep.mubr.msk.f32.mxu0 %vm9512_vm1, %v9511_v26 }
 0x5ff   :  { %v2754_v1 = vmul.f32 %v9426_v0, %v9410_v41  ;;  %v2747_v2 = vpop.xlane.xlu1 %2746  ;;  %8760 = vmatprep.subr.mxu0 %v9511_v26  ;;  %v9264_v41 = vpack.c.bf16 %v7981_v40, %v7980_v38 }
 0x600   :  { %9433 = vrcp.f32 %v2747_v2  ;;  %v2744_v4 = vpop.xlane.xlu0 %2743  ;;  %v7994_v2 = vld [vmem:[%s10699_s3 + $0x50] sm:$0xff] }
 0x601   :  { %9435 = vrcp.f32 %v2744_v4  ;;  %8748 = vmatmul.mubr.msk.f32.vlgmr.msra.gmra.mrb[48].mxu1 %vm419_vm2, %v2754_v1  ;;  %v7995_v4 = vld [vmem:[%s10699_s3 + $0x58] sm:$0xff] }
 0x602   :  { %v9428_v6 = vpop.eup %9427  ;;  %8756 = vmatpush3.msra.mxu1 %v9973_v27  ;;  %8757 = vmatprep.mubr.msk.f32.mxu1 %vm9512_vm1, %v9511_v26 }
 0x603   :  { %v2756_v8 = vmul.f32 %v9428_v6, %v9412_v47  ;;  %8765 = vmatprep.subr.mxu1 %v9511_v26  ;;  %v10102_v47 = vld [vmem:[%s10698_s0 + $0x30] sm:$0xff] }
 0x604   :  { %v2750_v28 = vpop.xlane.xlu0 %2749 }
 0x605   :  { %9437 = vrcp.f32 %v2750_v28  ;;  %8753 = vmatmul.mubr.msk.f32.vlgmr.msra.gmra.mrb[50].mxu0 %vm419_vm2, %v2756_v8  ;;  %v9272_v8 = vpack.c.bf16 %v7995_v4, %v7994_v2 }
 0x606   :  { %v9430_v10 = vpop.eup %9429  ;;  %8761 = vmatpush3.msra.mxu0 %v9980_v11  ;;  %8762 = vmatprep.mubr.msk.f32.mxu0 %vm9512_vm1, %v9511_v26 }
 0x607   :  { %v9432_v13 = vpop.eup %9431  ;;  %v2760_v15 = vmul.f32 %v9430_v10, %v9414_v50  ;;  %8770 = vmatprep.subr.mxu0 %v9511_v26  ;;  %v1708_v50 = vld [vmem:[%s10703_s7] sm:$0xff] }
 0x608   :  { %v2758_v27 = vmul.f32 %v9432_v13, %v9416_v51 }
 0x609   :  { %8763 = vmatmul.mubr.msk.f32.vlgmr.msra.gmra.mrb[52].mxu0 %vm419_vm2, %v2760_v15 }
 0x60a   :  { %v9434_v24 = vpop.eup %9433  ;;  %8758 = vmatmul.mubr.msk.f32.vlgmr.msra.gmra.mrb[50].mxu1 %vm419_vm2, %v2758_v27  ;;  %8771 = vmatpush3.msra.mxu0 %v9984_v21  ;;  %v7966_v21 = vld [vmem:[%s10697_s1 + $0x50] sm:$0xff] }
 0x60b   :  { %v9436_v11 = vpop.eup %9435  ;;  %v2764_v12 = vmul.f32 %v9434_v24, %v9418_v54  ;;  %8766 = vmatpush3.msra.mxu1 %v9978_v30  ;;  %8767 = vmatprep.mubr.msk.f32.mxu1 %vm9512_vm1, %v9511_v26  ;;  %v7967_v30 = vld [vmem:[%s10697_s1 + $0x58] sm:$0xff] }
 0x60c   :  { %v2762_v25 = vmul.f32 %v9436_v11, %v9420_v55  ;;  %8772 = vmatprep.mubr.msk.f32.mxu0 %vm9512_vm1, %v9511_v26  ;;  %8775 = vmatprep.subr.mxu1 %v9511_v26  ;;  %v9256_v17 = vpack.c.bf16 %v7967_v30, %v7966_v21  ;;  %v9268_v55 = vpack.c.bf16 %v7993_v53, %v7992_v52  ;;  %v7997_v52 = vld [vmem:[%s10702_s6 + $0x2] ss:$0 sm:$0xff] }
 0x60d   :  { %8773 = vmatmul.mubr.msk.f32.vlgmr.msra.gmra.mrb[54].mxu0 %vm419_vm2, %v2764_v12  ;;  %8780 = vmatprep.subr.mxu0 %v7947_v49 }
 0x60e   :  { %8768 = vmatmul.mubr.msk.f32.vlgmr.msra.gmra.mrb[52].mxu1 %vm419_vm2, %v2762_v25  ;;  %8781 = vmatpush3.msra.mxu0 %v7947_v49 }
 0x60f   :  { %v9438_v29 = vpop.eup %9437  ;;  %8776 = vmatpush3.msra.mxu1 %v9982_v18  ;;  %8777 = vmatprep.mubr.msk.f32.mxu1 %vm9512_vm1, %v9511_v26  ;;  %v10053_v18 = vld [vmem:[%s10698_s0] sm:$0xff] }
 0x610   :  { %v2766_v31 = vmul.f32 %v9438_v29, %v9422_v58  ;;  %9253 = vmatprep.subr.bf16.mxu1 %v9252_v14  ;;  %8794 = vmatprep.subr.mxu0 %v1708_v50 }
 0x612   :  { %8778 = vmatmul.mubr.msk.f32.vlgmr.msra.gmra.mrb[54].mxu1 %vm419_vm2, %v2766_v31 }
 0x613   :  { %9255 = vmatpush3.bf16.msra.mxu1 %v9252_v14  ;;  %8816 = vmatprep.mubr.msk.f32.mxu1 %vm57_vm0, %v10053_v18 }
 0x614   :  { %9257 = vmatprep.subr.bf16.mxu1 %v9256_v17 }
 0x617   :  { %9259 = vmatpush3.bf16.msra.mxu1 %v9256_v17 }
 0x618   :  { %9261 = vmatprep.subr.bf16.mxu1 %v9260_v37 }
 0x61a   :  { %8817 = vmatmul.mubr.msk.f32.vlgmr.msra.gmra.mrb[56].mxu1 %vm57_vm0, %v10066_v42 }
 0x61b   :  { %8819 = vmatprep.mubr.msk.f32.mxu1 %vm57_vm0, %v10073_v43  ;;  %9263 = vmatpush3.bf16.msra.mxu1 %v9260_v37 }
 0x61c   :  { %9265 = vmatprep.subr.bf16.mxu1 %v9264_v41 }
 0x61e   :  { %8820 = vmatmul.mubr.msk.f32.gmra.mrb[58].mxu1 %vm57_vm0, %v10080_v44 }
 0x61f   :  { %8822 = vmatprep.mubr.msk.f32.mxu1 %vm57_vm0, %v10087_v45  ;;  %9267 = vmatpush3.bf16.msra.mxu1 %v9264_v41 }
 0x620   :  { %8868 = vmatprep.subr.mxu1 %v9511_v26 }
 0x622   :  { %8823 = vmatmul.mubr.msk.f32.gmra.mrb[60].mxu1 %vm57_vm0, %v10095_v46 }
 0x623   :  { %8825 = vmatprep.mubr.msk.f32.mxu1 %vm57_vm0, %v10102_v47 }
 0x626   :  { %8826 = vmatmul.mubr.msk.f32.gmra.mrb[62].mxu1 %vm57_vm0, %v10109_v48 }
 0x627   :  { %8836 = vmatprep.mubr.msk.f32.mxu1 %vm57_vm0, %v10053_v18 }
 0x62a   :  { %8837 = vmatmul.mubr.msk.f32.vlgmr.msra.gmra.mrb[64].mxu1 %vm57_vm0, %v10066_v42 }
 0x62b   :  { %8839 = vmatprep.mubr.msk.f32.mxu1 %vm57_vm0, %v10073_v43 }
 0x62e   :  { %8840 = vmatmul.mubr.msk.f32.gmra.mrb[66].mxu1 %vm57_vm0, %v10080_v44 }
 0x62f   :  { %8842 = vmatprep.mubr.msk.f32.mxu1 %vm57_vm0, %v10087_v45 }
 0x632   :  { %8843 = vmatmul.mubr.msk.f32.gmra.mrb[68].mxu1 %vm57_vm0, %v10095_v46 }
 0x633   :  { %8845 = vmatprep.mubr.msk.f32.mxu1 %vm57_vm0, %v10102_v47 }
 0x636   :  { %8846 = vmatmul.mubr.msk.f32.gmra.mrb[70].mxu1 %vm57_vm0, %v10109_v48 }
 0x637   :  { %8870 = vmatprep.mubr.msk.f32.mxu1 %vm9512_vm1, %v9511_v26 }
 0x6d0   :  { %v2836_v51 = vpop.f32.mrb[48].mxu0 }
 0x6d1   :  { %v8744_v54 = vpop.f32.mrb[49].mxu0  ;;  %8782 = vmatprep.mubr.msk.f32.mxu0 %vm419_vm2, %v2836_v51 }
 0x6d4   :  { %v2909_v56 = vpop.f32.mrb[48].mxu1 }
 0x6d5   :  { %v8749_v57 = vpop.f32.mrb[49].mxu1  ;;  %8783 = vmatmul.mubr.msk.f32.vlgmr.msra.gmra.mrb[56].mxu0 %vm419_vm2, %v2909_v56 }
 0x6d6   :  { %8795 = vmatpush3.msra.mxu0 %v1708_v50 }
 0x6d7   :  { %9269 = vmatprep.subr.bf16.mxu0 %v9268_v55 }
 0x6d8   :  { %v2982_v58 = vpop.f32.mrb[50].mxu0 }
 0x6d9   :  { %v8754_v3 = vpop.f32.mrb[51].mxu0  ;;  %8785 = vmatprep.mubr.msk.f32.mxu0 %vm419_vm2, %v2982_v58 }
 0x6dc   :  { %v3128_v59 = vpop.f32.mrb[52].mxu0 }
 0x6dd   :  { %v3055_v5 = vpop.f32.mrb[50].mxu1  ;;  %v8764_v60 = vpop.f32.mrb[53].mxu0 }
 0x6de   :  { %v8759_v61 = vpop.f32.mrb[51].mxu1  ;;  %8786 = vmatmul.mubr.msk.f32.gmra.mrb[58].mxu0 %vm419_vm2, %v3055_v5 }
 0x6df   :  { %8788 = vmatprep.mubr.msk.f32.mxu0 %vm419_vm2, %v3128_v59 }
 0x6e0   :  { %v3274_v62 = vpop.f32.mrb[54].mxu0 }
 0x6e1   :  { %v3201_v63 = vpop.f32.mrb[52].mxu1  ;;  %v8774_v7 = vpop.f32.mrb[55].mxu0 }
 0x6e2   :  { %v8769_v0 = vpop.f32.mrb[53].mxu1  ;;  %8789 = vmatmul.mubr.msk.f32.gmra.mrb[60].mxu0 %vm419_vm2, %v3201_v63 }
 0x6e3   :  { %8791 = vmatprep.mubr.msk.f32.mxu0 %vm419_vm2, %v3274_v62 }
 0x6e5   :  { %v3347_v1 = vpop.f32.mrb[54].mxu1 }
 0x6e6   :  { %v8779_v6 = vpop.f32.mrb[55].mxu1  ;;  %8792 = vmatmul.mubr.msk.f32.gmra.mrb[62].mxu0 %vm419_vm2, %v3347_v1 }
 0x6e7   :  { %8796 = vmatprep.mubr.msk.f32.mxu0 %vm419_vm2, %v9909_v32 }
 0x6ea   :  { %8797 = vmatmul.mubr.msk.f32.vlgmr.msra.gmra.mrb[56].mxu0 %vm419_vm2, %v9907_v16 }
 0x6eb   :  { %8799 = vmatprep.mubr.msk.f32.mxu0 %vm419_vm2, %v9913_v34  ;;  %9271 = vmatpush3.bf16.msra.mxu0 %v9268_v55 }
 0x6ec   :  { %9273 = vmatprep.subr.bf16.mxu0 %v9272_v8 }
 0x6ed   :  { %v8818_v28 = vpop.f32.mrb[56].mxu1 }
 0x6ee   :  { %v3690_v10 = vpop.f32.mrb[57].mxu1  ;;  %8800 = vmatmul.mubr.msk.f32.gmra.mrb[58].mxu0 %vm419_vm2, %v9911_v33 }
 0x6ef   :  { %8802 = vmatprep.mubr.msk.f32.mxu0 %vm419_vm2, %v9917_v36  ;;  %9275 = vmatpush3.bf16.msra.mxu0 %v9272_v8 }
 0x6f0   :  { %8883 = vmatprep.subr.mxu0 %v9511_v26 }
 0x6f1   :  { %v8821_v32 = vpop.f32.mrb[58].mxu1 }
 0x6f2   :  { %v3700_v13 = vpop.f32.mrb[59].mxu1  ;;  %8803 = vmatmul.mubr.msk.f32.gmra.mrb[60].mxu0 %vm419_vm2, %v9915_v20  ;;  %v7983_v20 = vld [vmem:[%s10700_s5 + $0x2] ss:$0 sm:$0xff] }
 0x6f3   :  { %8805 = vmatprep.mubr.msk.f32.mxu0 %vm419_vm2, %v9921_v39 }
 0x6f5   :  { %v8824_v16 = vpop.f32.mrb[60].mxu1 }
 0x6f6   :  { %v3710_v34 = vpop.f32.mrb[61].mxu1  ;;  %8806 = vmatmul.mubr.msk.f32.gmra.mrb[62].mxu0 %vm419_vm2, %v9919_v22  ;;  %v7969_v22 = vld [vmem:[%s10701_s4 + $0x2] ss:$0 sm:$0xff] }
 0x6f7   :  { %8856 = vmatprep.mubr.msk.f32.mxu0 %vm57_vm0, %v10053_v18  ;;  %v3691_v9 = vadd.f32 %v7969_v22, %v3690_v10  ;;  %v3696_v21 = vadd.f32 %v8818_v28, %v7969_v22  ;;  %v3706_v31 = vadd.f32 %v8821_v32, %v7969_v22  ;;  %v3701_v35 = vadd.f32 %v7969_v22, %v3700_v13 }
 0x6f8   :  { %v3716_v40 = vadd.f32 %v8824_v16, %v7969_v22  ;;  %v3711_v49 = vadd.f32 %v7969_v22, %v3710_v34 }
 0x6f9   :  { %v8827_v33 = vpop.f32.mrb[62].mxu1 }
 0x6fa   :  { %v3720_v36 = vpop.f32.mrb[63].mxu1  ;;  %8857 = vmatmul.mubr.msk.f32.vlgmr.msra.gmra.mrb[64].mxu0 %vm57_vm0, %v10066_v42  ;;  %v3726_v50 = vadd.f32 %v8827_v33, %v7969_v22 }
 0x6fb   :  { %8859 = vmatprep.mubr.msk.f32.mxu0 %vm57_vm0, %v10073_v43  ;;  %v3721_v51 = vadd.f32 %v7969_v22, %v3720_v36 }
 0x6fd   :  { %v8838_v39 = vpop.f32.mrb[64].mxu1 }
 0x6fe   :  { %v3808_v15 = vpop.f32.mrb[65].mxu1  ;;  %8860 = vmatmul.mubr.msk.f32.gmra.mrb[66].mxu0 %vm57_vm0, %v10080_v44  ;;  %v3814_v12 = vadd.f32 %v8838_v39, %v7983_v20 }
 0x6ff   :  { %v3809_v27 = vadd.f32 %v7983_v20, %v3808_v15  ;;  %8862 = vmatprep.mubr.msk.f32.mxu0 %vm57_vm0, %v10087_v45 }
 0x701   :  { %8869 = vmatpush3.xpose.msk.msra.mxu1 %vm419_vm2, %v3809_v27  ;;  %v8841_v23 = vpop.f32.mrb[66].mxu1 }
 0x702   :  { %8863 = vmatmul.mubr.msk.f32.gmra.mrb[68].mxu0 %vm57_vm0, %v10095_v46  ;;  %v3824_v24 = vadd.f32 %v8841_v23, %v7983_v20  ;;  %8873 = vmatprep.subr.mxu1 %v9511_v26  ;;  %v3818_v11 = vpop.f32.mrb[67].mxu1 }
 0x703   :  { %8865 = vmatprep.mubr.msk.f32.mxu0 %vm57_vm0, %v10102_v47  ;;  %v3819_v25 = vadd.f32 %v7983_v20, %v3818_v11 }
 0x704   :  { %8871 = vmatmul.mubr.msk.f32.vlgmr.msra.gmra.mrb[72].mxu1 %vm419_vm2, %v3691_v9  ;;  %8884 = vmatpush3.xpose.msk.msra.mxu0 %vm419_vm2, %v3824_v24 }
 0x705   :  { %8874 = vmatpush3.xpose.msk.msra.mxu1 %vm419_vm2, %v3814_v12  ;;  %8875 = vmatprep.mubr.msk.f32.mxu1 %vm9512_vm1, %v9511_v26  ;;  %v8844_v14 = vpop.f32.mrb[68].mxu1 }
 0x706   :  { %8866 = vmatmul.mubr.msk.f32.gmra.mrb[70].mxu0 %vm57_vm0, %v10109_v48  ;;  %8878 = vmatprep.subr.mxu1 %v9511_v26  ;;  %v3828_v30 = vpop.f32.mrb[69].mxu1  ;;  %v3834_v29 = vadd.f32 %v8844_v14, %v7983_v20 }
 0x707   :  { %8885 = vmatprep.mubr.msk.f32.mxu0 %vm9512_vm1, %v9511_v26  ;;  %8893 = vmatprep.subr.mxu0 %v9511_v26  ;;  %v3829_v17 = vadd.f32 %v7983_v20, %v3828_v30 }
 0x708   :  { %8876 = vmatmul.mubr.msk.f32.vlgmr.msra.gmra.mrb[74].mxu1 %vm419_vm2, %v3696_v21 }
 0x709   :  { %8879 = vmatpush3.xpose.msk.msra.mxu1 %vm419_vm2, %v3819_v25  ;;  %8880 = vmatprep.mubr.msk.f32.mxu1 %vm9512_vm1, %v9511_v26  ;;  %v8847_v19 = vpop.f32.mrb[70].mxu1 }
 0x70a   :  { %8886 = vmatmul.mubr.msk.f32.vlgmr.msra.gmra.mrb[72].mxu0 %vm419_vm2, %v3706_v31  ;;  %8888 = vmatprep.subr.mxu1 %v9511_v26  ;;  %v3838_v37 = vpop.f32.mrb[71].mxu1  ;;  %v3844_v38 = vadd.f32 %v8847_v19, %v7983_v20 }
 0x70b   :  { %8894 = vmatpush3.xpose.msk.msra.mxu0 %vm419_vm2, %v3834_v29  ;;  %8895 = vmatprep.mubr.msk.f32.mxu0 %vm9512_vm1, %v9511_v26  ;;  %v3839_v41 = vadd.f32 %v7983_v20, %v3838_v37 }
 0x70c   :  { %8881 = vmatmul.mubr.msk.f32.vlgmr.msra.gmra.mrb[76].mxu1 %vm419_vm2, %v3701_v35  ;;  %8903 = vmatprep.subr.mxu0 %v9511_v26 }
 0x70d   :  { %8889 = vmatpush3.xpose.msk.msra.mxu1 %vm419_vm2, %v3829_v17  ;;  %8890 = vmatprep.mubr.msk.f32.mxu1 %vm9512_vm1, %v9511_v26 }
 0x70e   :  { %8896 = vmatmul.mubr.msk.f32.vlgmr.msra.gmra.mrb[74].mxu0 %vm419_vm2, %v3716_v40  ;;  %8898 = vmatprep.subr.mxu1 %v9511_v26 }
 0x70f   :  { %8904 = vmatpush3.xpose.msk.msra.mxu0 %vm419_vm2, %v3844_v38  ;;  %8905 = vmatprep.mubr.msk.f32.mxu0 %vm9512_vm1, %v9511_v26 }
 0x710   :  { %8891 = vmatmul.mubr.msk.f32.vlgmr.msra.gmra.mrb[78].mxu1 %vm419_vm2, %v3711_v49  ;;  %8913 = vmatprep.subr.mxu0 %v9511_v26 }
 0x711   :  { %8899 = vmatpush3.xpose.msk.msra.mxu1 %vm419_vm2, %v3839_v41  ;;  %8900 = vmatprep.mubr.msk.f32.mxu1 %vm9512_vm1, %v9511_v26 }
 0x712   :  { %8906 = vmatmul.mubr.msk.f32.vlgmr.msra.gmra.mrb[76].mxu0 %vm419_vm2, %v3726_v50  ;;  %8908 = vmatprep.subr.mxu1 %v9511_v26 }
 0x713   :  { %8915 = vmatprep.mubr.msk.f32.mxu0 %vm9512_vm1, %v9511_v26 }
 0x714   :  { %8901 = vmatmul.mubr.msk.f32.vlgmr.msra.gmra.mrb[80].mxu1 %vm419_vm2, %v3721_v51 }
 0x715   :  { %8910 = vmatprep.mubr.msk.f32.mxu1 %vm9512_vm1, %v9511_v26 }
 0x7cd   :  { %v8858_v53 = vpop.f32.mrb[64].mxu0 }
 0x7ce   :  { %v3932_v54 = vadd.f32 %v8858_v53, %v7997_v52  ;;  %v3926_v55 = vpop.f32.mrb[65].mxu0 }
 0x7cf   :  { %v3927_v56 = vadd.f32 %v7997_v52, %v3926_v55 }
 0x7d0   :  { %8914 = vmatpush3.msra.mxu0 %v3932_v54 }
 0x7d1   :  { %v8861_v57 = vpop.f32.mrb[66].mxu0  ;;  %8909 = vmatpush3.msra.mxu1 %v3927_v56  ;;  %8923 = vmatprep.subr.mxu0 %v9511_v26 }
 0x7d2   :  { %v10242_v58 = vadd.f32 %v8861_v57, %v7997_v52  ;;  %v3936_v3 = vpop.f32.mrb[67].mxu0  ;;  %8918 = vmatprep.subr.mxu1 %v9511_v26 }
 0x7d3   :  { %v10245_v59 = vadd.f32 %v7997_v52, %v3936_v3 }
 0x7d5   :  { %v8864_v5 = vpop.f32.mrb[68].mxu0 }
 0x7d6   :  { %v10247_v60 = vadd.f32 %v8864_v5, %v7997_v52  ;;  %v3946_v61 = vpop.f32.mrb[69].mxu0 }
 0x7d7   :  { %v4037_v62 = vpop.f32.mrb[72].mxu1  ;;  %v10249_v63 = vadd.f32 %v7997_v52, %v3946_v61 }
 0x7d8   :  { %v4573_v7 = vmul.f32 0.35355338, %v4037_v62  ;;  %v8872_v0 = vpop.f32.mrb[73].mxu1 }
 0x7d9   :  { %v8867_v1 = vpop.f32.mrb[70].mxu0 }
 0x7da   :  { %v10251_v2 = vadd.f32 %v8867_v1, %v7997_v52  ;;  %v4581_v4 = vsel %vm419_vm2, %v4573_v7, -inf  ;;  %v3956_v6 = vpop.f32.mrb[71].mxu0 }
 0x7db   :  { %4582 = vmax.xlane.f32.xlu0 %v4581_v4  ;;  %v4113_v8 = vpop.f32.mrb[74].mxu1  ;;  %v10254_v28 = vadd.f32 %v7997_v52, %v3956_v6 }
 0x7dc   :  { %v4574_v10 = vmul.f32 0.35355338, %v4113_v8  ;;  %v8877_v32 = vpop.f32.mrb[75].mxu1 }
 0x7dd   :  { %v4265_v13 = vpop.f32.mrb[72].mxu0 }
 0x7de   :  { %v4576_v16 = vmul.f32 0.35355338, %v4265_v13  ;;  %v8887_v34 = vpop.f32.mrb[73].mxu0  ;;  %v4584_v33 = vsel %vm419_vm2, %v4574_v10, -inf }
 0x7df   :  { %4585 = vmax.xlane.f32.xlu1 %v4584_v33  ;;  %v4189_v36 = vpop.f32.mrb[76].mxu1 }
 0x7e0   :  { %v4575_v20 = vmul.f32 0.35355338, %v4189_v36  ;;  %v8882_v39 = vpop.f32.mrb[77].mxu1  ;;  %v4590_v15 = vsel %vm419_vm2, %v4576_v16, -inf }
 0x7e1   :  { %v4417_v22 = vpop.f32.mrb[74].mxu0 }
 0x7e2   :  { %v4578_v27 = vmul.f32 0.35355338, %v4417_v22  ;;  %v8897_v23 = vpop.f32.mrb[75].mxu0  ;;  %v4587_v9 = vsel %vm419_vm2, %v4575_v20, -inf }
 0x7e3   :  { %4591 = vmax.xlane.f32.xlu1 %v4590_v15  ;;  %4588 = vmax.xlane.f32.xlu0 %v4587_v9  ;;  %v4341_v24 = vpop.f32.mrb[78].mxu1 }
 0x7e4   :  { %v4577_v11 = vmul.f32 0.35355338, %v4341_v24  ;;  %v8892_v12 = vpop.f32.mrb[79].mxu1  ;;  %v4596_v25 = vsel %vm419_vm2, %v4578_v27, -inf }
 0x7e5   :  { %v4569_v14 = vpop.f32.mrb[76].mxu0 }
 0x7e6   :  { %v4580_v21 = vmul.f32 0.35355338, %v4569_v14  ;;  %v8907_v30 = vpop.f32.mrb[77].mxu0  ;;  %v4593_v29 = vsel %vm419_vm2, %v4577_v11, -inf }
 0x7e7   :  { %4597 = vmax.xlane.f32.xlu1 %v4596_v25  ;;  %4594 = vmax.xlane.f32.xlu0 %v4593_v29  ;;  %v4493_v31 = vpop.f32.mrb[80].mxu1 }
 0x7e8   :  { %v4579_v17 = vmul.f32 0.35355338, %v4493_v31  ;;  %v8902_v19 = vpop.f32.mrb[81].mxu1  ;;  %v4602_v35 = vsel %vm419_vm2, %v4580_v21, -inf }
 0x7ea   :  { %v4599_v37 = vsel %vm419_vm2, %v4579_v17, -inf }
 0x7eb   :  { %4603 = vmax.xlane.f32.xlu1 %v4602_v35  ;;  %4600 = vmax.xlane.f32.xlu0 %v4599_v37 }
 0x868   :  { %v4583_v38 = vpop.xlane.xlu0 %4582 }
 0x869   :  { %v4605_v40 = vsub.f32 %v4573_v7, %v4583_v38 }
 0x86b   :  { %v4613_v41 = vmul.f32 1.442695, %v4605_v40 }
 0x86c   :  { %v4586_v49 = vpop.xlane.xlu1 %4585 }
 0x86d   :  { %9439 = vpow2.f32 %v4613_v41  ;;  %v4606_v50 = vsub.f32 %v4574_v10, %v4586_v49 }
 0x86f   :  { %v4615_v51 = vmul.f32 1.442695, %v4606_v50 }
 0x870   :  { %v4592_v52 = vpop.xlane.xlu1 %4591  ;;  %v4589_v53 = vpop.xlane.xlu0 %4588 }
 0x871   :  { %9441 = vpow2.f32 %v4615_v51  ;;  %v4608_v54 = vsub.f32 %v4576_v16, %v4592_v52  ;;  %v4607_v55 = vsub.f32 %v4575_v20, %v4589_v53 }
 0x873   :  { %v4619_v56 = vmul.f32 1.442695, %v4608_v54  ;;  %v4617_v57 = vmul.f32 1.442695, %v4607_v55 }
 0x874   :  { %v4598_v3 = vpop.xlane.xlu1 %4597  ;;  %v4595_v5 = vpop.xlane.xlu0 %4594 }
 0x875   :  { %9443 = vpow2.f32 %v4619_v56  ;;  %v4610_v61 = vsub.f32 %v4578_v27, %v4598_v3  ;;  %v4609_v62 = vsub.f32 %v4577_v11, %v4595_v5  ;;  %v8039_v5 = vld [vmem:[%s10697_s1 + $0x60] sm:$0xff] }
 0x876   :  { %9445 = vpow2.f32 %v4617_v57  ;;  %v8054_v57 = vld [vmem:[%s10696_s2 + $0x68] sm:$0xff] }
 0x877   :  { %v9440_v0 = vpop.eup %9439  ;;  %v4623_v7 = vmul.f32 1.442695, %v4610_v61  ;;  %v4621_v1 = vmul.f32 1.442695, %v4609_v62  ;;  %v8040_v61 = vld [vmem:[%s10697_s1 + $0x68] sm:$0xff] }
 0x878   :  { %v4604_v4 = vpop.xlane.xlu1 %4603  ;;  %v4601_v6 = vpop.xlane.xlu0 %4600  ;;  %v4629_v8 = vsel %vm419_vm2, %v9440_v0, 0.0  ;;  %v9276_v62 = vpack.c.bf16 %v8040_v61, %v8039_v5 }
 0x879   :  { %9447 = vpow2.f32 %v4623_v7  ;;  %v4612_v10 = vsub.f32 %v4580_v21, %v4604_v4  ;;  %v4611_v32 = vsub.f32 %v4579_v17, %v4601_v6  ;;  %4630 = vadd.xlane.f32.xlu0 %v4629_v8  ;;  %v8042_v7 = vld [vmem:[%s10697_s1 + $0x78] sm:$0xff]  ;;  %v8067_v4 = vld [vmem:[%s10699_s3 + $0x60] sm:$0xff]  ;;  %v8068_v6 = vld [vmem:[%s10699_s3 + $0x68] sm:$0xff] }
 0x87a   :  { %9449 = vpow2.f32 %v4621_v1  ;;  %v8069_v8 = vld [vmem:[%s10699_s3 + $0x70] sm:$0xff] }
 0x87b   :  { %v9442_v13 = vpop.eup %9441  ;;  %v4627_v16 = vmul.f32 1.442695, %v4612_v10  ;;  %v4625_v34 = vmul.f32 1.442695, %v4611_v32  ;;  %v9292_v10 = vpack.c.bf16 %v8068_v6, %v8067_v4  ;;  %v8070_v32 = vld [vmem:[%s10699_s3 + $0x78] sm:$0xff] }
 0x87c   :  { %v4632_v33 = vsel %vm419_vm2, %v9442_v13, 0.0 }
 0x87d   :  { %9451 = vpow2.f32 %v4627_v16  ;;  %4633 = vadd.xlane.f32.xlu1 %v4632_v33  ;;  %v8056_v33 = vld [vmem:[%s10696_s2 + $0x78] sm:$0xff] }
 0x87e   :  { %9453 = vpow2.f32 %v4625_v34  ;;  %v8055_v34 = vld [vmem:[%s10696_s2 + $0x70] sm:$0xff] }
 0x87f   :  { %v9444_v36 = vpop.eup %9443 }
 0x880   :  { %v9446_v20 = vpop.eup %9445  ;;  %v4638_v39 = vsel %vm419_vm2, %v9444_v36, 0.0 }
 0x881   :  { %4639 = vadd.xlane.f32.xlu1 %v4638_v39  ;;  %v4635_v15 = vsel %vm419_vm2, %v9446_v20, 0.0 }
 0x882   :  { %4636 = vadd.xlane.f32.xlu0 %v4635_v15 }
 0x883   :  { %v9448_v22 = vpop.eup %9447 }
 0x884   :  { %v9450_v27 = vpop.eup %9449  ;;  %v4644_v23 = vsel %vm419_vm2, %v9448_v22, 0.0 }
 0x885   :  { %4645 = vadd.xlane.f32.xlu1 %v4644_v23  ;;  %v4641_v9 = vsel %vm419_vm2, %v9450_v27, 0.0 }
 0x886   :  { %4642 = vadd.xlane.f32.xlu0 %v4641_v9 }
 0x887   :  { %v9452_v24 = vpop.eup %9451 }
 0x888   :  { %v9454_v11 = vpop.eup %9453  ;;  %v4650_v12 = vsel %vm419_vm2, %v9452_v24, 0.0 }
 0x889   :  { %4651 = vadd.xlane.f32.xlu1 %v4650_v12  ;;  %v4647_v25 = vsel %vm419_vm2, %v9454_v11, 0.0 }
 0x88a   :  { %4648 = vadd.xlane.f32.xlu0 %v4647_v25 }
 0x906   :  { %v4631_v14 = vpop.xlane.xlu0 %4630 }
 0x907   :  { %9455 = vrcp.f32 %v4631_v14 }
 0x90a   :  { %v4634_v21 = vpop.xlane.xlu1 %4633 }
 0x90b   :  { %9457 = vrcp.f32 %v4634_v21 }
 0x90e   :  { %v4640_v30 = vpop.xlane.xlu1 %4639 }
 0x90f   :  { %9459 = vrcp.f32 %v4640_v30  ;;  %v4637_v29 = vpop.xlane.xlu0 %4636 }
 0x910   :  { %9461 = vrcp.f32 %v4637_v29 }
 0x911   :  { %v9456_v31 = vpop.eup %9455 }
 0x912   :  { %v4654_v17 = vmul.f32 %v9456_v31, %v9440_v0  ;;  %v4646_v19 = vpop.xlane.xlu1 %4645  ;;  %v8041_v0 = vld [vmem:[%s10697_s1 + $0x70] sm:$0xff] }
 0x913   :  { %9463 = vrcp.f32 %v4646_v19  ;;  %v4643_v35 = vpop.xlane.xlu0 %4642  ;;  %v9280_v1 = vpack.c.bf16 %v8042_v7, %v8041_v0 }
 0x914   :  { %9465 = vrcp.f32 %v4643_v35  ;;  %8911 = vmatmul.mubr.msk.f32.vlgmr.msra.gmra.mrb[82].mxu1 %vm419_vm2, %v4654_v17 }
 0x915   :  { %v9458_v37 = vpop.eup %9457  ;;  %8919 = vmatpush3.msra.mxu1 %v10245_v59  ;;  %8920 = vmatprep.mubr.msk.f32.mxu1 %vm9512_vm1, %v9511_v26 }
 0x916   :  { %v4656_v38 = vmul.f32 %v9458_v37, %v9442_v13  ;;  %v4652_v40 = vpop.xlane.xlu1 %4651  ;;  %8928 = vmatprep.subr.mxu1 %v9511_v26  ;;  %v9296_v13 = vpack.c.bf16 %v8070_v32, %v8069_v8 }
 0x917   :  { %9467 = vrcp.f32 %v4652_v40  ;;  %v4649_v41 = vpop.xlane.xlu0 %4648 }
 0x918   :  { %9469 = vrcp.f32 %v4649_v41  ;;  %8916 = vmatmul.mubr.msk.f32.vlgmr.msra.gmra.mrb[78].mxu0 %vm419_vm2, %v4656_v38 }
 0x919   :  { %v9460_v49 = vpop.eup %9459  ;;  %8924 = vmatpush3.msra.mxu0 %v10242_v58  ;;  %8925 = vmatprep.mubr.msk.f32.mxu0 %vm9512_vm1, %v9511_v26 }
 0x91a   :  { %v9462_v50 = vpop.eup %9461  ;;  %v4660_v59 = vmul.f32 %v9460_v49, %v9444_v36  ;;  %8933 = vmatprep.subr.mxu0 %v9511_v26 }
 0x91b   :  { %v4658_v51 = vmul.f32 %v9462_v50, %v9446_v20  ;;  %v9288_v20 = vpack.c.bf16 %v8056_v33, %v8055_v34 }
 0x91c   :  { %8926 = vmatmul.mubr.msk.f32.vlgmr.msra.gmra.mrb[80].mxu0 %vm419_vm2, %v4660_v59 }
 0x91d   :  { %v9464_v52 = vpop.eup %9463  ;;  %8921 = vmatmul.mubr.msk.f32.vlgmr.msra.gmra.mrb[84].mxu1 %vm419_vm2, %v4658_v51  ;;  %8934 = vmatpush3.msra.mxu0 %v10247_v60 }
 0x91e   :  { %v9466_v53 = vpop.eup %9465  ;;  %v4664_v54 = vmul.f32 %v9464_v52, %v9448_v22  ;;  %8929 = vmatpush3.msra.mxu1 %v10249_v63  ;;  %8930 = vmatprep.mubr.msk.f32.mxu1 %vm9512_vm1, %v9511_v26 }
 0x91f   :  { %v4662_v58 = vmul.f32 %v9466_v53, %v9450_v27  ;;  %8935 = vmatprep.mubr.msk.f32.mxu0 %vm9512_vm1, %v9511_v26  ;;  %8938 = vmatprep.subr.mxu1 %v9511_v26 }
 0x920   :  { %8943 = vmatprep.subr.mxu0 %v9511_v26  ;;  %8936 = vmatmul.mubr.msk.f32.vlgmr.msra.gmra.mrb[82].mxu0 %vm419_vm2, %v4664_v54 }
 0x921   :  { %v9468_v55 = vpop.eup %9467  ;;  %8931 = vmatmul.mubr.msk.f32.vlgmr.msra.gmra.mrb[86].mxu1 %vm419_vm2, %v4662_v58  ;;  %8944 = vmatpush3.msra.mxu0 %v10251_v2  ;;  %v8030_v2 = vld [vmem:[%s10703_s7 + $0x10] sm:$0xff]  ;;  %v8058_v58 = vld [vmem:[%s10700_s5 + $0x3] ss:$0 sm:$0xff] }
 0x922   :  { %v9470_v60 = vpop.eup %9469  ;;  %v4668_v63 = vmul.f32 %v9468_v55, %v9452_v24  ;;  %8939 = vmatpush3.msra.mxu1 %v10254_v28  ;;  %8940 = vmatprep.mubr.msk.f32.mxu1 %vm9512_vm1, %v9511_v26  ;;  %v8053_v28 = vld [vmem:[%s10696_s2 + $0x60] sm:$0xff] }
 0x923   :  { %v4666_v56 = vmul.f32 %v9470_v60, %v9454_v11  ;;  %8945 = vmatprep.mubr.msk.f32.mxu0 %vm9512_vm1, %v9511_v26  ;;  %8948 = vmatprep.subr.mxu0 %v8030_v2  ;;  %v9284_v3 = vpack.c.bf16 %v8054_v57, %v8053_v28  ;;  %v8044_v55 = vld [vmem:[%s10701_s4 + $0x3] ss:$0 sm:$0xff] }
 0x924   :  { %8946 = vmatmul.mubr.msk.f32.vlgmr.msra.gmra.mrb[84].mxu0 %vm419_vm2, %v4668_v63  ;;  %9277 = vmatprep.subr.bf16.mxu1 %v9276_v62 }
 0x925   :  { %8941 = vmatmul.mubr.msk.f32.vlgmr.msra.gmra.mrb[88].mxu1 %vm419_vm2, %v4666_v56  ;;  %8949 = vmatpush3.msra.mxu0 %v8030_v2 }
 0x926   :  { %8970 = vmatprep.mubr.msk.f32.mxu1 %vm57_vm0, %v10053_v18  ;;  %9285 = vmatprep.subr.bf16.mxu0 %v9284_v3 }
 0x927   :  { %9279 = vmatpush3.bf16.msra.mxu1 %v9276_v62 }
 0x928   :  { %9281 = vmatprep.subr.bf16.mxu1 %v9280_v1 }
 0x92b   :  { %9283 = vmatpush3.bf16.msra.mxu1 %v9280_v1 }
 0x92c   :  { %9293 = vmatprep.subr.bf16.mxu1 %v9292_v10 }
 0x92e   :  { %8971 = vmatmul.mubr.msk.f32.vlgmr.msra.gmra.mrb[90].mxu1 %vm57_vm0, %v10066_v42 }
 0x92f   :  { %8973 = vmatprep.mubr.msk.f32.mxu1 %vm57_vm0, %v10073_v43  ;;  %9295 = vmatpush3.bf16.msra.mxu1 %v9292_v10 }
 0x930   :  { %9297 = vmatprep.subr.bf16.mxu1 %v9296_v13 }
 0x932   :  { %8974 = vmatmul.mubr.msk.f32.gmra.mrb[92].mxu1 %vm57_vm0, %v10080_v44 }
 0x933   :  { %8976 = vmatprep.mubr.msk.f32.mxu1 %vm57_vm0, %v10087_v45  ;;  %9299 = vmatpush3.bf16.msra.mxu1 %v9296_v13 }
 0x934   :  { %9027 = vmatprep.subr.mxu1 %v9511_v26 }
 0x936   :  { %8977 = vmatmul.mubr.msk.f32.gmra.mrb[94].mxu1 %vm57_vm0, %v10095_v46 }
 0x937   :  { %8979 = vmatprep.mubr.msk.f32.mxu1 %vm57_vm0, %v10102_v47 }
 0x93a   :  { %8980 = vmatmul.mubr.msk.f32.gmra.mrb[96].mxu1 %vm57_vm0, %v10109_v48 }
 0x93b   :  { %9010 = vmatprep.mubr.msk.f32.mxu1 %vm57_vm0, %v10053_v18 }
 0x93e   :  { %9011 = vmatmul.mubr.msk.f32.vlgmr.msra.gmra.mrb[98].mxu1 %vm57_vm0, %v10066_v42 }
 0x93f   :  { %9013 = vmatprep.mubr.msk.f32.mxu1 %vm57_vm0, %v10073_v43 }
 0x942   :  { %9014 = vmatmul.mubr.msk.f32.gmra.mrb[100].mxu1 %vm57_vm0, %v10080_v44 }
 0x943   :  { %9016 = vmatprep.mubr.msk.f32.mxu1 %vm57_vm0, %v10087_v45 }
 0x946   :  { %9017 = vmatmul.mubr.msk.f32.gmra.mrb[102].mxu1 %vm57_vm0, %v10095_v46 }
 0x947   :  { %9019 = vmatprep.mubr.msk.f32.mxu1 %vm57_vm0, %v10102_v47 }
 0x94a   :  { %9020 = vmatmul.mubr.msk.f32.gmra.mrb[104].mxu1 %vm57_vm0, %v10109_v48 }
 0x94b   :  { %9029 = vmatprep.mubr.msk.f32.mxu1 %vm9512_vm1, %v9511_v26 }
 0x9e7   :  { %v4738_v16 = vpop.f32.mrb[82].mxu1 }
 0x9e8   :  { %v8912_v36 = vpop.f32.mrb[83].mxu1  ;;  %8950 = vmatprep.mubr.msk.f32.mxu0 %vm419_vm2, %v4738_v16 }
 0x9eb   :  { %v4811_v39 = vpop.f32.mrb[78].mxu0 }
 0x9ec   :  { %v8917_v15 = vpop.f32.mrb[79].mxu0  ;;  %8951 = vmatmul.mubr.msk.f32.vlgmr.msra.gmra.mrb[56].mxu0 %vm419_vm2, %v4811_v39 }
 0x9ed   :  { %9287 = vmatpush3.bf16.msra.mxu0 %v9284_v3 }
 0x9ee   :  { %9289 = vmatprep.subr.bf16.mxu0 %v9288_v20 }
 0x9ef   :  { %v4957_v22 = vpop.f32.mrb[80].mxu0 }
 0x9f0   :  { %v4884_v27 = vpop.f32.mrb[84].mxu1  ;;  %v8927_v23 = vpop.f32.mrb[81].mxu0 }
 0x9f1   :  { %v8922_v9 = vpop.f32.mrb[85].mxu1  ;;  %8953 = vmatprep.mubr.msk.f32.mxu0 %vm419_vm2, %v4884_v27  ;;  %9291 = vmatpush3.bf16.msra.mxu0 %v9288_v20 }
 0x9f2   :  { %8954 = vmatmul.mubr.msk.f32.gmra.mrb[58].mxu0 %vm419_vm2, %v4957_v22  ;;  %9022 = vmatprep.subr.mxu0 %v9511_v26 }
 0x9f3   :  { %v5103_v24 = vpop.f32.mrb[82].mxu0 }
 0x9f4   :  { %v5030_v11 = vpop.f32.mrb[86].mxu1  ;;  %v8937_v12 = vpop.f32.mrb[83].mxu0 }
 0x9f5   :  { %v8932_v25 = vpop.f32.mrb[87].mxu1  ;;  %8956 = vmatprep.mubr.msk.f32.mxu0 %vm419_vm2, %v5030_v11 }
 0x9f6   :  { %8957 = vmatmul.mubr.msk.f32.gmra.mrb[60].mxu0 %vm419_vm2, %v5103_v24 }
 0x9f7   :  { %v5249_v14 = vpop.f32.mrb[84].mxu0 }
 0x9f8   :  { %v5176_v21 = vpop.f32.mrb[88].mxu1  ;;  %v8947_v30 = vpop.f32.mrb[85].mxu0 }
 0x9f9   :  { %v8942_v29 = vpop.f32.mrb[89].mxu1  ;;  %8959 = vmatprep.mubr.msk.f32.mxu0 %vm419_vm2, %v5176_v21 }
 0x9fa   :  { %8960 = vmatmul.mubr.msk.f32.gmra.mrb[62].mxu0 %vm419_vm2, %v5249_v14 }
 0x9fb   :  { %8990 = vmatprep.mubr.msk.f32.mxu0 %vm57_vm0, %v10053_v18 }
 0x9fe   :  { %8991 = vmatmul.mubr.msk.f32.vlgmr.msra.gmra.mrb[86].mxu0 %vm57_vm0, %v10066_v42 }
 0x9ff   :  { %8993 = vmatprep.mubr.msk.f32.mxu0 %vm57_vm0, %v10073_v43 }
 0xa01   :  { %v8972_v18 = vpop.f32.mrb[90].mxu1 }
 0xa02   :  { %8994 = vmatmul.mubr.msk.f32.gmra.mrb[88].mxu0 %vm57_vm0, %v10080_v44  ;;  %v5471_v42 = vpop.f32.mrb[91].mxu1  ;;  %v5477_v28 = vadd.f32 %v8972_v18, %v8044_v55 }
 0xa03   :  { %8996 = vmatprep.mubr.msk.f32.mxu0 %vm57_vm0, %v10087_v45  ;;  %v5472_v57 = vadd.f32 %v8044_v55, %v5471_v42 }
 0xa05   :  { %v8975_v43 = vpop.f32.mrb[92].mxu1 }
 0xa06   :  { %8997 = vmatmul.mubr.msk.f32.gmra.mrb[90].mxu0 %vm57_vm0, %v10095_v46  ;;  %v5481_v31 = vpop.f32.mrb[93].mxu1  ;;  %v5487_v0 = vadd.f32 %v8975_v43, %v8044_v55 }
 0xa07   :  { %8999 = vmatprep.mubr.msk.f32.mxu0 %vm57_vm0, %v10102_v47  ;;  %v10411_v47 = vld [vmem:[%s10702_s6 + $0x3] ss:$0 sm:$0xff]  ;;  %v5482_v7 = vadd.f32 %v8044_v55, %v5481_v31 }
 0xa09   :  { %v8978_v44 = vpop.f32.mrb[94].mxu1 }
 0xa0a   :  { %9000 = vmatmul.mubr.msk.f32.gmra.mrb[92].mxu0 %vm57_vm0, %v10109_v48  ;;  %v5491_v17 = vpop.f32.mrb[95].mxu1  ;;  %v5497_v10 = vadd.f32 %v8978_v44, %v8044_v55 }
 0xa0b   :  { %9024 = vmatprep.mubr.msk.f32.mxu0 %vm9512_vm1, %v9511_v26  ;;  %v5492_v32 = vadd.f32 %v8044_v55, %v5491_v17 }
 0xa0d   :  { %v8981_v19 = vpop.f32.mrb[96].mxu1 }
 0xa0e   :  { %v10402_v45 = vpop.f32.mrb[97].mxu1  ;;  %v5507_v36 = vadd.f32 %v8981_v19, %v8044_v55 }
 0xa0f   :  { %v5502_v20 = vadd.f32 %v8044_v55, %v10402_v45 }
 0xa11   :  { %v10404_v35 = vpop.f32.mrb[98].mxu1 }
 0xa12   :  { %v10406_v46 = vpop.f32.mrb[99].mxu1  ;;  %v5713_v39 = vadd.f32 %v10404_v35, %v10411_v47 }
 0xa13   :  { %v5708_v15 = vadd.f32 %v10411_v47, %v10406_v46 }
 0xa15   :  { %v9015_v48 = vpop.f32.mrb[100].mxu1 }
 0xa16   :  { %v10414_v37 = vadd.f32 %v9015_v48, %v10411_v47  ;;  %v5717_v38 = vpop.f32.mrb[101].mxu1 }
 0xa17   :  { %v10417_v40 = vadd.f32 %v10411_v47, %v5717_v38 }
 0xa19   :  { %v9018_v41 = vpop.f32.mrb[102].mxu1 }
 0xa1a   :  { %v10420_v49 = vadd.f32 %v9018_v41, %v10411_v47  ;;  %v5727_v50 = vpop.f32.mrb[103].mxu1 }
 0xa1b   :  { %v10423_v59 = vadd.f32 %v10411_v47, %v5727_v50 }
 0xa1d   :  { %v9021_v51 = vpop.f32.mrb[104].mxu1 }
 0xa1e   :  { %v10426_v52 = vadd.f32 %v9021_v51, %v10411_v47  ;;  %v5737_v53 = vpop.f32.mrb[105].mxu1 }
 0xa1f   :  { %v10429_v54 = vadd.f32 %v10411_v47, %v5737_v53 }
 0xad1   :  { %v8992_v60 = vpop.f32.mrb[86].mxu0 }
 0xad2   :  { %v5595_v63 = vadd.f32 %v8992_v60, %v8058_v58  ;;  %v5589_v56 = vpop.f32.mrb[87].mxu0 }
 0xad3   :  { %v5590_v2 = vadd.f32 %v8058_v58, %v5589_v56 }
 0xad4   :  { %9028 = vmatpush3.xpose.msk.msra.mxu1 %vm419_vm2, %v5595_v63 }
 0xad5   :  { %v8995_v3 = vpop.f32.mrb[88].mxu0  ;;  %9023 = vmatpush3.xpose.msk.msra.mxu0 %vm419_vm2, %v5590_v2  ;;  %9037 = vmatprep.subr.mxu1 %v9511_v26 }
 0xad6   :  { %v5605_v5 = vadd.f32 %v8995_v3, %v8058_v58  ;;  %v5599_v61 = vpop.f32.mrb[89].mxu0  ;;  %9032 = vmatprep.subr.mxu0 %v9511_v26 }
 0xad7   :  { %v5600_v62 = vadd.f32 %v8058_v58, %v5599_v61  ;;  %9030 = vmatmul.mubr.msk.f32.vlgmr.msra.gmra.mrb[106].mxu1 %vm419_vm2, %v5477_v28 }
 0xad8   :  { %9025 = vmatmul.mubr.msk.f32.vlgmr.msra.gmra.mrb[94].mxu0 %vm419_vm2, %v5472_v57  ;;  %9038 = vmatpush3.xpose.msk.msra.mxu1 %vm419_vm2, %v5605_v5 }
 0xad9   :  { %v8998_v1 = vpop.f32.mrb[90].mxu0  ;;  %9033 = vmatpush3.xpose.msk.msra.mxu0 %vm419_vm2, %v5600_v62  ;;  %9039 = vmatprep.mubr.msk.f32.mxu1 %vm9512_vm1, %v9511_v26 }
 0xada   :  { %v5615_v4 = vadd.f32 %v8998_v1, %v8058_v58  ;;  %v5609_v6 = vpop.f32.mrb[91].mxu0  ;;  %9034 = vmatprep.mubr.msk.f32.mxu0 %vm9512_vm1, %v9511_v26  ;;  %9047 = vmatprep.subr.mxu1 %v9511_v26 }
 0xadb   :  { %v5610_v8 = vadd.f32 %v8058_v58, %v5609_v6  ;;  %9040 = vmatmul.mubr.msk.f32.vlgmr.msra.gmra.mrb[108].mxu1 %vm419_vm2, %v5487_v0  ;;  %9042 = vmatprep.subr.mxu0 %v9511_v26 }
 0xadc   :  { %9035 = vmatmul.mubr.msk.f32.vlgmr.msra.gmra.mrb[96].mxu0 %vm419_vm2, %v5482_v7  ;;  %9048 = vmatpush3.xpose.msk.msra.mxu1 %vm419_vm2, %v5615_v4 }
 0xadd   :  { %v9001_v13 = vpop.f32.mrb[92].mxu0  ;;  %9043 = vmatpush3.xpose.msk.msra.mxu0 %vm419_vm2, %v5610_v8  ;;  %9049 = vmatprep.mubr.msk.f32.mxu1 %vm9512_vm1, %v9511_v26 }
 0xade   :  { %v5625_v16 = vadd.f32 %v9001_v13, %v8058_v58  ;;  %v5619_v34 = vpop.f32.mrb[93].mxu0  ;;  %9044 = vmatprep.mubr.msk.f32.mxu0 %vm9512_vm1, %v9511_v26  ;;  %9057 = vmatprep.subr.mxu1 %v9511_v26 }
 0xadf   :  { %v5620_v33 = vadd.f32 %v8058_v58, %v5619_v34  ;;  %9050 = vmatmul.mubr.msk.f32.vlgmr.msra.gmra.mrb[110].mxu1 %vm419_vm2, %v5497_v10  ;;  %9052 = vmatprep.subr.mxu0 %v9511_v26 }
 0xae0   :  { %9045 = vmatmul.mubr.msk.f32.vlgmr.msra.gmra.mrb[98].mxu0 %vm419_vm2, %v5492_v32  ;;  %9058 = vmatpush3.xpose.msk.msra.mxu1 %vm419_vm2, %v5625_v16 }
 0xae1   :  { %9053 = vmatpush3.xpose.msk.msra.mxu0 %vm419_vm2, %v5620_v33  ;;  %9059 = vmatprep.mubr.msk.f32.mxu1 %vm9512_vm1, %v9511_v26 }
 0xae2   :  { %9054 = vmatprep.mubr.msk.f32.mxu0 %vm9512_vm1, %v9511_v26  ;;  %9062 = vmatprep.subr.mxu0 %v9511_v26 }
 0xae3   :  { %9060 = vmatmul.mubr.msk.f32.vlgmr.msra.gmra.mrb[112].mxu1 %vm419_vm2, %v5507_v36  ;;  %9067 = vmatprep.subr.mxu1 %v9511_v26 }
 0xae4   :  { %9055 = vmatmul.mubr.msk.f32.vlgmr.msra.gmra.mrb[100].mxu0 %vm419_vm2, %v5502_v20  ;;  %9068 = vmatpush3.msra.mxu1 %v5713_v39 }
 0xae5   :  { %9063 = vmatpush3.msra.mxu0 %v5708_v15  ;;  %9069 = vmatprep.mubr.msk.f32.mxu1 %vm9512_vm1, %v9511_v26 }
 0xae6   :  { %9077 = vmatprep.subr.mxu1 %v9511_v26  ;;  %9064 = vmatprep.mubr.msk.f32.mxu0 %vm9512_vm1, %v9511_v26 }
 0xae7   :  { %9072 = vmatprep.subr.mxu0 %v9511_v26 }
 0xbaa   :  { %v5894_v22 = vpop.f32.mrb[106].mxu1 }
 0xbab   :  { %v6355_v27 = vmul.f32 0.35355338, %v5894_v22  ;;  %v5818_v23 = vpop.f32.mrb[94].mxu0  ;;  %v9031_v9 = vpop.f32.mrb[107].mxu1 }
 0xbac   :  { %v6354_v24 = vmul.f32 0.35355338, %v5818_v23  ;;  %v9026_v11 = vpop.f32.mrb[95].mxu0 }
 0xbad   :  { %v6365_v12 = vsel %vm419_vm2, %v6355_v27, -inf }
 0xbae   :  { %6366 = vmax.xlane.f32.xlu1 %v6365_v12  ;;  %v6046_v25 = vpop.f32.mrb[108].mxu1  ;;  %v6362_v14 = vsel %vm419_vm2, %v6354_v24, -inf }
 0xbaf   :  { %v6357_v21 = vmul.f32 0.35355338, %v6046_v25  ;;  %6363 = vmax.xlane.f32.xlu0 %v6362_v14  ;;  %v5970_v30 = vpop.f32.mrb[96].mxu0  ;;  %v9041_v29 = vpop.f32.mrb[109].mxu1 }
 0xbb0   :  { %v6356_v18 = vmul.f32 0.35355338, %v5970_v30  ;;  %v9036_v42 = vpop.f32.mrb[97].mxu0 }
 0xbb1   :  { %v6371_v43 = vsel %vm419_vm2, %v6357_v21, -inf }
 0xbb2   :  { %6372 = vmax.xlane.f32.xlu1 %v6371_v43  ;;  %v6198_v31 = vpop.f32.mrb[110].mxu1  ;;  %v6368_v44 = vsel %vm419_vm2, %v6356_v18, -inf }
 0xbb3   :  { %v6359_v17 = vmul.f32 0.35355338, %v6198_v31  ;;  %6369 = vmax.xlane.f32.xlu0 %v6368_v44  ;;  %v6122_v19 = vpop.f32.mrb[98].mxu0  ;;  %v9051_v45 = vpop.f32.mrb[111].mxu1 }
 0xbb4   :  { %v6358_v35 = vmul.f32 0.35355338, %v6122_v19  ;;  %v9046_v46 = vpop.f32.mrb[99].mxu0 }
 0xbb5   :  { %v6377_v47 = vsel %vm419_vm2, %v6359_v17, -inf }
 0xbb6   :  { %6378 = vmax.xlane.f32.xlu1 %v6377_v47  ;;  %v6350_v48 = vpop.f32.mrb[112].mxu1  ;;  %v6374_v38 = vsel %vm419_vm2, %v6358_v35, -inf }
 0xbb7   :  { %v6361_v41 = vmul.f32 0.35355338, %v6350_v48  ;;  %6375 = vmax.xlane.f32.xlu0 %v6374_v38  ;;  %v6274_v50 = vpop.f32.mrb[100].mxu0  ;;  %v9061_v51 = vpop.f32.mrb[113].mxu1 }
 0xbb8   :  { %v6360_v53 = vmul.f32 0.35355338, %v6274_v50  ;;  %v9056_v58 = vpop.f32.mrb[101].mxu0 }
 0xbb9   :  { %v6383_v55 = vsel %vm419_vm2, %v6361_v41, -inf }
 0xbba   :  { %6384 = vmax.xlane.f32.xlu1 %v6383_v55  ;;  %v6380_v60 = vsel %vm419_vm2, %v6360_v53, -inf }
 0xbbb   :  { %6381 = vmax.xlane.f32.xlu0 %v6380_v60 }
 0xc3b   :  { %v6367_v63 = vpop.xlane.xlu1 %6366 }
 0xc3c   :  { %v6387_v56 = vsub.f32 %v6355_v27, %v6367_v63  ;;  %v6364_v2 = vpop.xlane.xlu0 %6363 }
 0xc3d   :  { %v6386_v28 = vsub.f32 %v6354_v24, %v6364_v2 }
 0xc3e   :  { %v6396_v57 = vmul.f32 1.442695, %v6387_v56 }
 0xc3f   :  { %v6394_v3 = vmul.f32 1.442695, %v6386_v28  ;;  %v6373_v5 = vpop.xlane.xlu1 %6372  ;;  %v8115_v28 = vld [vmem:[%s10704_s9 + $0x20] sm:$0xff] }
 0xc40   :  { %9471 = vpow2.f32 %v6396_v57  ;;  %v6389_v61 = vsub.f32 %v6357_v21, %v6373_v5  ;;  %v6370_v62 = vpop.xlane.xlu0 %6369  ;;  %v8116_v57 = vld [vmem:[%s10704_s9 + $0x28] sm:$0xff] }
 0xc41   :  { %9473 = vpow2.f32 %v6394_v3  ;;  %v6388_v0 = vsub.f32 %v6356_v18, %v6370_v62  ;;  %v8117_v3 = vld [vmem:[%s10704_s9 + $0x30] sm:$0xff]  ;;  %v9301_v5 = vpack.c.bf16 %v8116_v57, %v8115_v28  ;;  %v8137_v28 = vld [vmem:[%s10704_s9 + $0xa8] sm:$0xff] }
 0xc42   :  { %v6400_v7 = vmul.f32 1.442695, %v6389_v61  ;;  %v8118_v61 = vld [vmem:[%s10704_s9 + $0x38] sm:$0xff] }
 0xc43   :  { %v6398_v1 = vmul.f32 1.442695, %v6388_v0  ;;  %v6379_v4 = vpop.xlane.xlu1 %6378  ;;  %v9304_v62 = vpack.c.bf16 %v8118_v61, %v8117_v3  ;;  %v8143_v3 = vld [vmem:[%s10704_s9 + $0xd0] sm:$0xff] }
 0xc44   :  { %9475 = vpow2.f32 %v6400_v7  ;;  %v6391_v6 = vsub.f32 %v6359_v17, %v6379_v4  ;;  %v6376_v8 = vpop.xlane.xlu0 %6375 }
 0xc45   :  { %9477 = vpow2.f32 %v6398_v1  ;;  %v6390_v10 = vsub.f32 %v6358_v35, %v6376_v8 }
 0xc46   :  { %v6404_v32 = vmul.f32 1.442695, %v6391_v6 }
 0xc47   :  { %v6402_v13 = vmul.f32 1.442695, %v6390_v10  ;;  %v6385_v16 = vpop.xlane.xlu1 %6384 }
 0xc48   :  { %9479 = vpow2.f32 %v6404_v32  ;;  %v6393_v34 = vsub.f32 %v6361_v41, %v6385_v16  ;;  %v6382_v33 = vpop.xlane.xlu0 %6381 }
 0xc49   :  { %9481 = vpow2.f32 %v6402_v13  ;;  %v6392_v36 = vsub.f32 %v6360_v53, %v6382_v33 }
 0xc4a   :  { %v9472_v20 = vpop.eup %9471  ;;  %v6408_v39 = vmul.f32 1.442695, %v6393_v34 }
 0xc4b   :  { %v9474_v15 = vpop.eup %9473  ;;  %v6406_v22 = vmul.f32 1.442695, %v6392_v36  ;;  %v6413_v27 = vsel %vm419_vm2, %v9472_v20, 0.0 }
 0xc4c   :  { %9483 = vpow2.f32 %v6408_v39  ;;  %6414 = vadd.xlane.f32.xlu1 %v6413_v27  ;;  %v6410_v23 = vsel %vm419_vm2, %v9474_v15, 0.0  ;;  %v8122_v27 = vld [vmem:[%s10704_s9 + $0x48] sm:$0xff] }
 0xc4d   :  { %9485 = vpow2.f32 %v6406_v22  ;;  %6411 = vadd.xlane.f32.xlu0 %v6410_v23  ;;  %v8121_v22 = vld [vmem:[%s10704_s9 + $0x40] sm:$0xff] }
 0xc4e   :  { %v9476_v9 = vpop.eup %9475  ;;  %v9313_v23 = vpack.c.bf16 %v8122_v27, %v8121_v22 }
 0xc4f   :  { %v9478_v24 = vpop.eup %9477  ;;  %v6419_v11 = vsel %vm419_vm2, %v9476_v9, 0.0 }
 0xc50   :  { %6420 = vadd.xlane.f32.xlu1 %v6419_v11  ;;  %v6416_v12 = vsel %vm419_vm2, %v9478_v24, 0.0 }
 0xc51   :  { %6417 = vadd.xlane.f32.xlu0 %v6416_v12  ;;  %v7188_v12 = vld [vmem:[%s10704_s9] sm:$0xff] }
 0xc52   :  { %v9480_v25 = vpop.eup %9479 }
 0xc53   :  { %v9482_v14 = vpop.eup %9481  ;;  %v6425_v21 = vsel %vm419_vm2, %v9480_v25, 0.0 }
 0xc54   :  { %6426 = vadd.xlane.f32.xlu1 %v6425_v21  ;;  %v6422_v30 = vsel %vm419_vm2, %v9482_v14, 0.0 }
 0xc55   :  { %6423 = vadd.xlane.f32.xlu0 %v6422_v30 }
 0xc56   :  { %v9484_v29 = vpop.eup %9483 }
 0xc57   :  { %v9486_v18 = vpop.eup %9485  ;;  %v6431_v42 = vsel %vm419_vm2, %v9484_v29, 0.0 }
 0xc58   :  { %6432 = vadd.xlane.f32.xlu1 %v6431_v42  ;;  %v6428_v43 = vsel %vm419_vm2, %v9486_v18, 0.0  ;;  %v7190_v42 = vld [vmem:[%s10704_s9 + $0x10] sm:$0xff] }
 0xc59   :  { %6429 = vadd.xlane.f32.xlu0 %v6428_v43  ;;  %v7191_v43 = vld [vmem:[%s10704_s9 + $0x18] sm:$0xff] }
 0xcd9   :  { %v6415_v31 = vpop.xlane.xlu1 %6414 }
 0xcda   :  { %9487 = vrcp.f32 %v6415_v31  ;;  %v6412_v44 = vpop.xlane.xlu0 %6411  ;;  %v8131_v31 = vld [vmem:[%s10704_s9 + $0x80] sm:$0xff] }
 0xcdb   :  { %9489 = vrcp.f32 %v6412_v44  ;;  %v8132_v44 = vld [vmem:[%s10704_s9 + $0x88] sm:$0xff] }
 0xcdd   :  { %v6421_v17 = vpop.xlane.xlu1 %6420 }
 0xcde   :  { %9491 = vrcp.f32 %v6421_v17  ;;  %v6418_v19 = vpop.xlane.xlu0 %6417 }
 0xcdf   :  { %9493 = vrcp.f32 %v6418_v19  ;;  %v9310_v19 = vpack.c.bf16 %v7191_v43, %v7190_v42 }
 0xce1   :  { %v6427_v45 = vpop.xlane.xlu1 %6426 }
 0xce2   :  { %9495 = vrcp.f32 %v6427_v45  ;;  %v6424_v35 = vpop.xlane.xlu0 %6423 }
 0xce3   :  { %9497 = vrcp.f32 %v6424_v35  ;;  %v9325_v35 = vpack.c.bf16 %v8132_v44, %v8131_v31  ;;  %v8151_v44 = vld [vmem:[%s10706_s10] ss:$0 sm:$0xff] }
 0xce4   :  { %v9488_v46 = vpop.eup %9487 }
 0xce5   :  { %v9490_v47 = vpop.eup %9489  ;;  %v6437_v48 = vmul.f32 %v9488_v46, %v9472_v20  ;;  %v6433_v38 = vpop.xlane.xlu1 %6432  ;;  %v8126_v46 = vld [vmem:[%s10704_s9 + $0x60] sm:$0xff] }
 0xce6   :  { %v6435_v41 = vmul.f32 %v9490_v47, %v9474_v15  ;;  %9499 = vrcp.f32 %v6433_v38  ;;  %v6430_v50 = vpop.xlane.xlu0 %6429  ;;  %v8127_v47 = vld [vmem:[%s10704_s9 + $0x68] sm:$0xff]  ;;  %v8133_v38 = vld [vmem:[%s10704_s9 + $0x90] sm:$0xff] }
 0xce7   :  { %9501 = vrcp.f32 %v6430_v50  ;;  %9070 = vmatmul.mubr.msk.f32.vlgmr.msra.gmra.mrb[114].mxu1 %vm419_vm2, %v6437_v48 }
 0xce8   :  { %v9492_v51 = vpop.eup %9491  ;;  %9078 = vmatpush3.msra.mxu1 %v10414_v37  ;;  %9065 = vmatmul.mubr.msk.f32.vlgmr.msra.gmra.mrb[102].mxu0 %vm419_vm2, %v6435_v41  ;;  %v8134_v41 = vld [vmem:[%s10704_s9 + $0x98] sm:$0xff] }
 0xce9   :  { %v9494_v53 = vpop.eup %9493  ;;  %v6441_v58 = vmul.f32 %v9492_v51, %v9476_v9  ;;  %9073 = vmatpush3.msra.mxu0 %v10417_v40  ;;  %9079 = vmatprep.mubr.msk.f32.mxu1 %vm9512_vm1, %v9511_v26  ;;  %v8123_v9 = vld [vmem:[%s10704_s9 + $0x50] sm:$0xff]  ;;  %v9319_v51 = vpack.c.bf16 %v8127_v47, %v8126_v46 }
 0xcea   :  { %v6439_v55 = vmul.f32 %v9494_v53, %v9478_v24  ;;  %9087 = vmatprep.subr.mxu1 %v9511_v26  ;;  %9074 = vmatprep.mubr.msk.f32.mxu0 %vm9512_vm1, %v9511_v26  ;;  %v8124_v24 = vld [vmem:[%s10704_s9 + $0x58] sm:$0xff] }
 0xceb   :  { %9080 = vmatmul.mubr.msk.f32.vlgmr.msra.gmra.mrb[116].mxu1 %vm419_vm2, %v6441_v58  ;;  %9082 = vmatprep.subr.mxu0 %v9511_v26  ;;  %v9316_v11 = vpack.c.bf16 %v8124_v24, %v8123_v9 }
 0xcec   :  { %v9496_v37 = vpop.eup %9495  ;;  %9088 = vmatpush3.msra.mxu1 %v10420_v49  ;;  %9075 = vmatmul.mubr.msk.f32.vlgmr.msra.gmra.mrb[104].mxu0 %vm419_vm2, %v6439_v55  ;;  %v9328_v55 = vpack.c.bf16 %v8134_v41, %v8133_v38 }
 0xced   :  { %v9498_v60 = vpop.eup %9497  ;;  %v6445_v40 = vmul.f32 %v9496_v37, %v9480_v25  ;;  %9083 = vmatpush3.msra.mxu0 %v10423_v59  ;;  %9089 = vmatprep.mubr.msk.f32.mxu1 %vm9512_vm1, %v9511_v26  ;;  %v7189_v25 = vld [vmem:[%s10704_s9 + $0x8] sm:$0xff]  ;;  %v8128_v37 = vld [vmem:[%s10704_s9 + $0x70] sm:$0xff] }
 0xcee   :  { %v6443_v63 = vmul.f32 %v9498_v60, %v9482_v14  ;;  %9097 = vmatprep.subr.mxu1 %v9511_v26  ;;  %9084 = vmatprep.mubr.msk.f32.mxu0 %vm9512_vm1, %v9511_v26  ;;  %v10584_v14 = vld [vmem:[%s10705_s8] ss:$0 sm:$0xff]  ;;  %v9307_v30 = vpack.c.bf16 %v7189_v25, %v7188_v12  ;;  %v8129_v60 = vld [vmem:[%s10704_s9 + $0x78] sm:$0xff] }
 0xcef   :  { %9090 = vmatmul.mubr.msk.f32.vlgmr.msra.gmra.mrb[118].mxu1 %vm419_vm2, %v6445_v40  ;;  %9092 = vmatprep.subr.mxu0 %v9511_v26  ;;  %v8141_v40 = vld [vmem:[%s10704_s9 + $0xc0] sm:$0xff] }
 0xcf0   :  { %v9500_v49 = vpop.eup %9499  ;;  %9098 = vmatpush3.msra.mxu1 %v10426_v52  ;;  %9085 = vmatmul.mubr.msk.f32.vlgmr.msra.gmra.mrb[106].mxu0 %vm419_vm2, %v6443_v63  ;;  %v8105_v52 = vld [vmem:[%s10703_s7 + $0x18] sm:$0xff]  ;;  %v8142_v63 = vld [vmem:[%s10704_s9 + $0xc8] sm:$0xff] }
 0xcf1   :  { %v9502_v56 = vpop.eup %9501  ;;  %v6449_v59 = vmul.f32 %v9500_v49, %v9484_v29  ;;  %9093 = vmatpush3.msra.mxu0 %v10429_v54  ;;  %9099 = vmatprep.mubr.msk.f32.mxu1 %vm9512_vm1, %v9511_v26  ;;  %v9513_v54 = vmov 0.0|0.0  }
 0xcf2   :  { %v6447_v2 = vmul.f32 %v9502_v56, %v9486_v18  ;;  %9094 = vmatprep.mubr.msk.f32.mxu0 %vm9512_vm1, %v9511_v26  ;;  %9102 = vmatprep.subr.mxu0 %v8105_v52  ;;  %v9322_v56 = vpack.c.bf16 %v8129_v60, %v8128_v37 }
 0xcf3   :  { %9100 = vmatmul.mubr.msk.f32.vlgmr.msra.gmra.mrb[120].mxu1 %vm419_vm2, %v6449_v59  ;;  %9300 = vmatprep.subr.bf16.mxu1 %v9513_v54 }
 0xcf4   :  { %9095 = vmatmul.mubr.msk.f32.vlgmr.msra.gmra.mrb[108].mxu0 %vm419_vm2, %v6447_v2  ;;  %9124 = vmatprep.mubr.msk.f32.mxu1 %vm9512_vm1, %v9511_v26  ;;  %v9337_v2 = vpack.c.bf16 %v8142_v63, %v8141_v40 }
 0xcf5   :  { %9103 = vmatpush3.msra.mxu0 %v8105_v52  ;;  %9302 = vmatpush3.bf16.msra.mxu1 %v9301_v5  ;;  %v8136_v52 = vld [vmem:[%s10704_s9 + $0xa0] sm:$0xff]  ;;  %v8144_v5 = vld [vmem:[%s10704_s9 + $0xd8] sm:$0xff] }
 0xcf6   :  { %9312 = vmatprep.subr.bf16.mxu0 %v9513_v54  ;;  %9303 = vmatprep.subr.bf16.mxu1 %v9513_v54  ;;  %v9331_v61 = vpack.c.bf16 %v8137_v28, %v8136_v52 }
 0xcf9   :  { %9305 = vmatpush3.bf16.msra.mxu1 %v9304_v62 }
 0xcfa   :  { %9306 = vmatprep.subr.bf16.mxu1 %v9513_v54 }
 0xdba   :  { %v6592_v0 = vpop.f32.mrb[114].mxu1 }
 0xdbb   :  { %v6519_v7 = vpop.f32.mrb[102].mxu0  ;;  %v9071_v1 = vpop.f32.mrb[115].mxu1 }
 0xdbc   :  { %v9066_v4 = vpop.f32.mrb[103].mxu0  ;;  %9104 = vmatprep.mubr.msk.f32.mxu0 %vm419_vm2, %v6519_v7  ;;  %v8138_v7 = vld [vmem:[%s10704_s9 + $0xb0] sm:$0xff]  ;;  %v8139_v1 = vld [vmem:[%s10704_s9 + $0xb8] sm:$0xff] }
 0xdbd   :  { %9105 = vmatmul.mubr.msk.f32.vlgmr.msra.gmra.mrb[56].mxu0 %vm419_vm2, %v6592_v0  ;;  %v9340_v0 = vpack.c.bf16 %v8144_v5, %v8143_v3  ;;  %v9334_v4 = vpack.c.bf16 %v8139_v1, %v8138_v7 }
 0xdbe   :  { %v6738_v6 = vpop.f32.mrb[116].mxu1  ;;  %9314 = vmatpush3.bf16.msra.mxu0 %v9313_v23 }
 0xdbf   :  { %v6665_v8 = vpop.f32.mrb[104].mxu0  ;;  %v9081_v10 = vpop.f32.mrb[117].mxu1  ;;  %9315 = vmatprep.subr.bf16.mxu0 %v9513_v54 }
 0xdc0   :  { %v9076_v32 = vpop.f32.mrb[105].mxu0  ;;  %9107 = vmatprep.mubr.msk.f32.mxu0 %vm419_vm2, %v6665_v8  ;;  %v8147_v8 = vld [vmem:[%s10704_s9 + $0xe8] sm:$0xff] }
 0xdc1   :  { %9108 = vmatmul.mubr.msk.f32.gmra.mrb[58].mxu0 %vm419_vm2, %v6738_v6  ;;  %v8146_v6 = vld [vmem:[%s10704_s9 + $0xe0] sm:$0xff] }
 0xdc2   :  { %v6884_v13 = vpop.f32.mrb[118].mxu1  ;;  %9317 = vmatpush3.bf16.msra.mxu0 %v9316_v11  ;;  %v9343_v32 = vpack.c.bf16 %v8147_v8, %v8146_v6 }
 0xdc3   :  { %v6811_v16 = vpop.f32.mrb[106].mxu0  ;;  %v9091_v34 = vpop.f32.mrb[119].mxu1  ;;  %9324 = vmatprep.subr.bf16.mxu0 %v9513_v54 }
 0xdc4   :  { %v9086_v33 = vpop.f32.mrb[107].mxu0  ;;  %9110 = vmatprep.mubr.msk.f32.mxu0 %vm419_vm2, %v6811_v16  ;;  %v8148_v16 = vld [vmem:[%s10704_s9 + $0xf0] sm:$0xff]  ;;  %v8149_v34 = vld [vmem:[%s10704_s9 + $0xf8] sm:$0xff] }
 0xdc5   :  { %9111 = vmatmul.mubr.msk.f32.gmra.mrb[60].mxu0 %vm419_vm2, %v6884_v13  ;;  %v9346_v33 = vpack.c.bf16 %v8149_v34, %v8148_v16 }
 0xdc6   :  { %v7030_v36 = vpop.f32.mrb[120].mxu1 }
 0xdc7   :  { %v6957_v20 = vpop.f32.mrb[108].mxu0  ;;  %v9101_v39 = vpop.f32.mrb[121].mxu1 }
 0xdc8   :  { %v9096_v15 = vpop.f32.mrb[109].mxu0  ;;  %9113 = vmatprep.mubr.msk.f32.mxu0 %vm419_vm2, %v6957_v20 }
 0xdc9   :  { %9114 = vmatmul.mubr.msk.f32.gmra.mrb[62].mxu0 %vm419_vm2, %v7030_v36 }
 0xdca   :  { %9146 = vmatprep.mubr.msk.f32.mxu0 %vm9512_vm1, %v9511_v26 }
 0xe90   :  { %v9106_v21 = vpop.f32.mrb[56].mxu0 }
 0xe91   :  { %v7181_v29 = vadd.f32 %v9106_v21, %v10584_v14  ;;  %v7126_v18 = vpop.f32.mrb[57].mxu0 }
 0xe92   :  { %v7180_v53 = vadd.f32 %v10584_v14, %v7126_v18 }
 0xe93   :  { %9125 = vmatmul.mubr.msk.f32.vlgmr.msra.gmra.mrb[122].mxu1 %vm57_vm0, %v7181_v29 }
 0xe94   :  { %9308 = vmatpush3.bf16.msra.mxu1 %v9307_v30  ;;  %v9109_v17 = vpop.f32.mrb[58].mxu0  ;;  %9135 = vmatprep.mubr.msk.f32.mxu1 %vm9512_vm1, %v9511_v26 }
 0xe95   :  { %v7136_v45 = vpop.f32.mrb[59].mxu0  ;;  %9309 = vmatprep.subr.bf16.mxu1 %v9513_v54  ;;  %v7183_v62 = vadd.f32 %v9109_v17, %v10584_v14 }
 0xe96   :  { %v7182_v48 = vadd.f32 %v10584_v14, %v7136_v45 }
 0xe98   :  { %9311 = vmatpush3.bf16.msra.mxu1 %v9310_v19  ;;  %v9112_v50 = vpop.f32.mrb[60].mxu0  ;;  %9147 = vmatmul.mubr.msk.f32.vlgmr.msra.gmra.mrb[110].mxu0 %vm57_vm0, %v7182_v48 }
 0xe99   :  { %9326 = vmatpush3.bf16.msra.mxu0 %v9325_v35  ;;  %v7146_v58 = vpop.f32.mrb[61].mxu0  ;;  %9318 = vmatprep.subr.bf16.mxu1 %v9513_v54  ;;  %v7185_v13 = vadd.f32 %v9112_v50, %v10584_v14 }
 0xe9a   :  { %9327 = vmatprep.subr.bf16.mxu0 %v9513_v54  ;;  %9168 = vmatprep.mubr.msk.f32.mxu0 %vm9512_vm1, %v9511_v26  ;;  %v7184_v57 = vadd.f32 %v10584_v14, %v7146_v58 }
 0xe9b   :  { %9136 = vmatmul.mubr.msk.f32.vlgmr.msra.gmra.mrb[124].mxu1 %vm57_vm0, %v7180_v53 }
 0xe9c   :  { %9320 = vmatpush3.bf16.msra.mxu1 %v9319_v51  ;;  %v9115_v49 = vpop.f32.mrb[62].mxu0  ;;  %9157 = vmatprep.mubr.msk.f32.mxu1 %vm9512_vm1, %v9511_v26 }
 0xe9d   :  { %9329 = vmatpush3.bf16.msra.mxu0 %v9328_v55  ;;  %v7156_v59 = vpop.f32.mrb[63].mxu0  ;;  %9321 = vmatprep.subr.bf16.mxu1 %v9513_v54  ;;  %v7187_v36 = vadd.f32 %v9115_v49, %v10584_v14 }
 0xe9e   :  { %9336 = vmatprep.subr.bf16.mxu0 %v9513_v54  ;;  %v7186_v10 = vadd.f32 %v10584_v14, %v7156_v59 }
 0xea0   :  { %9323 = vmatpush3.bf16.msra.mxu1 %v9322_v56  ;;  %9169 = vmatmul.mubr.msk.f32.vlgmr.msra.gmra.mrb[112].mxu0 %vm57_vm0, %v7184_v57 }
 0xea1   :  { %9338 = vmatpush3.bf16.msra.mxu0 %v9337_v2  ;;  %9330 = vmatprep.subr.bf16.mxu1 %v9513_v54 }
 0xea2   :  { %9339 = vmatprep.subr.bf16.mxu0 %v9513_v54  ;;  %9190 = vmatprep.mubr.msk.f32.mxu0 %vm9512_vm1, %v9511_v26 }
 0xea3   :  { %9158 = vmatmul.mubr.msk.f32.vlgmr.msra.gmra.mrb[126].mxu1 %vm57_vm0, %v7183_v62 }
 0xea4   :  { %9332 = vmatpush3.bf16.msra.mxu1 %v9331_v61  ;;  %9179 = vmatprep.mubr.msk.f32.mxu1 %vm9512_vm1, %v9511_v26 }
 0xea5   :  { %9341 = vmatpush3.bf16.msra.mxu0 %v9340_v0  ;;  %9333 = vmatprep.subr.bf16.mxu1 %v9513_v54 }
 0xea8   :  { %9335 = vmatpush3.bf16.msra.mxu1 %v9334_v4  ;;  %9191 = vmatmul.mubr.msk.f32.vlgmr.msra.gmra.mrb[114].mxu0 %vm57_vm0, %v7186_v10 }
 0xea9   :  { %9342 = vmatprep.subr.bf16.mxu1 %v9513_v54 }
 0xeab   :  { %9180 = vmatmul.mubr.msk.f32.vlgmr.msra.gmra.mrb[128].mxu1 %vm57_vm0, %v7185_v13 }
 0xeac   :  { %9344 = vmatpush3.bf16.msra.mxu1 %v9343_v32  ;;  %9201 = vmatprep.mubr.msk.f32.mxu1 %vm9512_vm1, %v9511_v26 }
 0xead   :  { %9345 = vmatprep.subr.bf16.mxu1 %v9513_v54 }
 0xeb0   :  { %9347 = vmatpush3.bf16.msra.mxu1 %v9346_v33 }
 0xeb3   :  { %9202 = vmatmul.mubr.msk.f32.vlgmr.msra.gmra.mrb[130].mxu1 %vm57_vm0, %v7187_v36 }
 0xf66   :  { %v7266_v20 = vpop.f32.mrb[122].mxu1 }
 0xf67   :  { %v9126_v39 = vpop.f32.mrb[123].mxu1 }
 0xf6b   :  { %v7417_v15 = vpop.f32.mrb[110].mxu0 }
 0xf6c   :  { %v9148_v22 = vpop.f32.mrb[111].mxu0 }
 0xf6e   :  { %v7339_v27 = vpop.f32.mrb[124].mxu1 }
 0xf6f   :  { %v7340_v23 = vadd.f32 %v7339_v27, %v7266_v20  ;;  %v9137_v9 = vpop.f32.mrb[125].mxu1 }
 0xf71   :  { %v7421_v24 = vadd.f32 %v7417_v15, %v7340_v23 }
 0xf73   :  { %v7575_v11 = vpop.f32.mrb[112].mxu0 }
 0xf74   :  { %v9170_v12 = vpop.f32.mrb[113].mxu0 }
 0xf76   :  { %v7496_v25 = vpop.f32.mrb[126].mxu1 }
 0xf77   :  { %v7500_v21 = vadd.f32 %v7496_v25, %v7421_v24  ;;  %v9159_v26 = vpop.f32.mrb[127].mxu1 }
 0xf79   :  { %v7579_v30 = vadd.f32 %v7575_v11, %v7500_v21 }
 0xf7b   :  { %v7733_v54 = vpop.f32.mrb[114].mxu0 }
 0xf7c   :  { %v9192_v29 = vpop.f32.mrb[115].mxu0 }
 0xf7e   :  { %v7654_v18 = vpop.f32.mrb[128].mxu1 }
 0xf7f   :  { %v7658_v14 = vadd.f32 %v7654_v18, %v7579_v30  ;;  %v9181_v42 = vpop.f32.mrb[129].mxu1 }
 0xf81   :  { %v7737_v43 = vadd.f32 %v7733_v54, %v7658_v14 }
 0xf86   :  { %v7812_v31 = vpop.f32.mrb[130].mxu1 }
 0xf87   :  { %v7816_v17 = vadd.f32 %v7812_v31, %v7737_v43  ;;  %v9203_v19 = vpop.f32.mrb[131].mxu1 }
 0xf89   :  { %v7824_v45 = vadd.f32 %v8151_v44, %v7816_v17 }
 0xf8b   :  { %7825 = vst [vmem:[%s10707_s11] sm:$0xff] %v7824_v45 }

</bundles_post_ra>
